<compile_context>
chip_gen: v7x
topology: tpu7x:2x2x1
jax: 0.10.0
libtpu: 0.0.40
codegen_flags: <defaults>
</compile_context>

<pallas_src>
import jax
import jax.numpy as jnp
import numpy as np
from jax.experimental import pallas as pl
from jax.experimental.pallas import tpu as pltpu

D = 768  # nn.Linear(768, 1)


def _pair_head_kernel(x_ref, w_ref, b_ref, y_ref, pred_ref, loss_ref):
    """One grid step = one (tn, 768) row tile, two fused heads.

      z     = x @ [wS|wE] + [bS|bE]            (tn, 2)  MXU, f32 accumulate
      mask  = (y[:, 0] >= 0)                   column-0 labels gate BOTH heads
                                               (matches the PyTorch module:
                                                loss weight & pred mask come
                                                from the *_S labels)
      pred  = sigmoid(z) * mask
      loss  = mask * bce_with_logits(z, y)     per-element; summed outside
    """
    x = x_ref[...]                                                   # (tn, D)
    z = jnp.dot(x, w_ref[...], preferred_element_type=jnp.float32)   # (tn, 2)
    z = z + b_ref[...]                                               # +(1, 2)

    y = y_ref[...]                                                   # (tn, 2) f32
    mask = (y[:, 0:1] >= 0.0).astype(jnp.float32)                    # (tn, 1)

    pred_ref[...] = (jax.nn.sigmoid(z) * mask).astype(pred_ref.dtype)

    # Numerically-stable BCEWithLogits: max(z,0) - z*y + log1p(exp(-|z|))
    l = jnp.maximum(z, 0.0) - z * y + jnp.log1p(jnp.exp(-jnp.abs(z)))
    loss_ref[...] = (l * mask).astype(loss_ref.dtype)


def _round_up(n, m):
    return (n + m - 1) // m * m


def _choose_tile(n, target_tn):
    """Pick (tile_rows, padded_rows).  Prefer a tile that divides the (8-aligned)
    row count exactly so the big feature slab never needs a host-side pad copy."""
    n8 = _round_up(n, 8)
    if n8 <= target_tn:
        return n8, n8
    for cand in range(target_tn, 255, -8):     # biggest divisor-tile >= 256 rows
        if n8 % cand == 0:
            return cand, n8
    return target_tn, _round_up(n8, target_tn)  # fallback: pad up to tile multiple


def _fused_pair(x2d, w2, b2, y2, *, target_tn=1024):
    """Run the fused two-head kernel over a (N, 768) slab.

    Returns (preds (N, 2) f32, mean_loss_col0, mean_loss_col1)."""
    n = x2d.shape[0]
    tn, n_pad = _choose_tile(n, target_tn)
    if n_pad != n:
        # Only taken for awkward row counts; labels padded with -1 => mask 0.
        x2d = jnp.pad(x2d, ((0, n_pad - n), (0, 0)))
        y2 = jnp.pad(y2, ((0, n_pad - n), (0, 0)), constant_values=-1.0)

    grid = (n_pad // tn,)

    pred, loss_elems = pl.pallas_call(
        _pair_head_kernel,
        out_shape=(
            jax.ShapeDtypeStruct((n_pad, 2), jnp.float32),   # sigmoid(z)*mask
            jax.ShapeDtypeStruct((n_pad, 2), jnp.float32),   # per-element loss
        ),
        grid_spec=pltpu.PrefetchScalarGridSpec(
            num_scalar_prefetch=0,
            grid=grid,
            in_specs=[
                pl.BlockSpec((tn, D), lambda i: (i, 0)),     # x row tile
                pl.BlockSpec((D, 2), lambda i: (0, 0)),      # fused weights
                pl.BlockSpec((1, 2), lambda i: (0, 0)),      # fused biases
                pl.BlockSpec((tn, 2), lambda i: (i, 0)),     # labels (S,E)
            ],
            out_specs=[
                pl.BlockSpec((tn, 2), lambda i: (i, 0)),     # preds
                pl.BlockSpec((tn, 2), lambda i: (i, 0)),     # per-elem losses
            ],
        ),
        compiler_params=pltpu.CompilerParams(
            dimension_semantics=("parallel",)),              # no resident state
    )(x2d, w2, b2, y2)

    # BCEWithLogitsLoss(reduction='mean', weight=...) divides by the TRUE
    # element count; padded rows contribute exactly 0 to the sums.
    loss_sums = jnp.sum(loss_elems, axis=0)                  # (2,)
    return pred[:n], loss_sums[0] / n, loss_sums[1] / n


def inference_layer_forward(params, table, attention_mask,
                            table_labels_S, table_labels_E,
                            table_labels_iaS, table_labels_iaE,
                            ia_seq, span_pruning=0.0):
    """Mirror of InferenceLayer.forward with config.span_pruning == 0."""
    del attention_mask  # only consumed by the span_pruning != 0 branch
    B, L = table.shape[0], table.shape[1]
    Nt, Ni = B * L * L, B * L

    # Feature slabs in native dtype (no upcast pass over HBM).
    xt = table.reshape(Nt, D)
    xi = ia_seq.reshape(Ni, D)

    # Labels packed as (N, 2) f32 columns [S, E] / [iaS, iaE] (tiny arrays).
    yt = jnp.stack([table_labels_S.reshape(Nt),
                    table_labels_E.reshape(Nt)], axis=1).astype(jnp.float32)
    yi = jnp.stack([table_labels_iaS.reshape(Ni),
                    table_labels_iaE.reshape(Ni)], axis=1).astype(jnp.float32)

    # Fused (768, 2) weights / (1, 2) biases per head pair.
    wT = jnp.concatenate([params["wS"], params["wE"]], axis=1).astype(xt.dtype)
    bT = jnp.concatenate([params["bS"], params["bE"]], axis=1).astype(jnp.float32)
    wI = jnp.concatenate([params["wiaS"], params["wiaE"]], axis=1).astype(xi.dtype)
    bI = jnp.concatenate([params["biaS"], params["biaE"]], axis=1).astype(jnp.float32)

    predT, loss_S, loss_E = _fused_pair(xt, wT, bT, yt)
    predI, loss_iaS, loss_iaE = _fused_pair(xi, wI, bI, yi)

    S_pred = predT[:, 0].reshape(B, L, L)
    E_pred = predT[:, 1].reshape(B, L, L)
    iaS_pred = predI[:, 0].reshape(B, L)
    iaE_pred = predI[:, 1].reshape(B, L)

    # TODO(synk): span_pruning != 0 branch (per-batch descending sort + Python
    # branch on a runtime tensor value `topkth[0] == 0`) has no clean Pallas
    # equivalent; only the span_pruning == 0 thresholding path is implemented.
    outputs = {
        "table_loss_S": loss_S,
        "table_loss_E": loss_E,
        "table_loss_iaS": loss_iaS,
        "table_loss_iaE": loss_iaE,
        "table_predict_S": S_pred > 0.5,
        "table_predict_E": E_pred > 0.5,
        "table_predict_iaS": iaS_pred > 0.5,
        "table_predict_iaE": iaE_pred > 0.5,
        "table_labels_S": table_labels_S,
        "table_labels_E": table_labels_E,
        "table_labels_iaS": table_labels_iaS,
        "table_labels_iaE": table_labels_iaE,
    }
    return outputs, (S_pred, E_pred, iaS_pred, iaE_pred)


# ----------------------------- pure-JAX reference -----------------------------

def _ref_bce_mean(z, y, w):
    l = jnp.maximum(z, 0.0) - z * y + jnp.log1p(jnp.exp(-jnp.abs(z)))
    return jnp.sum(l * w) / z.size


def _reference(params, table, table_labels_S, table_labels_E,
               table_labels_iaS, table_labels_iaE, ia_seq):
    zS = jnp.einsum("bijd,do->bij", table, params["wS"]) + params["bS"][0, 0]
    zE = jnp.einsum("bijd,do->bij", table, params["wE"]) + params["bE"][0, 0]
    ziS = jnp.einsum("bid,do->bi", ia_seq, params["wiaS"]) + params["biaS"][0, 0]
    ziE = jnp.einsum("bid,do->bi", ia_seq, params["wiaE"]) + params["biaE"][0, 0]

    mS = (table_labels_S >= 0).astype(jnp.float32)
    miS = (table_labels_iaS >= 0).astype(jnp.float32)

    losses = (_ref_bce_mean(zS, table_labels_S.astype(jnp.float32), mS),
              _ref_bce_mean(zE, table_labels_E.astype(jnp.float32), mS),
              _ref_bce_mean(ziS, table_labels_iaS.astype(jnp.float32), miS),
              _ref_bce_mean(ziE, table_labels_iaE.astype(jnp.float32), miS))
    preds = (jax.nn.sigmoid(zS) * mS, jax.nn.sigmoid(zE) * mS,
             jax.nn.sigmoid(ziS) * miS, jax.nn.sigmoid(ziE) * miS)
    return losses, preds


if __name__ == "__main__":
    B, L = 2, 16
    key = jax.random.PRNGKey(0)
    keys = jax.random.split(key, 16)

    bound = 1.0 / np.sqrt(D)  # nn.Linear default init bound
    params = {
        "wS":  jax.random.uniform(keys[0], (D, 1), jnp.float32, -bound, bound),
        "bS":  jax.random.uniform(keys[1], (1, 1), jnp.float32, -bound, bound),
        "wE":  jax.random.uniform(keys[2], (D, 1), jnp.float32, -bound, bound),
        "bE":  jax.random.uniform(keys[3], (1, 1), jnp.float32, -bound, bound),
        "wiaS": jax.random.uniform(keys[4], (D, 1), jnp.float32, -bound, bound),
        "biaS": jax.random.uniform(keys[5], (1, 1), jnp.float32, -bound, bound),
        "wiaE": jax.random.uniform(keys[6], (D, 1), jnp.float32, -bound, bound),
        "biaE": jax.random.uniform(keys[7], (1, 1), jnp.float32, -bound, bound),
    }

    table = jax.random.normal(keys[8], (B, L, L, D), jnp.float32)
    ia_seq = jax.random.normal(keys[9], (B, L, D), jnp.float32)
    attention_mask = jnp.ones((B, L), jnp.int32)
    # labels in {-1, 0, 1}: -1 marks padded cells (zero BCE weight)
    table_labels_S = jax.random.randint(keys[10], (B, L, L), -1, 2).astype(jnp.float32)
    table_labels_E = jax.random.randint(keys[11], (B, L, L), -1, 2).astype(jnp.float32)
    table_labels_iaS = jax.random.randint(keys[12], (B, L), -1, 2).astype(jnp.float32)
    table_labels_iaE = jax.random.randint(keys[13], (B, L), -1, 2).astype(jnp.float32)

    outputs, preds = inference_layer_forward(
        params, table, attention_mask,
        table_labels_S, table_labels_E, table_labels_iaS, table_labels_iaE,
        ia_seq, span_pruning=0.0)
    outputs = jax.block_until_ready(outputs)
    preds = jax.block_until_ready(preds)

    # correctness check vs. pure-JAX reference
    ref_losses, ref_preds = _reference(params, table, table_labels_S, table_labels_E,
                                       table_labels_iaS, table_labels_iaE, ia_seq)
    got_losses = (outputs["table_loss_S"], outputs["table_loss_E"],
                  outputs["table_loss_iaS"], outputs["table_loss_iaE"])
    for g, r in zip(got_losses, ref_losses):
        np.testing.assert_allclose(np.asarray(g), np.asarray(r), rtol=2e-3, atol=2e-3)
    for g, r in zip(preds, ref_preds):
        np.testing.assert_allclose(np.asarray(g), np.asarray(r), rtol=2e-3, atol=2e-3)
    for name in ("S", "E"):
        assert outputs[f"table_predict_{name}"].shape == (B, L, L)
        assert outputs[f"table_predict_ia{name}"].shape == (B, L)

    print("KERNEL_OK")
</pallas_src>

<mosaic_0001>
module attributes {stable_mosaic.version = 11 : i64} {
  func.func @_pair_head_kernel(%arg0: i32, %arg1: memref<512x768xf32, #tpu.memory_space<vmem>>, %arg2: memref<768x2xf32, #tpu.memory_space<vmem>>, %arg3: memref<1x2xf32, #tpu.memory_space<vmem>>, %arg4: memref<512x2xf32, #tpu.memory_space<vmem>>, %arg5: memref<512x2xf32, #tpu.memory_space<vmem>>, %arg6: memref<512x2xf32, #tpu.memory_space<vmem>>) attributes {dimension_semantics = [#tpu.dimension_semantics<parallel>], iteration_bounds = array<i64: 1>, scalar_prefetch = 0 : i64, scratch_operands = 0 : i64, tpu.core_type = #tpu.core_type<tc>, window_params = [{transform_indices = @transform_0, window_bounds = array<i64: 512, 768>}, {pipeline_mode = #tpu.pipeline_mode<synchronous>, transform_indices = @transform_1, window_bounds = array<i64: 768, 2>}, {pipeline_mode = #tpu.pipeline_mode<synchronous>, transform_indices = @transform_2, window_bounds = array<i64: 1, 2>}, {transform_indices = @transform_3, window_bounds = array<i64: 512, 2>}, {transform_indices = @transform_4, window_bounds = array<i64: 512, 2>}, {transform_indices = @transform_5, window_bounds = array<i64: 512, 2>}]} {
    %c0 = arith.constant 0 : index
    %c0_0 = arith.constant 0 : index
    %0 = vector.load %arg1[%c0, %c0_0] : memref<512x768xf32, #tpu.memory_space<vmem>>, vector<512x768xf32>
    %c0_1 = arith.constant 0 : index
    %c0_2 = arith.constant 0 : index
    %1 = vector.load %arg2[%c0_1, %c0_2] : memref<768x2xf32, #tpu.memory_space<vmem>>, vector<768x2xf32>
    %cst = arith.constant dense<0.000000e+00> : vector<512x2xf32>
    %2 = tpu.matmul %0, %1, %cst {dimension_numbers = #tpu.dot_dimension_numbers<[1], [0], [0], [1], [0, 0, 1, 1], [], []>} : vector<512x768xf32>, vector<768x2xf32>, vector<512x2xf32> -> vector<512x2xf32>
    %c0_3 = arith.constant 0 : index
    %c0_4 = arith.constant 0 : index
    %3 = vector.load %arg3[%c0_3, %c0_4] : memref<1x2xf32, #tpu.memory_space<vmem>>, vector<1x2xf32>
    %4 = vector.broadcast %3 : vector<1x2xf32> to vector<512x2xf32>
    %5 = arith.addf %2, %4 : vector<512x2xf32>
    %c0_5 = arith.constant 0 : index
    %c0_6 = arith.constant 0 : index
    %6 = vector.load %arg4[%c0_5, %c0_6] : memref<512x2xf32, #tpu.memory_space<vmem>>, vector<512x2xf32>
    %7 = vector.extract_strided_slice %6 {offsets = [0, 0], sizes = [512, 1], strides = [1, 1]} : vector<512x2xf32> to vector<512x1xf32>
    %cst_7 = arith.constant 0.000000e+00 : f32
    %8 = vector.broadcast %cst_7 : f32 to vector<512x1xf32>
    %9 = arith.cmpf oge, %7, %8 : vector<512x1xf32>
    %10 = arith.extui %9 : vector<512x1xi1> to vector<512x1xi32>
    %11 = arith.sitofp %10 : vector<512x1xi32> to vector<512x1xf32>
    %12 = arith.negf %5 : vector<512x2xf32>
    %13 = math.exp %12 : vector<512x2xf32>
    %cst_8 = arith.constant 1.000000e+00 : f32
    %14 = vector.broadcast %cst_8 : f32 to vector<512x2xf32>
    %15 = arith.addf %14, %13 : vector<512x2xf32>
    %16 = arith.divf %14, %15 : vector<512x2xf32>
    %17 = vector.broadcast %11 : vector<512x1xf32> to vector<512x2xf32>
    %18 = arith.mulf %16, %17 : vector<512x2xf32>
    %c0_9 = arith.constant 0 : index
    %c0_10 = arith.constant 0 : index
    %19 = vector.load %arg5[%c0_9, %c0_10] : memref<512x2xf32, #tpu.memory_space<vmem>>, vector<512x2xf32>
    tpu.vector_store %arg5[%c0_9, %c0_10], %18 {strides = array<i32>} : memref<512x2xf32, #tpu.memory_space<vmem>>, vector<512x2xf32>,
    %cst_11 = arith.constant 0.000000e+00 : f32
    %20 = vector.broadcast %cst_11 : f32 to vector<512x2xf32>
    %21 = arith.maximumf %5, %20 : vector<512x2xf32>
    %22 = arith.mulf %5, %6 : vector<512x2xf32>
    %23 = arith.subf %21, %22 : vector<512x2xf32>
    %24 = math.absf %5 : vector<512x2xf32>
    %cst_12 = arith.constant 0.000000e+00 : f32
    %25 = vector.broadcast %cst_12 : f32 to vector<512x2xf32>
    %26 = arith.subf %25, %24 : vector<512x2xf32>
    %27 = math.exp %26 : vector<512x2xf32>
    %28 = math.log1p %27 : vector<512x2xf32>
    %29 = arith.addf %23, %28 : vector<512x2xf32>
    %30 = vector.broadcast %11 : vector<512x1xf32> to vector<512x2xf32>
    %31 = arith.mulf %29, %30 : vector<512x2xf32>
    %c0_13 = arith.constant 0 : index
    %c0_14 = arith.constant 0 : index
    %32 = vector.load %arg6[%c0_13, %c0_14] : memref<512x2xf32, #tpu.memory_space<vmem>>, vector<512x2xf32>
    tpu.vector_store %arg6[%c0_13, %c0_14], %31 {strides = array<i32>} : memref<512x2xf32, #tpu.memory_space<vmem>>, vector<512x2xf32>,
    return
  }
  func.func @transform_0(%arg0: i32) -> (i32, i32) {
    %c0_i32 = arith.constant 0 : i32
    %c0_i32_0 = arith.constant 0 : i32
    return %arg0, %c0_i32 : i32, i32
  }
  func.func @transform_1(%arg0: i32) -> (i32, i32) {
    %c0_i32 = arith.constant 0 : i32
    %c0_i32_0 = arith.constant 0 : i32
    %c0_i32_1 = arith.constant 0 : i32
    return %c0_i32, %c0_i32_0 : i32, i32
  }
  func.func @transform_2(%arg0: i32) -> (i32, i32) {
    %c0_i32 = arith.constant 0 : i32
    %c0_i32_0 = arith.constant 0 : i32
    %c0_i32_1 = arith.constant 0 : i32
    return %c0_i32, %c0_i32_0 : i32, i32
  }
  func.func @transform_3(%arg0: i32) -> (i32, i32) {
    %c0_i32 = arith.constant 0 : i32
    %c0_i32_0 = arith.constant 0 : i32
    return %arg0, %c0_i32 : i32, i32
  }
  func.func @transform_4(%arg0: i32) -> (i32, i32) {
    %c0_i32 = arith.constant 0 : i32
    %c0_i32_0 = arith.constant 0 : i32
    return %arg0, %c0_i32 : i32, i32
  }
  func.func @transform_5(%arg0: i32) -> (i32, i32) {
    %c0_i32 = arith.constant 0 : i32
    %c0_i32_0 = arith.constant 0 : i32
    return %arg0, %c0_i32 : i32, i32
  }
}

</mosaic_0001>

<bundles_post_ra>
// kernel: tpu_custom_call.1
= control target key start
LH: loop header
LB: loop body
LE: loop exit
PB: predicated region body
PF: predicated region fallthrough
CT: control target
= control target key end

     0   :  { %11 = vsyncpa [#allocation3], 0  ;;  %s8865_s0 = inlined_call_operand.hbm [shape: f32[512,768], index: 0, kind: input, shape index: {}]   ;;  %s8866_s1 = inlined_call_operand.vmem [shape: f32[768,2], index: 1, kind: input, shape index: {}]   ;;  %s8867_s2 = inlined_call_operand.hbm [shape: f32[1,2], index: 2, kind: input, shape index: {}]   ;;  %s8868_s3 = inlined_call_operand.vmem [shape: f32[512,2], index: 3, kind: input, shape index: {}]   ;;  %s8869_s4 = inlined_call_operand.vmem [shape: f32[512,2], index: 4, kind: output, shape index: {0}]   ;;  %s8870_s5 = inlined_call_operand.vmem [shape: f32[512,2], index: 5, kind: output, shape index: {1}]  }
   0x1   :  { %12 = vsyncpa [#allocation5], 0  ;;  %s5359_s18 = smov [#allocation2]   ;;  %s5311_s22 = scalar_lea.hbm %s8865_s0, 49152 }
   0x2   :  { %s18_s19 = sshll.u32 %s5359_s18, 4  ;;  %p5312_p0 = scmp.ne.s32.totalorder %s8865_s0, %s5311_s22  ;;  %s19_s19 = int_to_ptr.vmem [resolvable:$true] %s18_s19 }
   0x3   :  { %p5315_p1 = scmp.lt.u32.totalorder %s5311_s22, %s8865_s0 }
   0x5   :  { %p5317_p2 = pnand %p5315_p1, %p5312_p0 }
   0x7   :  { %5320 = shalt.err (!%p5317_p2)
}
   0x8   :  { %s5321_s27 = scalar_lea.vmem %s19_s19, 49152  ;;  %p5326_p4 = scmp.lt.s32.totalorder %s19_s19, %s19_s19 }
   0x9   :  { %p5322_p3 = scmp.ne.s32.totalorder %s19_s19, %s5321_s27  ;;  %p5327_p5 = scmp.lt.s32.totalorder %s5321_s27, %s5321_s27 }
   0xb   :  { %p5328_p6 = por %p5327_p5, %p5326_p4 }
   0xd   :  { %p5329_p7 = pnand %p5328_p6, %p5322_p3 }
   0xf   :  { %5332 = shalt.err (!%p5329_p7)
}
  0x10   :  { %s5360_s28 = smov 768   ;;  %s5361_s29 = smov 48  }
  0x11   :  { %24 = dma.hbm_to_vmem [thread:$0]  %s8865_s0, 49152, %s19_s19, [#allocation3], %s5360_s28, %s5360_s28, %s5361_s29  }
  0x12   :  { %s5362_s7 = smov [#allocation4]   ;;  %s5333_s11 = scalar_lea.hbm %s8867_s2, 16 }
  0x13   :  { %s33_s8 = sshll.u32 %s5362_s7, 4  ;;  %p5334_p8 = scmp.ne.s32.totalorder %s8867_s2, %s5333_s11  ;;  %s34_s8 = int_to_ptr.vmem [resolvable:$true] %s33_s8 }
  0x14   :  { %p5337_p9 = scmp.lt.u32.totalorder %s5333_s11, %s8867_s2 }
  0x16   :  { %p5339_p10 = pnand %p5337_p9, %p5334_p8 }
  0x18   :  { %5342 = shalt.err (!%p5339_p10)
}
  0x19   :  { %s5343_s16 = scalar_lea.vmem %s34_s8, 16  ;;  %s5347_s0 = scalar_lea.vmem %s34_s8, 32 }
  0x1a   :  { %p5344_p11 = scmp.ne.s32.totalorder %s34_s8, %s5343_s16  ;;  %p5348_p12 = scmp.lt.s32.totalorder %s34_s8, %s34_s8 }
  0x1b   :  { %p5349_p13 = scmp.lt.s32.totalorder %s5347_s0, %s5343_s16 }
  0x1d   :  { %p5350_p0 = por %p5349_p13, %p5348_p12 }
  0x1f   :  { %p5351_p1 = pnand %p5350_p0, %p5344_p11 }
  0x21   :  { %5354 = shalt.err (!%p5351_p1)
}
  0x22   :  { %36 = dma.hbm_to_vmem [thread:$0]  %s8867_s2, 16, %s34_s8, [#allocation5]  }
  0x23   :  { %5355 = dma.done.wait [#allocation3], 49152  }
  0x24   :  { %5356 = vsyncadd [#allocation3], 4294918144 }
  0x25   :  { %5357 = dma.done.wait [#allocation5], 16  }
  0x26   :  { %5358 = vsyncadd [#allocation5], 4294967280  ;;  %v5363_v0 = vmov 0.0|0.0   ;;  %v429_v1 = vld [vmem:[%s8866_s1] sm:$0xff]  ;;  %v430_v2 = vld [vmem:[%s8866_s1 + $0x8] sm:$0xff] }
  0x27   :  { %4131 = vmatprep.subr.bf16.mxu1 %v5363_v0  ;;  %4179 = vmatprep.subr.bf16.mxu0 %v5363_v0  ;;  %v461_v3 = vld [vmem:[%s8866_s1 + $0x100] sm:$0xff]  ;;  %v4132_v4 = vpack.c.bf16 %v430_v2, %v429_v1  ;;  %v462_v5 = vld [vmem:[%s8866_s1 + $0x108] sm:$0xff]  ;;  %v431_v6 = vld [vmem:[%s8866_s1 + $0x10] sm:$0xff] }
  0x28   :  { %v432_v7 = vld [vmem:[%s8866_s1 + $0x18] sm:$0xff]  ;;  %v5440_v8 = vpack.c.bf16 %v462_v5, %v461_v3  ;;  %v463_v9 = vld [vmem:[%s8866_s1 + $0x110] sm:$0xff]  ;;  %v433_v13 = vld [vmem:[%s8866_s1 + $0x20] sm:$0xff] }
  0x29   :  { %v464_v10 = vld [vmem:[%s8866_s1 + $0x118] sm:$0xff]  ;;  %4133 = vmatpush1.bf16.msra.mxu1 %v4132_v4  ;;  %v4135_v11 = vpack.c.bf16 %v432_v7, %v431_v6  ;;  %v434_v14 = vld [vmem:[%s8866_s1 + $0x28] sm:$0xff]  ;;  %v465_v15 = vld [vmem:[%s8866_s1 + $0x120] sm:$0xff] }
  0x2a   :  { %4181 = vmatpush1.bf16.msra.mxu0 %v5440_v8  ;;  %4134 = vmatprep.subr.bf16.mxu1 %v5363_v0  ;;  %v5450_v12 = vpack.c.bf16 %v464_v10, %v463_v9  ;;  %v466_v16 = vld [vmem:[%s8866_s1 + $0x128] sm:$0xff]  ;;  %v4138_v17 = vpack.c.bf16 %v434_v14, %v433_v13  ;;  %v435_v19 = vld [vmem:[%s8866_s1 + $0x30] sm:$0xff]  ;;  %v436_v20 = vld [vmem:[%s8866_s1 + $0x38] sm:$0xff] }
  0x2b   :  { %4182 = vmatprep.subr.bf16.mxu0 %v5363_v0  ;;  %v5467_v18 = vpack.c.bf16 %v466_v16, %v465_v15  ;;  %v467_v21 = vld [vmem:[%s8866_s1 + $0x130] sm:$0xff]  ;;  %v468_v22 = vld [vmem:[%s8866_s1 + $0x138] sm:$0xff]  ;;  %v4141_v23 = vpack.c.bf16 %v436_v20, %v435_v19  ;;  %v437_v25 = vld [vmem:[%s8866_s1 + $0x40] sm:$0xff] }
  0x2c   :  { %v5484_v24 = vpack.c.bf16 %v468_v22, %v467_v21  ;;  %v438_v26 = vld [vmem:[%s8866_s1 + $0x48] sm:$0xff]  ;;  %v469_v27 = vld [vmem:[%s8866_s1 + $0x140] sm:$0xff]  ;;  %v439_v31 = vld [vmem:[%s8866_s1 + $0x50] sm:$0xff] }
  0x2d   :  { %4136 = vmatpush1.bf16.msra.mxu1 %v4135_v11  ;;  %v470_v28 = vld [vmem:[%s8866_s1 + $0x148] sm:$0xff]  ;;  %v4144_v29 = vpack.c.bf16 %v438_v26, %v437_v25  ;;  %v440_v32 = vld [vmem:[%s8866_s1 + $0x58] sm:$0xff]  ;;  %v471_v33 = vld [vmem:[%s8866_s1 + $0x150] sm:$0xff] }
  0x2e   :  { %4184 = vmatpush1.bf16.msra.mxu0 %v5450_v12  ;;  %4137 = vmatprep.subr.bf16.mxu1 %v5363_v0  ;;  %v5501_v30 = vpack.c.bf16 %v470_v28, %v469_v27  ;;  %v472_v34 = vld [vmem:[%s8866_s1 + $0x158] sm:$0xff]  ;;  %v4147_v35 = vpack.c.bf16 %v440_v32, %v439_v31  ;;  %v441_v37 = vld [vmem:[%s8866_s1 + $0x60] sm:$0xff]  ;;  %v442_v38 = vld [vmem:[%s8866_s1 + $0x68] sm:$0xff] }
  0x2f   :  { %4185 = vmatprep.subr.bf16.mxu0 %v5363_v0  ;;  %v5518_v36 = vpack.c.bf16 %v472_v34, %v471_v33  ;;  %v473_v39 = vld [vmem:[%s8866_s1 + $0x160] sm:$0xff]  ;;  %v474_v40 = vld [vmem:[%s8866_s1 + $0x168] sm:$0xff]  ;;  %v48_v42 = vld [vmem:[#allocation2 + $0x18] sm:$0xff]  ;;  %v4150_v43 = vpack.c.bf16 %v442_v38, %v441_v37 }
  0x30   :  { %v46_v41 = vld [vmem:[#allocation2 + $0x8] sm:$0xff]  ;;  %981 = vmatprep.mubr.f32.mxu0 %v48_v42  ;;  %v5535_v44 = vpack.c.bf16 %v474_v40, %v473_v39  ;;  %v443_v45 = vld [vmem:[%s8866_s1 + $0x70] sm:$0xff]  ;;  %v444_v46 = vld [vmem:[%s8866_s1 + $0x78] sm:$0xff] }
  0x31   :  { %4139 = vmatpush1.bf16.msra.mxu1 %v4138_v17  ;;  %596 = vmatprep.mubr.f32.mxu1 %v46_v41  ;;  %v475_v47 = vld [vmem:[%s8866_s1 + $0x170] sm:$0xff]  ;;  %v476_v48 = vld [vmem:[%s8866_s1 + $0x178] sm:$0xff]  ;;  %v4153_v49 = vpack.c.bf16 %v444_v46, %v443_v45  ;;  %v445_v51 = vld [vmem:[%s8866_s1 + $0x80] sm:$0xff] }
  0x32   :  { %4187 = vmatpush1.bf16.msra.mxu0 %v5467_v18  ;;  %4140 = vmatprep.subr.bf16.mxu1 %v5363_v0  ;;  %v5552_v50 = vpack.c.bf16 %v476_v48, %v475_v47  ;;  %v446_v52 = vld [vmem:[%s8866_s1 + $0x88] sm:$0xff]  ;;  %v477_v53 = vld [vmem:[%s8866_s1 + $0x180] sm:$0xff]  ;;  %v447_v57 = vld [vmem:[%s8866_s1 + $0x90] sm:$0xff] }
  0x33   :  { %4188 = vmatprep.subr.bf16.mxu0 %v5363_v0  ;;  %v478_v54 = vld [vmem:[%s8866_s1 + $0x188] sm:$0xff]  ;;  %v4156_v55 = vpack.c.bf16 %v446_v52, %v445_v51  ;;  %v448_v58 = vld [vmem:[%s8866_s1 + $0x98] sm:$0xff]  ;;  %v479_v59 = vld [vmem:[%s8866_s1 + $0x190] sm:$0xff] }
  0x34   :  { %v5569_v56 = vpack.c.bf16 %v478_v54, %v477_v53  ;;  %v480_v60 = vld [vmem:[%s8866_s1 + $0x198] sm:$0xff]  ;;  %v4159_v61 = vpack.c.bf16 %v448_v58, %v447_v57  ;;  %v449_v63 = vld [vmem:[%s8866_s1 + $0xa0] sm:$0xff]  ;;  %v450_v1 = vld [vmem:[%s8866_s1 + $0xa8] sm:$0xff] }
  0x35   :  { %4142 = vmatpush1.bf16.msra.mxu1 %v4141_v23  ;;  %v5586_v62 = vpack.c.bf16 %v480_v60, %v479_v59  ;;  %v481_v2 = vld [vmem:[%s8866_s1 + $0x1a0] sm:$0xff]  ;;  %v482_v3 = vld [vmem:[%s8866_s1 + $0x1a8] sm:$0xff]  ;;  %v4162_v4 = vpack.c.bf16 %v450_v1, %v449_v63  ;;  %v451_v6 = vld [vmem:[%s8866_s1 + $0xb0] sm:$0xff] }
  0x36   :  { %4190 = vmatpush1.bf16.msra.mxu0 %v5484_v24  ;;  %4143 = vmatprep.subr.bf16.mxu1 %v5363_v0  ;;  %v5603_v5 = vpack.c.bf16 %v482_v3, %v481_v2  ;;  %v452_v7 = vld [vmem:[%s8866_s1 + $0xb8] sm:$0xff]  ;;  %v483_v9 = vld [vmem:[%s8866_s1 + $0x1b0] sm:$0xff]  ;;  %v453_v14 = vld [vmem:[%s8866_s1 + $0xc0] sm:$0xff] }
  0x37   :  { %4191 = vmatprep.subr.bf16.mxu0 %v5363_v0  ;;  %v484_v10 = vld [vmem:[%s8866_s1 + $0x1b8] sm:$0xff]  ;;  %v4165_v11 = vpack.c.bf16 %v452_v7, %v451_v6  ;;  %v454_v15 = vld [vmem:[%s8866_s1 + $0xc8] sm:$0xff]  ;;  %v485_v16 = vld [vmem:[%s8866_s1 + $0x1c0] sm:$0xff] }
  0x38   :  { %v5620_v13 = vpack.c.bf16 %v484_v10, %v483_v9  ;;  %v486_v17 = vld [vmem:[%s8866_s1 + $0x1c8] sm:$0xff]  ;;  %v4168_v19 = vpack.c.bf16 %v454_v15, %v453_v14  ;;  %v455_v21 = vld [vmem:[%s8866_s1 + $0xd0] sm:$0xff]  ;;  %v456_v22 = vld [vmem:[%s8866_s1 + $0xd8] sm:$0xff] }
  0x39   :  { %4145 = vmatpush1.bf16.msra.mxu1 %v4144_v29  ;;  %v5637_v20 = vpack.c.bf16 %v486_v17, %v485_v16  ;;  %v487_v23 = vld [vmem:[%s8866_s1 + $0x1d0] sm:$0xff]  ;;  %v488_v25 = vld [vmem:[%s8866_s1 + $0x1d8] sm:$0xff]  ;;  %v4171_v26 = vpack.c.bf16 %v456_v22, %v455_v21  ;;  %v457_v28 = vld [vmem:[%s8866_s1 + $0xe0] sm:$0xff] }
  0x3a   :  { %4193 = vmatpush1.bf16.msra.mxu0 %v5501_v30  ;;  %4146 = vmatprep.subr.bf16.mxu1 %v5363_v0  ;;  %v5654_v27 = vpack.c.bf16 %v488_v25, %v487_v23  ;;  %v458_v29 = vld [vmem:[%s8866_s1 + $0xe8] sm:$0xff]  ;;  %v489_v31 = vld [vmem:[%s8866_s1 + $0x1e0] sm:$0xff]  ;;  %v460_v37 = vld [vmem:[%s8866_s1 + $0xf8] sm:$0xff] }
  0x3b   :  { %4194 = vmatprep.subr.bf16.mxu0 %v5363_v0  ;;  %v490_v32 = vld [vmem:[%s8866_s1 + $0x1e8] sm:$0xff]  ;;  %v4174_v33 = vpack.c.bf16 %v458_v29, %v457_v28  ;;  %v491_v38 = vld [vmem:[%s8866_s1 + $0x1f0] sm:$0xff]  ;;  %v492_v39 = vld [vmem:[%s8866_s1 + $0x1f8] sm:$0xff] }
  0x3c   :  { %v5671_v34 = vpack.c.bf16 %v490_v32, %v489_v31  ;;  %v5688_v41 = vpack.c.bf16 %v492_v39, %v491_v38  ;;  %v493_v42 = vld [vmem:[%s8866_s1 + $0x200] sm:$0xff]  ;;  %v47_v46 = vld [vmem:[#allocation2 + $0x10] sm:$0xff]  ;;  %v52_v47 = vld [vmem:[#allocation2 + $0x38] sm:$0xff] }
  0x3d   :  { %4148 = vmatpush1.bf16.msra.mxu1 %v4147_v35  ;;  %v459_v35 = vld [vmem:[%s8866_s1 + $0xf0] sm:$0xff]  ;;  %v45_v45 = vld [vmem:[#allocation2] sm:$0xff]  ;;  %v54_v48 = vld [vmem:[#allocation2 + $0x48] sm:$0xff] }
  0x3e   :  { %4196 = vmatpush1.bf16.msra.mxu0 %v5518_v36  ;;  %4149 = vmatprep.subr.bf16.mxu1 %v5363_v0  ;;  %v4177_v40 = vpack.c.bf16 %v460_v37, %v459_v35  ;;  %v495_v51 = vld [vmem:[%s8866_s1 + $0x210] sm:$0xff]  ;;  %v496_v52 = vld [vmem:[%s8866_s1 + $0x218] sm:$0xff]  ;;  %v53_v54 = vld [vmem:[#allocation2 + $0x40] sm:$0xff] }
  0x3f   :  { %4197 = vmatprep.subr.bf16.mxu0 %v5363_v0  ;;  %v51_v53 = vld [vmem:[#allocation2 + $0x30] sm:$0xff]  ;;  %v60_v57 = vld [vmem:[#allocation2 + $0x78] sm:$0xff]  ;;  %v4231_v58 = vpack.c.bf16 %v496_v52, %v495_v51  ;;  %v497_v59 = vld [vmem:[%s8866_s1 + $0x220] sm:$0xff] }
  0x40   :  { %v57_v60 = vld [vmem:[#allocation2 + $0x60] sm:$0xff]  ;;  %v64_v63 = vld [vmem:[#allocation2 + $0x98] sm:$0xff]  ;;  %v66_v1 = vld [vmem:[#allocation2 + $0xa8] sm:$0xff] }
  0x41   :  { %4151 = vmatpush1.bf16.msra.mxu1 %v4150_v43  ;;  %v494_v43 = vld [vmem:[%s8866_s1 + $0x208] sm:$0xff]  ;;  %v499_v3 = vld [vmem:[%s8866_s1 + $0x230] sm:$0xff]  ;;  %v72_v9 = vld [vmem:[#allocation2 + $0xd8] sm:$0xff] }
  0x42   :  { %4199 = vmatpush1.bf16.msra.mxu0 %v5535_v44  ;;  %4152 = vmatprep.subr.bf16.mxu1 %v5363_v0  ;;  %v63_v6 = vld [vmem:[#allocation2 + $0x90] sm:$0xff]  ;;  %v70_v7 = vld [vmem:[#allocation2 + $0xc8] sm:$0xff]  ;;  %v69_v15 = vld [vmem:[#allocation2 + $0xc0] sm:$0xff] }
  0x43   :  { %4200 = vmatprep.subr.bf16.mxu0 %v5363_v0  ;;  %v502_v14 = vld [vmem:[%s8866_s1 + $0x248] sm:$0xff]  ;;  %v76_v16 = vld [vmem:[#allocation2 + $0xf8] sm:$0xff]  ;;  %v503_v21 = vld [vmem:[%s8866_s1 + $0x250] sm:$0xff] }
  0x44   :  { %v78_v17 = vld [vmem:[#allocation2 + $0x108] sm:$0xff]  ;;  %v504_v22 = vld [vmem:[%s8866_s1 + $0x258] sm:$0xff]  ;;  %v75_v23 = vld [vmem:[#allocation2 + $0xf0] sm:$0xff] }
  0x45   :  { %4154 = vmatpush1.bf16.msra.mxu1 %v4153_v49  ;;  %v4228_v49 = vpack.c.bf16 %v494_v43, %v493_v42  ;;  %v82_v25 = vld [vmem:[#allocation2 + $0x128] sm:$0xff]  ;;  %v4243_v28 = vpack.c.bf16 %v504_v22, %v503_v21  ;;  %v505_v29 = vld [vmem:[%s8866_s1 + $0x260] sm:$0xff]  ;;  %v507_v38 = vld [vmem:[%s8866_s1 + $0x270] sm:$0xff] }
  0x46   :  { %4202 = vmatpush1.bf16.msra.mxu0 %v5552_v50  ;;  %4155 = vmatprep.subr.bf16.mxu1 %v5363_v0  ;;  %v506_v31 = vld [vmem:[%s8866_s1 + $0x268] sm:$0xff]  ;;  %v81_v32 = vld [vmem:[#allocation2 + $0x120] sm:$0xff]  ;;  %v508_v39 = vld [vmem:[%s8866_s1 + $0x278] sm:$0xff] }
  0x47   :  { %4203 = vmatprep.subr.bf16.mxu0 %v5363_v0  ;;  %v90_v35 = vld [vmem:[#allocation2 + $0x168] sm:$0xff]  ;;  %v4246_v37 = vpack.c.bf16 %v506_v31, %v505_v29  ;;  %v96_v43 = vld [vmem:[#allocation2 + $0x198] sm:$0xff]  ;;  %v123_v21 = vld [vmem:[#allocation2 + $0x270] sm:$0xff] }
  0x48   :  { %v94_v42 = vld [vmem:[#allocation2 + $0x188] sm:$0xff]  ;;  %v136_v29 = vld [vmem:[#allocation2 + $0x2d8] sm:$0xff] }
  0x49   :  { %4157 = vmatpush1.bf16.msra.mxu1 %v4156_v55  ;;  %v58_v55 = vld [vmem:[#allocation2 + $0x68] sm:$0xff] }
  0x4a   :  { %4205 = vmatpush1.bf16.msra.mxu0 %v5569_v56  ;;  %4158 = vmatprep.subr.bf16.mxu1 %v5363_v0  ;;  %v102_v51 = vld [vmem:[#allocation2 + $0x1c8] sm:$0xff] }
  0x4b   :  { %4206 = vmatprep.subr.bf16.mxu0 %v5363_v0  ;;  %v130_v22 = vld [vmem:[#allocation2 + $0x2a8] sm:$0xff] }
  0x4c   :  { %v138_v31 = vld [vmem:[#allocation2 + $0x2e8] sm:$0xff] }
  0x4d   :  { %4160 = vmatpush1.bf16.msra.mxu1 %v4159_v61  ;;  %v59_v61 = vld [vmem:[#allocation2 + $0x70] sm:$0xff] }
  0x4e   :  { %4208 = vmatpush1.bf16.msra.mxu0 %v5586_v62  ;;  %4161 = vmatprep.subr.bf16.mxu1 %v5363_v0 }
  0x4f   :  { %4209 = vmatprep.subr.bf16.mxu0 %v5363_v0 }
  0x51   :  { %4163 = vmatpush1.bf16.msra.mxu1 %v4162_v4  ;;  %v500_v4 = vld [vmem:[%s8866_s1 + $0x238] sm:$0xff] }
  0x52   :  { %4211 = vmatpush1.bf16.msra.mxu0 %v5603_v5  ;;  %4164 = vmatprep.subr.bf16.mxu1 %v5363_v0  ;;  %v4237_v10 = vpack.c.bf16 %v500_v4, %v499_v3  ;;  %v515_v3 = vld [vmem:[%s8866_s1 + $0x2b0] sm:$0xff]  ;;  %v516_v4 = vld [vmem:[%s8866_s1 + $0x2b8] sm:$0xff] }
  0x53   :  { %4212 = vmatprep.subr.bf16.mxu0 %v5363_v0 }
  0x55   :  { %4166 = vmatpush1.bf16.msra.mxu1 %v4165_v11  ;;  %v501_v11 = vld [vmem:[%s8866_s1 + $0x240] sm:$0xff] }
  0x56   :  { %4214 = vmatpush1.bf16.msra.mxu0 %v5620_v13  ;;  %4167 = vmatprep.subr.bf16.mxu1 %v5363_v0 }
  0x57   :  { %4215 = vmatprep.subr.bf16.mxu0 %v5363_v0 }
  0x59   :  { %4169 = vmatpush1.bf16.msra.mxu1 %v4168_v19  ;;  %v4240_v19 = vpack.c.bf16 %v502_v14, %v501_v11  ;;  %v518_v11 = vld [vmem:[%s8866_s1 + $0x2c8] sm:$0xff]  ;;  %v117_v14 = vld [vmem:[#allocation2 + $0x240] sm:$0xff] }
  0x5a   :  { %4217 = vmatpush1.bf16.msra.mxu0 %v5637_v20  ;;  %4170 = vmatprep.subr.bf16.mxu1 %v5363_v0 }
  0x5b   :  { %4218 = vmatprep.subr.bf16.mxu0 %v5363_v0 }
  0x5d   :  { %4172 = vmatpush1.bf16.msra.mxu1 %v4171_v26  ;;  %v84_v26 = vld [vmem:[#allocation2 + $0x138] sm:$0xff] }
  0x5e   :  { %4220 = vmatpush1.bf16.msra.mxu0 %v5654_v27  ;;  %4173 = vmatprep.subr.bf16.mxu1 %v5363_v0 }
  0x5f   :  { %4221 = vmatprep.subr.bf16.mxu0 %v5363_v0 }
  0x61   :  { %4175 = vmatpush1.bf16.msra.mxu1 %v4174_v33  ;;  %v88_v33 = vld [vmem:[#allocation2 + $0x158] sm:$0xff] }
  0x62   :  { %4223 = vmatpush1.bf16.msra.mxu0 %v5671_v34  ;;  %4176 = vmatprep.subr.bf16.mxu1 %v5363_v0 }
  0x63   :  { %4224 = vmatprep.subr.bf16.mxu0 %v5363_v0 }
  0x65   :  { %4178 = vmatpush1.bf16.msra.mxu1 %v4177_v40  ;;  %v87_v40 = vld [vmem:[#allocation2 + $0x150] sm:$0xff] }
  0x66   :  { %4226 = vmatpush1.bf16.msra.mxu0 %v5688_v41  ;;  %4275 = vmatprep.subr.bf16.mxu1 %v5363_v0 }
  0x67   :  { %4227 = vmatprep.subr.bf16.mxu0 %v5363_v0 }
  0x68   :  { %597 = vmatmul.mubr.f32.vlgmr.msra.gmra.mrb[0].mxu1 %v45_v45  ;;  %v4249_v45 = vpack.c.bf16 %v508_v39, %v507_v38  ;;  %v144_v38 = vld [vmem:[#allocation2 + $0x318] sm:$0xff] }
  0x69   :  { %982 = vmatmul.mubr.f32.vlgmr.msra.gmra.mrb[0].mxu0 %v47_v46  ;;  %4291 = vmatpush1.bf16.msra.mxu1 %v5440_v8  ;;  %v498_v8 = vld [vmem:[%s8866_s1 + $0x228] sm:$0xff]  ;;  %v509_v46 = vld [vmem:[%s8866_s1 + $0x280] sm:$0xff] }
  0x6a   :  { %601 = vmatprep.mubr.f32.mxu1 %v52_v47  ;;  %986 = vmatprep.mubr.f32.mxu0 %v54_v48  ;;  %v4234_v2 = vpack.c.bf16 %v498_v8, %v497_v59  ;;  %v510_v47 = vld [vmem:[%s8866_s1 + $0x288] sm:$0xff]  ;;  %v93_v48 = vld [vmem:[#allocation2 + $0x180] sm:$0xff] }
  0x6b   :  { %4229 = vmatpush1.bf16.msra.mxu0 %v4228_v49  ;;  %4276 = vmatprep.subr.bf16.mxu1 %v5363_v0  ;;  %v100_v49 = vld [vmem:[#allocation2 + $0x1b8] sm:$0xff]  ;;  %v4252_v52 = vpack.c.bf16 %v510_v47, %v509_v46  ;;  %v513_v8 = vld [vmem:[%s8866_s1 + $0x2a0] sm:$0xff]  ;;  %v154_v46 = vld [vmem:[#allocation2 + $0x368] sm:$0xff] }
  0x6c   :  { %602 = vmatmul.mubr.f32.gmra.mrb[2].mxu1 %v51_v53  ;;  %4230 = vmatprep.subr.bf16.mxu0 %v5363_v0  ;;  %v511_v53 = vld [vmem:[%s8866_s1 + $0x290] sm:$0xff]  ;;  %v156_v47 = vld [vmem:[#allocation2 + $0x378] sm:$0xff] }
  0x6d   :  { %987 = vmatmul.mubr.f32.gmra.mrb[2].mxu0 %v53_v54  ;;  %606 = vmatprep.mubr.f32.mxu1 %v58_v55  ;;  %v512_v54 = vld [vmem:[%s8866_s1 + $0x298] sm:$0xff]  ;;  %v99_v55 = vld [vmem:[#allocation2 + $0x1b0] sm:$0xff] }
  0x6e   :  { %991 = vmatprep.mubr.f32.mxu0 %v60_v57  ;;  %4292 = vmatpush1.bf16.msra.mxu1 %v5450_v12  ;;  %v65_v12 = vld [vmem:[#allocation2 + $0xa0] sm:$0xff]  ;;  %v106_v57 = vld [vmem:[#allocation2 + $0x1e8] sm:$0xff]  ;;  %v4255_v59 = vpack.c.bf16 %v512_v54, %v511_v53  ;;  %v168_v53 = vld [vmem:[#allocation2 + $0x3d8] sm:$0xff] }
  0x6f   :  { %4232 = vmatpush1.bf16.msra.mxu0 %v4231_v58  ;;  %4277 = vmatprep.subr.bf16.mxu1 %v5363_v0  ;;  %v108_v58 = vld [vmem:[#allocation2 + $0x1f8] sm:$0xff]  ;;  %v165_v54 = vld [vmem:[#allocation2 + $0x3c0] sm:$0xff] }
  0x70   :  { %607 = vmatmul.mubr.f32.gmra.mrb[4].mxu1 %v57_v60  ;;  %4233 = vmatprep.subr.bf16.mxu0 %v5363_v0  ;;  %v514_v60 = vld [vmem:[%s8866_s1 + $0x2a8] sm:$0xff] }
  0x71   :  { %992 = vmatmul.mubr.f32.gmra.mrb[4].mxu0 %v59_v61  ;;  %611 = vmatprep.mubr.f32.mxu1 %v64_v63  ;;  %v105_v61 = vld [vmem:[#allocation2 + $0x1e0] sm:$0xff]  ;;  %v112_v63 = vld [vmem:[#allocation2 + $0x218] sm:$0xff] }
  0x72   :  { %996 = vmatprep.mubr.f32.mxu0 %v66_v1  ;;  %4293 = vmatpush1.bf16.msra.mxu1 %v5467_v18  ;;  %v71_v18 = vld [vmem:[#allocation2 + $0xd0] sm:$0xff]  ;;  %v114_v1 = vld [vmem:[#allocation2 + $0x228] sm:$0xff] }
  0x73   :  { %4235 = vmatpush1.bf16.msra.mxu0 %v4234_v2  ;;  %4278 = vmatprep.subr.bf16.mxu1 %v5363_v0  ;;  %v4258_v2 = vpack.c.bf16 %v514_v60, %v513_v8  ;;  %v178_v8 = vld [vmem:[#allocation2 + $0x428] sm:$0xff]  ;;  %v180_v60 = vld [vmem:[#allocation2 + $0x438] sm:$0xff] }
  0x74   :  { %612 = vmatmul.mubr.f32.gmra.mrb[6].mxu1 %v63_v6  ;;  %4236 = vmatprep.subr.bf16.mxu0 %v5363_v0  ;;  %v111_v6 = vld [vmem:[#allocation2 + $0x210] sm:$0xff] }
  0x75   :  { %997 = vmatmul.mubr.f32.gmra.mrb[6].mxu0 %v65_v12  ;;  %616 = vmatprep.mubr.f32.mxu1 %v70_v7  ;;  %v118_v12 = vld [vmem:[#allocation2 + $0x248] sm:$0xff]  ;;  %v120_v7 = vld [vmem:[#allocation2 + $0x258] sm:$0xff] }
  0x76   :  { %1001 = vmatprep.mubr.f32.mxu0 %v72_v9  ;;  %4294 = vmatpush1.bf16.msra.mxu1 %v5484_v24  ;;  %v77_v24 = vld [vmem:[#allocation2 + $0x100] sm:$0xff]  ;;  %v4261_v9 = vpack.c.bf16 %v516_v4, %v515_v3  ;;  %v190_v4 = vld [vmem:[#allocation2 + $0x488] sm:$0xff] }
  0x77   :  { %4238 = vmatpush1.bf16.msra.mxu0 %v4237_v10  ;;  %4279 = vmatprep.subr.bf16.mxu1 %v5363_v0  ;;  %v517_v10 = vld [vmem:[%s8866_s1 + $0x2c0] sm:$0xff] }
  0x78   :  { %617 = vmatmul.mubr.f32.gmra.mrb[8].mxu1 %v69_v15  ;;  %4239 = vmatprep.subr.bf16.mxu0 %v5363_v0  ;;  %v124_v15 = vld [vmem:[#allocation2 + $0x278] sm:$0xff]  ;;  %v185_v3 = vld [vmem:[#allocation2 + $0x460] sm:$0xff] }
  0x79   :  { %1002 = vmatmul.mubr.f32.gmra.mrb[8].mxu0 %v71_v18  ;;  %621 = vmatprep.mubr.f32.mxu1 %v76_v16  ;;  %v126_v18 = vld [vmem:[#allocation2 + $0x288] sm:$0xff]  ;;  %v4264_v16 = vpack.c.bf16 %v518_v11, %v517_v10  ;;  %v195_v10 = vld [vmem:[#allocation2 + $0x4b0] sm:$0xff]  ;;  %v197_v11 = vld [vmem:[#allocation2 + $0x4c0] sm:$0xff] }
  0x7a   :  { %1006 = vmatprep.mubr.f32.mxu0 %v78_v17  ;;  %4295 = vmatpush1.bf16.msra.mxu1 %v5501_v30  ;;  %v83_v30 = vld [vmem:[#allocation2 + $0x130] sm:$0xff] }
  0x7b   :  { %4241 = vmatpush1.bf16.msra.mxu0 %v4240_v19  ;;  %4280 = vmatprep.subr.bf16.mxu1 %v5363_v0  ;;  %v519_v17 = vld [vmem:[%s8866_s1 + $0x2d0] sm:$0xff]  ;;  %v520_v19 = vld [vmem:[%s8866_s1 + $0x2d8] sm:$0xff] }
  0x7c   :  { %622 = vmatmul.mubr.f32.gmra.mrb[10].mxu1 %v75_v23  ;;  %4242 = vmatprep.subr.bf16.mxu0 %v5363_v0  ;;  %v132_v23 = vld [vmem:[#allocation2 + $0x2b8] sm:$0xff] }
  0x7d   :  { %1007 = vmatmul.mubr.f32.gmra.mrb[10].mxu0 %v77_v24  ;;  %626 = vmatprep.mubr.f32.mxu1 %v82_v25  ;;  %v4267_v24 = vpack.c.bf16 %v520_v19, %v519_v17  ;;  %v521_v25 = vld [vmem:[%s8866_s1 + $0x2e0] sm:$0xff]  ;;  %v210_v17 = vld [vmem:[#allocation2 + $0x528] sm:$0xff]  ;;  %v207_v19 = vld [vmem:[#allocation2 + $0x510] sm:$0xff] }
  0x7e   :  { %1011 = vmatprep.mubr.f32.mxu0 %v84_v26  ;;  %4296 = vmatpush1.bf16.msra.mxu1 %v5518_v36  ;;  %v89_v36 = vld [vmem:[#allocation2 + $0x160] sm:$0xff]  ;;  %v522_v26 = vld [vmem:[%s8866_s1 + $0x2e8] sm:$0xff] }
  0x7f   :  { %4244 = vmatpush1.bf16.msra.mxu0 %v4243_v28  ;;  %4281 = vmatprep.subr.bf16.mxu1 %v5363_v0  ;;  %v129_v28 = vld [vmem:[#allocation2 + $0x2a0] sm:$0xff] }
  0x80   :  { %627 = vmatmul.mubr.f32.gmra.mrb[12].mxu1 %v81_v32  ;;  %4245 = vmatprep.subr.bf16.mxu0 %v5363_v0  ;;  %v4270_v32 = vpack.c.bf16 %v522_v26, %v521_v25  ;;  %v8871_v25 = vmov 0.0  }
  0x81   :  { %1012 = vmatmul.mubr.f32.gmra.mrb[12].mxu0 %v83_v30  ;;  %631 = vmatprep.mubr.f32.mxu1 %v88_v33  ;;  %v523_v30 = vld [vmem:[%s8866_s1 + $0x2f0] sm:$0xff]  ;;  %v524_v33 = vld [vmem:[%s8866_s1 + $0x2f8] sm:$0xff] }
  0x82   :  { %1016 = vmatprep.mubr.f32.mxu0 %v90_v35  ;;  %4297 = vmatpush1.bf16.msra.mxu1 %v5535_v44  ;;  %v95_v44 = vld [vmem:[#allocation2 + $0x190] sm:$0xff]  ;;  %v4273_v39 = vpack.c.bf16 %v524_v33, %v523_v30  ;;  %v5365_v30 = vmov 0   ;;  %v222_v33 = vld [vmem:[#allocation2 + $0x588] sm:$0xff] }
  0x83   :  { %4247 = vmatpush1.bf16.msra.mxu0 %v4246_v37  ;;  %4282 = vmatprep.subr.bf16.mxu1 %v5363_v0  ;;  %v135_v35 = vld [vmem:[#allocation2 + $0x2d0] sm:$0xff]  ;;  %v142_v37 = vld [vmem:[#allocation2 + $0x308] sm:$0xff] }
  0x84   :  { %632 = vmatmul.mubr.f32.gmra.mrb[14].mxu1 %v87_v40  ;;  %4248 = vmatprep.subr.bf16.mxu0 %v5363_v0  ;;  %v141_v40 = vld [vmem:[#allocation2 + $0x300] sm:$0xff] }
  0x85   :  { %1017 = vmatmul.mubr.f32.gmra.mrb[14].mxu0 %v89_v36  ;;  %636 = vmatprep.mubr.f32.mxu1 %v94_v42  ;;  %v143_v36 = vld [vmem:[#allocation2 + $0x310] sm:$0xff]  ;;  %v148_v42 = vld [vmem:[#allocation2 + $0x338] sm:$0xff] }
  0x86   :  { %1021 = vmatprep.mubr.f32.mxu0 %v96_v43  ;;  %4298 = vmatpush1.bf16.msra.mxu1 %v5552_v50  ;;  %v101_v50 = vld [vmem:[#allocation2 + $0x1c0] sm:$0xff]  ;;  %v150_v43 = vld [vmem:[#allocation2 + $0x348] sm:$0xff] }
  0x87   :  { %4250 = vmatpush1.bf16.msra.mxu0 %v4249_v45  ;;  %4283 = vmatprep.subr.bf16.mxu1 %v5363_v0  ;;  %v149_v45 = vld [vmem:[#allocation2 + $0x340] sm:$0xff] }
  0x88   :  { %637 = vmatmul.mubr.f32.gmra.mrb[16].mxu1 %v93_v48  ;;  %4251 = vmatprep.subr.bf16.mxu0 %v5363_v0  ;;  %v155_v48 = vld [vmem:[#allocation2 + $0x370] sm:$0xff] }
  0x89   :  { %1022 = vmatmul.mubr.f32.gmra.mrb[16].mxu0 %v95_v44  ;;  %641 = vmatprep.mubr.f32.mxu1 %v100_v49  ;;  %v160_v44 = vld [vmem:[#allocation2 + $0x398] sm:$0xff]  ;;  %v162_v49 = vld [vmem:[#allocation2 + $0x3a8] sm:$0xff] }
  0x8a   :  { %1026 = vmatprep.mubr.f32.mxu0 %v102_v51  ;;  %4299 = vmatpush1.bf16.msra.mxu1 %v5569_v56  ;;  %v107_v56 = vld [vmem:[#allocation2 + $0x1f0] sm:$0xff]  ;;  %v161_v51 = vld [vmem:[#allocation2 + $0x3a0] sm:$0xff] }
  0x8b   :  { %4253 = vmatpush1.bf16.msra.mxu0 %v4252_v52  ;;  %4284 = vmatprep.subr.bf16.mxu1 %v5363_v0  ;;  %v166_v52 = vld [vmem:[#allocation2 + $0x3c8] sm:$0xff] }
  0x8c   :  { %642 = vmatmul.mubr.f32.gmra.mrb[18].mxu1 %v99_v55  ;;  %4254 = vmatprep.subr.bf16.mxu0 %v5363_v0  ;;  %v167_v55 = vld [vmem:[#allocation2 + $0x3d0] sm:$0xff] }
  0x8d   :  { %1027 = vmatmul.mubr.f32.gmra.mrb[18].mxu0 %v101_v50  ;;  %646 = vmatprep.mubr.f32.mxu1 %v106_v57  ;;  %v172_v50 = vld [vmem:[#allocation2 + $0x3f8] sm:$0xff]  ;;  %v174_v57 = vld [vmem:[#allocation2 + $0x408] sm:$0xff] }
  0x8e   :  { %1031 = vmatprep.mubr.f32.mxu0 %v108_v58  ;;  %4300 = vmatpush1.bf16.msra.mxu1 %v5586_v62  ;;  %v113_v62 = vld [vmem:[#allocation2 + $0x220] sm:$0xff]  ;;  %v171_v58 = vld [vmem:[#allocation2 + $0x3f0] sm:$0xff] }
  0x8f   :  { %4256 = vmatpush1.bf16.msra.mxu0 %v4255_v59  ;;  %4285 = vmatprep.subr.bf16.mxu1 %v5363_v0  ;;  %v173_v59 = vld [vmem:[#allocation2 + $0x400] sm:$0xff] }
  0x90   :  { %647 = vmatmul.mubr.f32.gmra.mrb[20].mxu1 %v105_v61  ;;  %4257 = vmatprep.subr.bf16.mxu0 %v5363_v0  ;;  %v177_v61 = vld [vmem:[#allocation2 + $0x420] sm:$0xff] }
  0x91   :  { %1032 = vmatmul.mubr.f32.gmra.mrb[20].mxu0 %v107_v56  ;;  %651 = vmatprep.mubr.f32.mxu1 %v112_v63  ;;  %v179_v56 = vld [vmem:[#allocation2 + $0x430] sm:$0xff]  ;;  %v184_v63 = vld [vmem:[#allocation2 + $0x458] sm:$0xff] }
  0x92   :  { %1036 = vmatprep.mubr.f32.mxu0 %v114_v1  ;;  %4301 = vmatpush1.bf16.msra.mxu1 %v5603_v5  ;;  %v119_v5 = vld [vmem:[#allocation2 + $0x250] sm:$0xff]  ;;  %v186_v1 = vld [vmem:[#allocation2 + $0x468] sm:$0xff] }
  0x93   :  { %4259 = vmatpush1.bf16.msra.mxu0 %v4258_v2  ;;  %4286 = vmatprep.subr.bf16.mxu1 %v5363_v0  ;;  %v183_v2 = vld [vmem:[#allocation2 + $0x450] sm:$0xff] }
  0x94   :  { %652 = vmatmul.mubr.f32.gmra.mrb[22].mxu1 %v111_v6  ;;  %4260 = vmatprep.subr.bf16.mxu0 %v5363_v0  ;;  %v192_v6 = vld [vmem:[#allocation2 + $0x498] sm:$0xff] }
  0x95   :  { %1037 = vmatmul.mubr.f32.gmra.mrb[22].mxu0 %v113_v62  ;;  %656 = vmatprep.mubr.f32.mxu1 %v118_v12  ;;  %v189_v62 = vld [vmem:[#allocation2 + $0x480] sm:$0xff]  ;;  %v191_v12 = vld [vmem:[#allocation2 + $0x490] sm:$0xff] }
  0x96   :  { %1041 = vmatprep.mubr.f32.mxu0 %v120_v7  ;;  %4302 = vmatpush1.bf16.msra.mxu1 %v5620_v13  ;;  %v125_v13 = vld [vmem:[#allocation2 + $0x280] sm:$0xff]  ;;  %v196_v7 = vld [vmem:[#allocation2 + $0x4b8] sm:$0xff] }
  0x97   :  { %4262 = vmatpush1.bf16.msra.mxu0 %v4261_v9  ;;  %4287 = vmatprep.subr.bf16.mxu1 %v5363_v0  ;;  %v198_v9 = vld [vmem:[#allocation2 + $0x4c8] sm:$0xff] }
  0x98   :  { %657 = vmatmul.mubr.f32.gmra.mrb[24].mxu1 %v117_v14  ;;  %4263 = vmatprep.subr.bf16.mxu0 %v5363_v0  ;;  %v202_v14 = vld [vmem:[#allocation2 + $0x4e8] sm:$0xff] }
  0x99   :  { %1042 = vmatmul.mubr.f32.gmra.mrb[24].mxu0 %v119_v5  ;;  %661 = vmatprep.mubr.f32.mxu1 %v124_v15  ;;  %v204_v5 = vld [vmem:[#allocation2 + $0x4f8] sm:$0xff]  ;;  %v201_v15 = vld [vmem:[#allocation2 + $0x4e0] sm:$0xff] }
  0x9a   :  { %1046 = vmatprep.mubr.f32.mxu0 %v126_v18  ;;  %4303 = vmatpush1.bf16.msra.mxu1 %v5637_v20  ;;  %v131_v20 = vld [vmem:[#allocation2 + $0x2b0] sm:$0xff] }
  0x9b   :  { %4265 = vmatpush1.bf16.msra.mxu0 %v4264_v16  ;;  %4288 = vmatprep.subr.bf16.mxu1 %v5363_v0  ;;  %v203_v18 = vld [vmem:[#allocation2 + $0x4f0] sm:$0xff]  ;;  %v208_v16 = vld [vmem:[#allocation2 + $0x518] sm:$0xff] }
  0x9c   :  { %662 = vmatmul.mubr.f32.gmra.mrb[26].mxu1 %v123_v21  ;;  %4266 = vmatprep.subr.bf16.mxu0 %v5363_v0  ;;  %v209_v21 = vld [vmem:[#allocation2 + $0x520] sm:$0xff] }
  0x9d   :  { %1047 = vmatmul.mubr.f32.gmra.mrb[26].mxu0 %v125_v13  ;;  %666 = vmatprep.mubr.f32.mxu1 %v130_v22  ;;  %v214_v13 = vld [vmem:[#allocation2 + $0x548] sm:$0xff]  ;;  %v1687_v22 = vld [vmem:[%s8868_s3] sm:$0xff] }
  0x9e   :  { %1051 = vmatprep.mubr.f32.mxu0 %v132_v23  ;;  %4304 = vmatpush1.bf16.msra.mxu1 %v5654_v27  ;;  %v137_v27 = vld [vmem:[#allocation2 + $0x2e0] sm:$0xff]  ;;  %v1688_v23 = vld [vmem:[%s8868_s3 + $0x8] sm:$0xff]  ;;  %vm1751_vm0 = vcmp.ge.f32.partialorder %v1687_v22, 0.0  ;;  %v267_v22 = vld [vmem:[#allocation2 + $0x6f0] sm:$0xff] }
  0x9f   :  { %4268 = vmatpush1.bf16.msra.mxu0 %v4267_v24  ;;  %4289 = vmatprep.subr.bf16.mxu1 %v5363_v0  ;;  %v216_v24 = vld [vmem:[#allocation2 + $0x558] sm:$0xff]  ;;  %vm1752_vm1 = vcmp.ge.f32.partialorder %v1688_v23, 0.0  ;;  %v4003_v26 = vsel %vm1751_vm0, 1.0, %v8871_v25  ;;  %v79_v23 = vld [vmem:[#allocation2 + $0x110] sm:$0xff] }
  0xa0   :  { %667 = vmatmul.mubr.f32.gmra.mrb[28].mxu1 %v129_v28  ;;  %4269 = vmatprep.subr.bf16.mxu0 %v5363_v0  ;;  %v4004_v28 = vsel %vm1752_vm1, 1.0, %v8871_v25 }
  0xa1   :  { %1052 = vmatmul.mubr.f32.gmra.mrb[28].mxu0 %v131_v20  ;;  %671 = vmatprep.mubr.f32.mxu1 %v136_v29  ;;  %v213_v20 = vld [vmem:[#allocation2 + $0x540] sm:$0xff]  ;;  %v4571_v29 = vpack.i.bf16 %v4004_v28, %v4003_v26  ;;  %v1697_v26 = vld [vmem:[%s8868_s3 + $0x50] sm:$0xff]  ;;  %v1698_v28 = vld [vmem:[%s8868_s3 + $0x58] sm:$0xff] }
  0xa2   :  { %1056 = vmatprep.mubr.f32.mxu0 %v138_v31  ;;  %4305 = vmatpush1.bf16.msra.mxu1 %v5671_v34  ;;  %v147_v34 = vld [vmem:[#allocation2 + $0x330] sm:$0xff]  ;;  %vm1761_vm10 = vcmp.ge.f32.partialorder %v1697_v26, 0.0  ;;  %vm1762_vm11 = vcmp.ge.f32.partialorder %v1698_v28, 0.0  ;;  %v334_v28 = vld [vmem:[#allocation2 + $0x908] sm:$0xff] }
  0xa3   :  { %4271 = vmatpush1.bf16.msra.mxu0 %v4270_v32  ;;  %4290 = vmatprep.subr.bf16.mxu1 %v5363_v0  ;;  %v215_v31 = vld [vmem:[#allocation2 + $0x550] sm:$0xff]  ;;  %v220_v32 = vld [vmem:[#allocation2 + $0x578] sm:$0xff] }
  0xa4   :  { %672 = vmatmul.mubr.f32.gmra.mrb[30].mxu1 %v135_v35  ;;  %4272 = vmatprep.subr.bf16.mxu0 %v5363_v0  ;;  %v153_v0 = vld [vmem:[#allocation2 + $0x360] sm:$0xff]  ;;  %v219_v35 = vld [vmem:[#allocation2 + $0x570] sm:$0xff] }
  0xa5   :  { %1057 = vmatmul.mubr.f32.gmra.mrb[30].mxu0 %v137_v27  ;;  %676 = vmatprep.mubr.f32.mxu1 %v142_v37  ;;  %v221_v27 = vld [vmem:[#allocation2 + $0x580] sm:$0xff]  ;;  %v226_v37 = vld [vmem:[#allocation2 + $0x5a8] sm:$0xff]  ;;  %v139_v26 = vld [vmem:[#allocation2 + $0x2f0] sm:$0xff] }
  0xa6   :  { %1061 = vmatprep.mubr.f32.mxu0 %v144_v38  ;;  %4306 = vmatpush1.bf16.msra.mxu1 %v5688_v41  ;;  %v159_v41 = vld [vmem:[#allocation2 + $0x390] sm:$0xff] }
  0xa7   :  { %4274 = vmatpush1.bf16.msra.mxu0 %v4273_v39  ;;  %4570 = vset.pattern.permute.xlu0 %v5365_v30  ;;  %v1689_v38 = vld [vmem:[%s8868_s3 + $0x10] sm:$0xff]  ;;  %v1690_v39 = vld [vmem:[%s8868_s3 + $0x18] sm:$0xff] }
  0xa8   :  { %677 = vmatmul.mubr.f32.gmra.mrb[32].mxu1 %v141_v40  ;;  %4572 = vperm.xlu0 %4570, %v4571_v29   ;;  %v228_v40 = vld [vmem:[#allocation2 + $0x5b8] sm:$0xff]  ;;  %vm1753_vm2 = vcmp.ge.f32.partialorder %v1689_v38, 0.0  ;;  %vm1754_vm3 = vcmp.ge.f32.partialorder %v1690_v39, 0.0  ;;  %v4013_v29 = vsel %vm1761_vm10, 1.0, %v8871_v25  ;;  %v91_v38 = vld [vmem:[#allocation2 + $0x170] sm:$0xff]  ;;  %v286_v39 = vld [vmem:[#allocation2 + $0x788] sm:$0xff] }
  0xa9   :  { %1062 = vmatmul.mubr.f32.gmra.mrb[32].mxu0 %v143_v36  ;;  %681 = vmatprep.mubr.f32.mxu1 %v148_v42  ;;  %v4005_v36 = vsel %vm1753_vm2, 1.0, %v8871_v25  ;;  %v4006_v42 = vsel %vm1754_vm3, 1.0, %v8871_v25 }
  0xaa   :  { %1066 = vmatprep.mubr.f32.mxu0 %v150_v43  ;;  %4581 = vset.pattern.permute.xlu1 %v5365_v30  ;;  %v225_v43 = vld [vmem:[#allocation2 + $0x5a0] sm:$0xff] }
  0xac   :  { %682 = vmatmul.mubr.f32.gmra.mrb[34].mxu1 %v147_v34  ;;  %v4576_v34 = vpack.i.bf16 %v4006_v42, %v4005_v36  ;;  %v1700_v36 = vld [vmem:[%s8868_s3 + $0x68] sm:$0xff] }
  0xad   :  { %1067 = vmatmul.mubr.f32.gmra.mrb[34].mxu0 %v149_v45  ;;  %686 = vmatprep.mubr.f32.mxu1 %v154_v46  ;;  %v227_v45 = vld [vmem:[#allocation2 + $0x5b0] sm:$0xff]  ;;  %v232_v46 = vld [vmem:[#allocation2 + $0x5d8] sm:$0xff]  ;;  %v98_v42 = vld [vmem:[#allocation2 + $0x1a8] sm:$0xff]  ;;  %vm1764_vm13 = vcmp.ge.f32.partialorder %v1700_v36, 0.0 }
  0xae   :  { %1071 = vmatprep.mubr.f32.mxu0 %v156_v47  ;;  %v234_v47 = vld [vmem:[#allocation2 + $0x5e8] sm:$0xff]  ;;  %4577 = vperm.xlu0 %4570, %v4576_v34   ;;  %v4016_v34 = vsel %vm1764_vm13, 1.0, %v8871_v25 }
  0xaf   :  { %v346_v36 = vld [vmem:[#allocation2 + $0x968] sm:$0xff] }
  0xb0   :  { %687 = vmatmul.mubr.f32.gmra.mrb[36].mxu1 %v153_v0  ;;  %v231_v0 = vld [vmem:[#allocation2 + $0x5d0] sm:$0xff] }
  0xb1   :  { %1072 = vmatmul.mubr.f32.gmra.mrb[36].mxu0 %v155_v48  ;;  %691 = vmatprep.mubr.f32.mxu1 %v160_v44  ;;  %v233_v48 = vld [vmem:[#allocation2 + $0x5e0] sm:$0xff]  ;;  %v238_v44 = vld [vmem:[#allocation2 + $0x608] sm:$0xff] }
  0xb2   :  { %1076 = vmatprep.mubr.f32.mxu0 %v162_v49  ;;  %v1691_v49 = vld [vmem:[%s8868_s3 + $0x20] sm:$0xff] }
  0xb3   :  { %vm1755_vm4 = vcmp.ge.f32.partialorder %v1691_v49, 0.0  ;;  %v103_v49 = vld [vmem:[#allocation2 + $0x1d0] sm:$0xff] }
  0xb4   :  { %692 = vmatmul.mubr.f32.gmra.mrb[38].mxu1 %v159_v41  ;;  %v1692_v41 = vld [vmem:[%s8868_s3 + $0x28] sm:$0xff] }
  0xb5   :  { %1077 = vmatmul.mubr.f32.gmra.mrb[38].mxu0 %v161_v51  ;;  %696 = vmatprep.mubr.f32.mxu1 %v166_v52  ;;  %v50_v51 = vld [vmem:[#allocation2 + $0x28] sm:$0xff]  ;;  %vm1756_vm5 = vcmp.ge.f32.partialorder %v1692_v41, 0.0  ;;  %v4007_v52 = vsel %vm1755_vm4, 1.0, %v8871_v25 }
  0xb6   :  { %1081 = vmatprep.mubr.f32.mxu0 %v168_v53  ;;  %v4008_v53 = vsel %vm1756_vm5, 1.0, %v8871_v25  ;;  %v298_v41 = vld [vmem:[#allocation2 + $0x7e8] sm:$0xff] }
  0xb8   :  { %697 = vmatmul.mubr.f32.gmra.mrb[40].mxu1 %v165_v54  ;;  %v237_v54 = vld [vmem:[#allocation2 + $0x600] sm:$0xff] }
  0xb9   :  { %1082 = vmatmul.mubr.f32.gmra.mrb[40].mxu0 %v167_v55  ;;  %701 = vmatprep.mubr.f32.mxu1 %v172_v50  ;;  %v4582_v55 = vpack.i.bf16 %v4008_v53, %v4007_v52  ;;  %v49_v50 = vld [vmem:[#allocation2 + $0x20] sm:$0xff]  ;;  %v1702_v52 = vld [vmem:[%s8868_s3 + $0x78] sm:$0xff]  ;;  %v110_v53 = vld [vmem:[#allocation2 + $0x208] sm:$0xff] }
  0xba   :  { %1086 = vmatprep.mubr.f32.mxu0 %v174_v57  ;;  %v244_v57 = vld [vmem:[#allocation2 + $0x638] sm:$0xff]  ;;  %vm1766_vm15 = vcmp.ge.f32.partialorder %v1702_v52, 0.0  ;;  %v358_v52 = vld [vmem:[#allocation2 + $0x9c8] sm:$0xff] }
  0xbb   :  { %4583 = vperm.xlu1 %4581, %v4582_v55   ;;  %v4018_v55 = vsel %vm1766_vm15, 1.0, %v8871_v25 }
  0xbc   :  { %702 = vmatmul.mubr.f32.gmra.mrb[42].mxu1 %v171_v58  ;;  %v56_v58 = vld [vmem:[#allocation2 + $0x58] sm:$0xff] }
  0xbd   :  { %1087 = vmatmul.mubr.f32.gmra.mrb[42].mxu0 %v173_v59  ;;  %706 = vmatprep.mubr.f32.mxu1 %v178_v8  ;;  %v243_v59 = vld [vmem:[#allocation2 + $0x630] sm:$0xff] }
  0xbe   :  { %1091 = vmatprep.mubr.f32.mxu0 %v180_v60  ;;  %v55_v8 = vld [vmem:[#allocation2 + $0x50] sm:$0xff]  ;;  %v250_v60 = vld [vmem:[#allocation2 + $0x668] sm:$0xff] }
  0xc0   :  { %707 = vmatmul.mubr.f32.gmra.mrb[44].mxu1 %v177_v61  ;;  %v1693_v61 = vld [vmem:[%s8868_s3 + $0x30] sm:$0xff] }
  0xc1   :  { %1092 = vmatmul.mubr.f32.gmra.mrb[44].mxu0 %v179_v56  ;;  %711 = vmatprep.mubr.f32.mxu1 %v184_v63  ;;  %v1694_v56 = vld [vmem:[%s8868_s3 + $0x38] sm:$0xff]  ;;  %v62_v63 = vld [vmem:[#allocation2 + $0x88] sm:$0xff]  ;;  %vm1757_vm6 = vcmp.ge.f32.partialorder %v1693_v61, 0.0  ;;  %v115_v61 = vld [vmem:[#allocation2 + $0x230] sm:$0xff] }
  0xc2   :  { %1096 = vmatprep.mubr.f32.mxu0 %v186_v1  ;;  %vm1758_vm7 = vcmp.ge.f32.partialorder %v1694_v56, 0.0  ;;  %v4009_v1 = vsel %vm1757_vm6, 1.0, %v8871_v25  ;;  %v310_v56 = vld [vmem:[#allocation2 + $0x848] sm:$0xff] }
  0xc4   :  { %712 = vmatmul.mubr.f32.gmra.mrb[46].mxu1 %v183_v2  ;;  %v4010_v2 = vsel %vm1758_vm7, 1.0, %v8871_v25 }
  0xc5   :  { %1097 = vmatmul.mubr.f32.gmra.mrb[46].mxu0 %v185_v3  ;;  %716 = vmatprep.mubr.f32.mxu1 %v190_v4  ;;  %v249_v3 = vld [vmem:[#allocation2 + $0x660] sm:$0xff]  ;;  %v4587_v4 = vpack.i.bf16 %v4010_v2, %v4009_v1  ;;  %v1704_v1 = vld [vmem:[%s8868_s3 + $0x88] sm:$0xff] }
  0xc6   :  { %1101 = vmatprep.mubr.f32.mxu0 %v192_v6  ;;  %v61_v6 = vld [vmem:[#allocation2 + $0x80] sm:$0xff]  ;;  %v122_v2 = vld [vmem:[#allocation2 + $0x268] sm:$0xff]  ;;  %vm1768_vm1 = vcmp.ge.f32.partialorder %v1704_v1, 0.0 }
  0xc7   :  { %4588 = vperm.xlu1 %4581, %v4587_v4   ;;  %v4020_v4 = vsel %vm1768_vm1, 1.0, %v8871_v25  ;;  %v370_v1 = vld [vmem:[#allocation2 + $0xa28] sm:$0xff] }
  0xc8   :  { %717 = vmatmul.mubr.f32.gmra.mrb[48].mxu1 %v189_v62  ;;  %v256_v62 = vld [vmem:[#allocation2 + $0x698] sm:$0xff] }
  0xc9   :  { %1102 = vmatmul.mubr.f32.gmra.mrb[48].mxu0 %v191_v12  ;;  %721 = vmatprep.mubr.f32.mxu1 %v196_v7  ;;  %v68_v12 = vld [vmem:[#allocation2 + $0xb8] sm:$0xff]  ;;  %v255_v7 = vld [vmem:[#allocation2 + $0x690] sm:$0xff] }
  0xca   :  { %1106 = vmatprep.mubr.f32.mxu0 %v198_v9  ;;  %v67_v9 = vld [vmem:[#allocation2 + $0xb0] sm:$0xff] }
  0xcc   :  { %722 = vmatmul.mubr.f32.gmra.mrb[50].mxu1 %v195_v10  ;;  %v262_v10 = vld [vmem:[#allocation2 + $0x6c8] sm:$0xff] }
  0xcd   :  { %1107 = vmatmul.mubr.f32.gmra.mrb[50].mxu0 %v197_v11  ;;  %726 = vmatprep.mubr.f32.mxu1 %v202_v14  ;;  %v1695_v11 = vld [vmem:[%s8868_s3 + $0x40] sm:$0xff]  ;;  %v1696_v14 = vld [vmem:[%s8868_s3 + $0x48] sm:$0xff] }
  0xce   :  { %1111 = vmatprep.mubr.f32.mxu0 %v204_v5  ;;  %v74_v5 = vld [vmem:[#allocation2 + $0xe8] sm:$0xff]  ;;  %vm1759_vm8 = vcmp.ge.f32.partialorder %v1695_v11, 0.0  ;;  %vm1760_vm9 = vcmp.ge.f32.partialorder %v1696_v14, 0.0  ;;  %v127_v11 = vld [vmem:[#allocation2 + $0x290] sm:$0xff] }
  0xcf   :  { %v322_v14 = vld [vmem:[#allocation2 + $0x8a8] sm:$0xff] }
  0xd0   :  { %727 = vmatmul.mubr.f32.gmra.mrb[52].mxu1 %v201_v15  ;;  %v4011_v15 = vsel %vm1759_vm8, 1.0, %v8871_v25 }
  0xd1   :  { %1112 = vmatmul.mubr.f32.gmra.mrb[52].mxu0 %v203_v18  ;;  %731 = vmatprep.mubr.f32.mxu1 %v208_v16  ;;  %v4012_v18 = vsel %vm1760_vm9, 1.0, %v8871_v25  ;;  %v261_v16 = vld [vmem:[#allocation2 + $0x6c0] sm:$0xff] }
  0xd2   :  { %1116 = vmatprep.mubr.f32.mxu0 %v210_v17  ;;  %v4592_v17 = vpack.i.bf16 %v4012_v18, %v4011_v15  ;;  %v1706_v15 = vld [vmem:[%s8868_s3 + $0x98] sm:$0xff]  ;;  %v134_v18 = vld [vmem:[#allocation2 + $0x2c8] sm:$0xff] }
  0xd3   :  { %vm1770_vm3 = vcmp.ge.f32.partialorder %v1706_v15, 0.0  ;;  %v188_v15 = vld [vmem:[#allocation2 + $0x478] sm:$0xff] }
  0xd4   :  { %732 = vmatmul.mubr.f32.gmra.mrb[54].mxu1 %v207_v19  ;;  %v73_v19 = vld [vmem:[#allocation2 + $0xe0] sm:$0xff]  ;;  %4593 = vperm.xlu0 %4570, %v4592_v17   ;;  %v4022_v17 = vsel %vm1770_vm3, 1.0, %v8871_v25 }
  0xd5   :  { %1117 = vmatmul.mubr.f32.gmra.mrb[54].mxu0 %v209_v21  ;;  %736 = vmatprep.mubr.f32.mxu1 %v214_v13  ;;  %v268_v21 = vld [vmem:[#allocation2 + $0x6f8] sm:$0xff] }
  0xd6   :  { %1121 = vmatprep.mubr.f32.mxu0 %v216_v24  ;;  %v80_v13 = vld [vmem:[#allocation2 + $0x118] sm:$0xff]  ;;  %v274_v24 = vld [vmem:[#allocation2 + $0x728] sm:$0xff] }
  0xd8   :  { %737 = vmatmul.mubr.f32.gmra.mrb[56].mxu1 %v213_v20  ;;  %v86_v20 = vld [vmem:[#allocation2 + $0x148] sm:$0xff] }
  0xd9   :  { %1122 = vmatmul.mubr.f32.gmra.mrb[56].mxu0 %v215_v31  ;;  %741 = vmatprep.mubr.f32.mxu1 %v220_v32  ;;  %v4014_v31 = vsel %vm1762_vm11, 1.0, %v8871_v25  ;;  %v273_v32 = vld [vmem:[#allocation2 + $0x720] sm:$0xff] }
  0xda   :  { %1126 = vmatprep.mubr.f32.mxu0 %v222_v33  ;;  %v4597_v30 = vpack.i.bf16 %v4014_v31, %v4013_v29  ;;  %v85_v33 = vld [vmem:[#allocation2 + $0x140] sm:$0xff]  ;;  %v1708_v29 = vld [vmem:[%s8868_s3 + $0xa8] sm:$0xff] }
  0xdb   :  { %v146_v31 = vld [vmem:[#allocation2 + $0x328] sm:$0xff]  ;;  %vm1772_vm5 = vcmp.ge.f32.partialorder %v1708_v29, 0.0  ;;  %v193_v29 = vld [vmem:[#allocation2 + $0x4a0] sm:$0xff] }
  0xdc   :  { %742 = vmatmul.mubr.f32.gmra.mrb[58].mxu1 %v219_v35  ;;  %v280_v35 = vld [vmem:[#allocation2 + $0x758] sm:$0xff]  ;;  %4598 = vperm.xlu1 %4581, %v4597_v30   ;;  %v4024_v30 = vsel %vm1772_vm5, 1.0, %v8871_v25 }
  0xdd   :  { %1127 = vmatmul.mubr.f32.gmra.mrb[58].mxu0 %v221_v27  ;;  %746 = vmatprep.mubr.f32.mxu1 %v226_v37  ;;  %v92_v27 = vld [vmem:[#allocation2 + $0x178] sm:$0xff]  ;;  %v279_v37 = vld [vmem:[#allocation2 + $0x750] sm:$0xff] }
  0xde   :  { %1131 = vmatprep.mubr.f32.mxu0 %v228_v40  ;;  %v1699_v40 = vld [vmem:[%s8868_s3 + $0x60] sm:$0xff] }
  0xdf   :  { %vm1763_vm12 = vcmp.ge.f32.partialorder %v1699_v40, 0.0  ;;  %v151_v40 = vld [vmem:[#allocation2 + $0x350] sm:$0xff] }
  0xe0   :  { %747 = vmatmul.mubr.f32.gmra.mrb[60].mxu1 %v225_v43  ;;  %v4015_v43 = vsel %vm1763_vm12, 1.0, %v8871_v25 }
  0xe1   :  { %1132 = vmatmul.mubr.f32.gmra.mrb[60].mxu0 %v227_v45  ;;  %751 = vmatprep.mubr.f32.mxu1 %v232_v46  ;;  %v285_v45 = vld [vmem:[#allocation2 + $0x780] sm:$0xff]  ;;  %v4602_v46 = vpack.i.bf16 %v4016_v34, %v4015_v43  ;;  %v1710_v43 = vld [vmem:[%s8868_s3 + $0xb8] sm:$0xff]  ;;  %v158_v34 = vld [vmem:[#allocation2 + $0x388] sm:$0xff] }
  0xe2   :  { %1136 = vmatprep.mubr.f32.mxu0 %v234_v47  ;;  %v97_v47 = vld [vmem:[#allocation2 + $0x1a0] sm:$0xff]  ;;  %vm1774_vm7 = vcmp.ge.f32.partialorder %v1710_v43, 0.0  ;;  %v1718_v43 = vld [vmem:[%s8868_s3 + $0xf8] sm:$0xff] }
  0xe3   :  { %4603 = vperm.xlu0 %4570, %v4602_v46   ;;  %v4026_v46 = vsel %vm1774_vm7, 1.0, %v8871_v25  ;;  %vm1782_vm15 = vcmp.ge.f32.partialorder %v1718_v43, 0.0  ;;  %v252_v43 = vld [vmem:[#allocation2 + $0x678] sm:$0xff] }
  0xe4   :  { %752 = vmatmul.mubr.f32.gmra.mrb[62].mxu1 %v231_v0  ;;  %v292_v0 = vld [vmem:[#allocation2 + $0x7b8] sm:$0xff] }
  0xe5   :  { %1137 = vmatmul.mubr.f32.gmra.mrb[62].mxu0 %v233_v48  ;;  %756 = vmatprep.mubr.f32.mxu1 %v238_v44  ;;  %v104_v48 = vld [vmem:[#allocation2 + $0x1d8] sm:$0xff]  ;;  %v291_v44 = vld [vmem:[#allocation2 + $0x7b0] sm:$0xff] }
  0xe6   :  { %1366 = vmatprep.mubr.f32.mxu0 %v50_v51  ;;  %v1701_v51 = vld [vmem:[%s8868_s3 + $0x70] sm:$0xff] }
  0xe7   :  { %vm1765_vm14 = vcmp.ge.f32.partialorder %v1701_v51, 0.0  ;;  %v163_v51 = vld [vmem:[#allocation2 + $0x3b0] sm:$0xff] }
  0xe8   :  { %757 = vmatmul.mubr.f32.gmra.mrb[64].mxu1 %v237_v54  ;;  %v4017_v54 = vsel %vm1765_vm14, 1.0, %v8871_v25 }
  0xe9   :  { %1367 = vmatmul.mubr.f32.vlgmr.msra.gmra.mrb[0].mxu0 %v49_v50  ;;  %761 = vmatprep.mubr.f32.mxu1 %v244_v57  ;;  %v297_v50 = vld [vmem:[#allocation2 + $0x7e0] sm:$0xff]  ;;  %v4607_v57 = vpack.i.bf16 %v4018_v55, %v4017_v54  ;;  %v1712_v54 = vld [vmem:[%s8868_s3 + $0xc8] sm:$0xff] }
  0xea   :  { %1371 = vmatprep.mubr.f32.mxu0 %v56_v58  ;;  %v109_v58 = vld [vmem:[#allocation2 + $0x200] sm:$0xff]  ;;  %v170_v55 = vld [vmem:[#allocation2 + $0x3e8] sm:$0xff]  ;;  %vm1776_vm9 = vcmp.ge.f32.partialorder %v1712_v54, 0.0 }
  0xeb   :  { %4608 = vperm.xlu1 %4581, %v4607_v57   ;;  %v4028_v57 = vsel %vm1776_vm9, 1.0, %v8871_v25 }
  0xec   :  { %762 = vmatmul.mubr.f32.gmra.mrb[66].mxu1 %v243_v59  ;;  %v304_v59 = vld [vmem:[#allocation2 + $0x818] sm:$0xff] }
  0xed   :  { %1372 = vmatmul.mubr.f32.gmra.mrb[2].mxu0 %v55_v8  ;;  %766 = vmatprep.mubr.f32.mxu1 %v250_v60  ;;  %v116_v8 = vld [vmem:[#allocation2 + $0x238] sm:$0xff]  ;;  %v303_v60 = vld [vmem:[#allocation2 + $0x810] sm:$0xff] }
  0xee   :  { %1376 = vmatprep.mubr.f32.mxu0 %v62_v63  ;;  %v1703_v63 = vld [vmem:[%s8868_s3 + $0x80] sm:$0xff] }
  0xef   :  { %vm1767_vm0 = vcmp.ge.f32.partialorder %v1703_v63, 0.0  ;;  %v175_v63 = vld [vmem:[#allocation2 + $0x410] sm:$0xff] }
  0xf0   :  { %767 = vmatmul.mubr.f32.gmra.mrb[68].mxu1 %v249_v3  ;;  %v4019_v3 = vsel %vm1767_vm0, 1.0, %v8871_v25 }
  0xf1   :  { %1377 = vmatmul.mubr.f32.gmra.mrb[4].mxu0 %v61_v6  ;;  %771 = vmatprep.mubr.f32.mxu1 %v256_v62  ;;  %v309_v6 = vld [vmem:[#allocation2 + $0x840] sm:$0xff]  ;;  %v4612_v62 = vpack.i.bf16 %v4020_v4, %v4019_v3  ;;  %v1714_v3 = vld [vmem:[%s8868_s3 + $0xd8] sm:$0xff] }
  0xf2   :  { %1381 = vmatprep.mubr.f32.mxu0 %v68_v12  ;;  %v121_v12 = vld [vmem:[#allocation2 + $0x260] sm:$0xff]  ;;  %vm1778_vm11 = vcmp.ge.f32.partialorder %v1714_v3, 0.0  ;;  %v418_v3 = vld [vmem:[#allocation2 + $0xba8] sm:$0xff] }
  0xf3   :  { %4613 = vperm.xlu0 %4570, %v4612_v62  }
  0xf4   :  { %772 = vmatmul.mubr.f32.gmra.mrb[70].mxu1 %v255_v7  ;;  %v316_v7 = vld [vmem:[#allocation2 + $0x878] sm:$0xff] }
  0xf5   :  { %1382 = vmatmul.mubr.f32.gmra.mrb[6].mxu0 %v67_v9  ;;  %776 = vmatprep.mubr.f32.mxu1 %v262_v10  ;;  %v128_v9 = vld [vmem:[#allocation2 + $0x298] sm:$0xff]  ;;  %v315_v10 = vld [vmem:[#allocation2 + $0x870] sm:$0xff] }
  0xf6   :  { %1386 = vmatprep.mubr.f32.mxu0 %v74_v5  ;;  %v1705_v5 = vld [vmem:[%s8868_s3 + $0x90] sm:$0xff] }
  0xf7   :  { %vm1769_vm2 = vcmp.ge.f32.partialorder %v1705_v5, 0.0 }
  0xf8   :  { %777 = vmatmul.mubr.f32.gmra.mrb[72].mxu1 %v261_v16  ;;  %v4021_v16 = vsel %vm1769_vm2, 1.0, %v8871_v25 }
  0xf9   :  { %1387 = vmatmul.mubr.f32.gmra.mrb[8].mxu0 %v73_v19  ;;  %781 = vmatprep.mubr.f32.mxu1 %v268_v21  ;;  %v321_v19 = vld [vmem:[#allocation2 + $0x8a0] sm:$0xff]  ;;  %v4617_v21 = vpack.i.bf16 %v4022_v17, %v4021_v16  ;;  %v375_v16 = vld [vmem:[#allocation2 + $0xa50] sm:$0xff] }
  0xfa   :  { %1391 = vmatprep.mubr.f32.mxu0 %v80_v13  ;;  %v133_v13 = vld [vmem:[#allocation2 + $0x2c0] sm:$0xff]  ;;  %v187_v17 = vld [vmem:[#allocation2 + $0x470] sm:$0xff] }
  0xfb   :  { %4618 = vperm.xlu1 %4581, %v4617_v21  }
  0xfc   :  { %782 = vmatmul.mubr.f32.gmra.mrb[74].mxu1 %v267_v22  ;;  %v328_v22 = vld [vmem:[#allocation2 + $0x8d8] sm:$0xff] }
  0xfd   :  { %1392 = vmatmul.mubr.f32.gmra.mrb[10].mxu0 %v79_v23  ;;  %786 = vmatprep.mubr.f32.mxu1 %v274_v24  ;;  %v140_v23 = vld [vmem:[#allocation2 + $0x2f8] sm:$0xff]  ;;  %v327_v24 = vld [vmem:[#allocation2 + $0x8d0] sm:$0xff] }
  0xfe   :  { %1396 = vmatprep.mubr.f32.mxu0 %v86_v20  ;;  %v1707_v20 = vld [vmem:[%s8868_s3 + $0xa0] sm:$0xff] }
  0xff   :  { %vm1771_vm4 = vcmp.ge.f32.partialorder %v1707_v20, 0.0 }
 0x100   :  { %787 = vmatmul.mubr.f32.gmra.mrb[76].mxu1 %v273_v32  ;;  %v4023_v32 = vsel %vm1771_vm4, 1.0, %v8871_v25 }
 0x101   :  { %1397 = vmatmul.mubr.f32.gmra.mrb[12].mxu0 %v85_v33  ;;  %791 = vmatprep.mubr.f32.mxu1 %v280_v35  ;;  %v333_v33 = vld [vmem:[#allocation2 + $0x900] sm:$0xff]  ;;  %v4622_v35 = vpack.i.bf16 %v4024_v30, %v4023_v32 }
 0x102   :  { %1401 = vmatprep.mubr.f32.mxu0 %v92_v27  ;;  %v145_v27 = vld [vmem:[#allocation2 + $0x320] sm:$0xff] }
 0x103   :  { %4623 = vperm.xlu0 %4570, %v4622_v35  }
 0x104   :  { %792 = vmatmul.mubr.f32.gmra.mrb[78].mxu1 %v279_v37  ;;  %v340_v37 = vld [vmem:[#allocation2 + $0x938] sm:$0xff] }
 0x105   :  { %1402 = vmatmul.mubr.f32.gmra.mrb[14].mxu0 %v91_v38  ;;  %796 = vmatprep.mubr.f32.mxu1 %v286_v39  ;;  %v152_v38 = vld [vmem:[#allocation2 + $0x358] sm:$0xff]  ;;  %v339_v39 = vld [vmem:[#allocation2 + $0x930] sm:$0xff] }
 0x106   :  { %1406 = vmatprep.mubr.f32.mxu0 %v98_v42  ;;  %v1709_v42 = vld [vmem:[%s8868_s3 + $0xb0] sm:$0xff] }
 0x107   :  { %vm1773_vm6 = vcmp.ge.f32.partialorder %v1709_v42, 0.0  ;;  %v1717_v42 = vld [vmem:[%s8868_s3 + $0xf0] sm:$0xff] }
 0x108   :  { %797 = vmatmul.mubr.f32.gmra.mrb[80].mxu1 %v285_v45  ;;  %v4025_v45 = vsel %vm1773_vm6, 1.0, %v8871_v25  ;;  %vm1781_vm14 = vcmp.ge.f32.partialorder %v1717_v42, 0.0  ;;  %v247_v42 = vld [vmem:[#allocation2 + $0x650] sm:$0xff] }
 0x109   :  { %1407 = vmatmul.mubr.f32.gmra.mrb[16].mxu0 %v97_v47  ;;  %801 = vmatprep.mubr.f32.mxu1 %v292_v0  ;;  %v345_v47 = vld [vmem:[#allocation2 + $0x960] sm:$0xff]  ;;  %v4627_v0 = vpack.i.bf16 %v4026_v46, %v4025_v45  ;;  %v400_v46 = vld [vmem:[#allocation2 + $0xb18] sm:$0xff] }
 0x10a   :  { %1411 = vmatprep.mubr.f32.mxu0 %v104_v48  ;;  %v157_v48 = vld [vmem:[#allocation2 + $0x380] sm:$0xff] }
 0x10b   :  { %4628 = vperm.xlu1 %4581, %v4627_v0   ;;  %v205_v45 = vld [vmem:[#allocation2 + $0x500] sm:$0xff]  ;;  %v4034_v0 = vsel %vm1782_vm15, 1.0, %v8871_v25 }
 0x10c   :  { %802 = vmatmul.mubr.f32.gmra.mrb[82].mxu1 %v291_v44  ;;  %v352_v44 = vld [vmem:[#allocation2 + $0x998] sm:$0xff] }
 0x10d   :  { %1412 = vmatmul.mubr.f32.gmra.mrb[18].mxu0 %v103_v49  ;;  %806 = vmatprep.mubr.f32.mxu1 %v298_v41  ;;  %v164_v49 = vld [vmem:[#allocation2 + $0x3b8] sm:$0xff]  ;;  %v351_v41 = vld [vmem:[#allocation2 + $0x990] sm:$0xff] }
 0x10e   :  { %1416 = vmatprep.mubr.f32.mxu0 %v110_v53  ;;  %v1711_v53 = vld [vmem:[%s8868_s3 + $0xc0] sm:$0xff] }
 0x10f   :  { %vm1775_vm8 = vcmp.ge.f32.partialorder %v1711_v53, 0.0  ;;  %v406_v53 = vld [vmem:[#allocation2 + $0xb48] sm:$0xff] }
 0x110   :  { %807 = vmatmul.mubr.f32.gmra.mrb[84].mxu1 %v297_v50  ;;  %v4027_v50 = vsel %vm1775_vm8, 1.0, %v8871_v25 }
 0x111   :  { %1417 = vmatmul.mubr.f32.gmra.mrb[20].mxu0 %v109_v58  ;;  %811 = vmatprep.mubr.f32.mxu1 %v304_v59  ;;  %v357_v58 = vld [vmem:[#allocation2 + $0x9c0] sm:$0xff]  ;;  %v4632_v59 = vpack.i.bf16 %v4028_v57, %v4027_v50 }
 0x112   :  { %1421 = vmatprep.mubr.f32.mxu0 %v116_v8  ;;  %v169_v8 = vld [vmem:[#allocation2 + $0x3e0] sm:$0xff] }
 0x113   :  { %4633 = vperm.xlu0 %4570, %v4632_v59   ;;  %v405_v57 = vld [vmem:[#allocation2 + $0xb40] sm:$0xff]  ;;  %v412_v59 = vld [vmem:[#allocation2 + $0xb78] sm:$0xff] }
 0x114   :  { %812 = vmatmul.mubr.f32.gmra.mrb[86].mxu1 %v303_v60  ;;  %v364_v60 = vld [vmem:[#allocation2 + $0x9f8] sm:$0xff] }
 0x115   :  { %1422 = vmatmul.mubr.f32.gmra.mrb[22].mxu0 %v115_v61  ;;  %816 = vmatprep.mubr.f32.mxu1 %v310_v56  ;;  %v176_v61 = vld [vmem:[#allocation2 + $0x418] sm:$0xff]  ;;  %v363_v56 = vld [vmem:[#allocation2 + $0x9f0] sm:$0xff] }
 0x116   :  { %1426 = vmatprep.mubr.f32.mxu0 %v122_v2  ;;  %v1713_v2 = vld [vmem:[%s8868_s3 + $0xd0] sm:$0xff] }
 0x117   :  { %vm1777_vm10 = vcmp.ge.f32.partialorder %v1713_v2, 0.0  ;;  %v223_v2 = vld [vmem:[#allocation2 + $0x590] sm:$0xff] }
 0x118   :  { %817 = vmatmul.mubr.f32.gmra.mrb[88].mxu1 %v309_v6  ;;  %v182_v6 = vld [vmem:[#allocation2 + $0x448] sm:$0xff] }
 0x119   :  { %1427 = vmatmul.mubr.f32.gmra.mrb[24].mxu0 %v121_v12  ;;  %821 = vmatprep.mubr.f32.mxu1 %v316_v7  ;;  %v4029_v12 = vsel %vm1777_vm10, 1.0, %v8871_v25  ;;  %v4030_v7 = vsel %vm1778_vm11, 1.0, %v8871_v25 }
 0x11a   :  { %1431 = vmatprep.mubr.f32.mxu0 %v128_v9  ;;  %v369_v9 = vld [vmem:[#allocation2 + $0xa20] sm:$0xff] }
 0x11c   :  { %822 = vmatmul.mubr.f32.gmra.mrb[90].mxu1 %v315_v10  ;;  %v4637_v10 = vpack.i.bf16 %v4030_v7, %v4029_v12 }
 0x11d   :  { %1432 = vmatmul.mubr.f32.gmra.mrb[26].mxu0 %v127_v11  ;;  %826 = vmatprep.mubr.f32.mxu1 %v322_v14  ;;  %v181_v11 = vld [vmem:[#allocation2 + $0x440] sm:$0xff]  ;;  %v376_v14 = vld [vmem:[#allocation2 + $0xa58] sm:$0xff] }
 0x11e   :  { %1436 = vmatprep.mubr.f32.mxu0 %v134_v18  ;;  %4638 = vperm.xlu1 %4581, %v4637_v10  }
 0x120   :  { %827 = vmatmul.mubr.f32.gmra.mrb[92].mxu1 %v321_v19  ;;  %v382_v19 = vld [vmem:[#allocation2 + $0xa88] sm:$0xff] }
 0x121   :  { %1437 = vmatmul.mubr.f32.gmra.mrb[28].mxu0 %v133_v13  ;;  %831 = vmatprep.mubr.f32.mxu1 %v328_v22  ;;  %v194_v13 = vld [vmem:[#allocation2 + $0x4a8] sm:$0xff]  ;;  %v1715_v22 = vld [vmem:[%s8868_s3 + $0xe0] sm:$0xff] }
 0x122   :  { %1441 = vmatprep.mubr.f32.mxu0 %v140_v23  ;;  %v1716_v23 = vld [vmem:[%s8868_s3 + $0xe8] sm:$0xff]  ;;  %vm1779_vm12 = vcmp.ge.f32.partialorder %v1715_v22, 0.0  ;;  %v240_v22 = vld [vmem:[#allocation2 + $0x618] sm:$0xff] }
 0x123   :  { %vm1780_vm13 = vcmp.ge.f32.partialorder %v1716_v23, 0.0 }
 0x124   :  { %832 = vmatmul.mubr.f32.gmra.mrb[94].mxu1 %v327_v24  ;;  %v4032_v20 = vsel %vm1780_vm13, 1.0, %v8871_v25 }
 0x125   :  { %1442 = vmatmul.mubr.f32.gmra.mrb[30].mxu0 %v139_v26  ;;  %836 = vmatprep.mubr.f32.mxu1 %v334_v28  ;;  %v381_v26 = vld [vmem:[#allocation2 + $0xa80] sm:$0xff]  ;;  %v4031_v28 = vsel %vm1779_vm12, 1.0, %v8871_v25 }
 0x126   :  { %1446 = vmatprep.mubr.f32.mxu0 %v146_v31  ;;  %v388_v31 = vld [vmem:[#allocation2 + $0xab8] sm:$0xff]  ;;  %v4642_v32 = vpack.i.bf16 %v4032_v20, %v4031_v28  ;;  %v239_v28 = vld [vmem:[#allocation2 + $0x610] sm:$0xff]  ;;  %v241_v20 = vld [vmem:[#allocation2 + $0x620] sm:$0xff] }
 0x128   :  { %837 = vmatmul.mubr.f32.gmra.mrb[96].mxu1 %v333_v33  ;;  %v200_v33 = vld [vmem:[#allocation2 + $0x4d8] sm:$0xff]  ;;  %4643 = vperm.xlu0 %4570, %v4642_v32  }
 0x129   :  { %1447 = vmatmul.mubr.f32.gmra.mrb[32].mxu0 %v145_v27  ;;  %841 = vmatprep.mubr.f32.mxu1 %v340_v37  ;;  %v387_v27 = vld [vmem:[#allocation2 + $0xab0] sm:$0xff]  ;;  %v1722_v32 = vld [vmem:[%s8868_s3 + $0x118] sm:$0xff] }
 0x12a   :  { %1451 = vmatprep.mubr.f32.mxu0 %v152_v38  ;;  %v199_v37 = vld [vmem:[#allocation2 + $0x4d0] sm:$0xff]  ;;  %v394_v38 = vld [vmem:[#allocation2 + $0xae8] sm:$0xff]  ;;  %vm1786_vm3 = vcmp.ge.f32.partialorder %v1722_v32, 0.0 }
 0x12b   :  { %v290_v32 = vld [vmem:[#allocation2 + $0x7a8] sm:$0xff] }
 0x12c   :  { %842 = vmatmul.mubr.f32.gmra.mrb[98].mxu1 %v339_v39 }
 0x12d   :  { %1452 = vmatmul.mubr.f32.gmra.mrb[34].mxu0 %v151_v40  ;;  %846 = vmatprep.mubr.f32.mxu1 %v346_v36  ;;  %v206_v40 = vld [vmem:[#allocation2 + $0x508] sm:$0xff] }
 0x12e   :  { %1456 = vmatprep.mubr.f32.mxu0 %v158_v34  ;;  %v393_v34 = vld [vmem:[#allocation2 + $0xae0] sm:$0xff] }
 0x130   :  { %847 = vmatmul.mubr.f32.gmra.mrb[100].mxu1 %v345_v47  ;;  %v4033_v47 = vsel %vm1781_vm14, 1.0, %v8871_v25 }
 0x131   :  { %1457 = vmatmul.mubr.f32.gmra.mrb[36].mxu0 %v157_v48  ;;  %851 = vmatprep.mubr.f32.mxu1 %v352_v44  ;;  %v212_v44 = vld [vmem:[#allocation2 + $0x538] sm:$0xff] }
 0x132   :  { %1461 = vmatprep.mubr.f32.mxu0 %v164_v49  ;;  %v4647_v49 = vpack.i.bf16 %v4034_v0, %v4033_v47  ;;  %v251_v47 = vld [vmem:[#allocation2 + $0x670] sm:$0xff]  ;;  %v253_v0 = vld [vmem:[#allocation2 + $0x680] sm:$0xff] }
 0x134   :  { %852 = vmatmul.mubr.f32.gmra.mrb[102].mxu1 %v351_v41  ;;  %4648 = vperm.xlu1 %4581, %v4647_v49  }
 0x135   :  { %1462 = vmatmul.mubr.f32.gmra.mrb[38].mxu0 %v163_v51  ;;  %856 = vmatprep.mubr.f32.mxu1 %v358_v52  ;;  %v399_v51 = vld [vmem:[#allocation2 + $0xb10] sm:$0xff] }
 0x136   :  { %1466 = vmatprep.mubr.f32.mxu0 %v170_v55  ;;  %v211_v52 = vld [vmem:[#allocation2 + $0x530] sm:$0xff]  ;;  %v218_v55 = vld [vmem:[#allocation2 + $0x568] sm:$0xff] }
 0x138   :  { %857 = vmatmul.mubr.f32.gmra.mrb[104].mxu1 %v357_v58  ;;  %v217_v58 = vld [vmem:[#allocation2 + $0x560] sm:$0xff] }
 0x139   :  { %1467 = vmatmul.mubr.f32.gmra.mrb[40].mxu0 %v169_v8  ;;  %861 = vmatprep.mubr.f32.mxu1 %v364_v60  ;;  %v224_v60 = vld [vmem:[#allocation2 + $0x598] sm:$0xff] }
 0x13a   :  { %1471 = vmatprep.mubr.f32.mxu0 %v176_v61 }
 0x13b   :  { %v5946_v4 = vpop.f32.mrb[0].mxu1 }
 0x13c   :  { %v600_v62 = vpop.f32.mrb[1].mxu1  ;;  %862 = vmatmul.mubr.f32.gmra.mrb[106].mxu1 %v363_v56  ;;  %v411_v56 = vld [vmem:[#allocation2 + $0xb70] sm:$0xff] }
 0x13d   :  { %1472 = vmatmul.mubr.f32.gmra.mrb[42].mxu0 %v175_v63  ;;  %866 = vmatprep.mubr.f32.mxu1 %v370_v1  ;;  %v1719_v63 = vld [vmem:[%s8868_s3 + $0x100] sm:$0xff]  ;;  %v1720_v1 = vld [vmem:[%s8868_s3 + $0x108] sm:$0xff] }
 0x13e   :  { %1476 = vmatprep.mubr.f32.mxu0 %v182_v6  ;;  %vm1783_vm0 = vcmp.ge.f32.partialorder %v1719_v63, 0.0  ;;  %vm1784_vm1 = vcmp.ge.f32.partialorder %v1720_v1, 0.0  ;;  %v230_v62 = vld [vmem:[#allocation2 + $0x5c8] sm:$0xff]  ;;  %v272_v63 = vld [vmem:[#allocation2 + $0x718] sm:$0xff] }
 0x13f   :  { %v5950_v5 = vpop.f32.mrb[2].mxu1  ;;  %v4035_v12 = vsel %vm1783_vm0, 1.0, %v8871_v25  ;;  %v4036_v7 = vsel %vm1784_vm1, 1.0, %v8871_v25 }
 0x140   :  { %v605_v18 = vpop.f32.mrb[3].mxu1  ;;  %867 = vmatmul.mubr.f32.gmra.mrb[108].mxu1 %v369_v9  ;;  %v4652_v10 = vpack.i.bf16 %v4036_v7, %v4035_v12  ;;  %v278_v7 = vld [vmem:[#allocation2 + $0x748] sm:$0xff] }
 0x141   :  { %1477 = vmatmul.mubr.f32.gmra.mrb[44].mxu0 %v181_v11  ;;  %871 = vmatprep.mubr.f32.mxu1 %v376_v14  ;;  %v417_v11 = vld [vmem:[#allocation2 + $0xba0] sm:$0xff] }
 0x142   :  { %1481 = vmatprep.mubr.f32.mxu0 %v188_v15  ;;  %v229_v14 = vld [vmem:[#allocation2 + $0x5c0] sm:$0xff]  ;;  %v424_v15 = vld [vmem:[#allocation2 + $0xbd8] sm:$0xff]  ;;  %4653 = vperm.xlu0 %4570, %v4652_v10   ;;  %v1724_v10 = vld [vmem:[%s8868_s3 + $0x128] sm:$0xff] }
 0x143   :  { %v5952_v21 = vpop.f32.mrb[4].mxu1  ;;  %vm1788_vm5 = vcmp.ge.f32.partialorder %v1724_v10, 0.0  ;;  %v311_v10 = vld [vmem:[#allocation2 + $0x850] sm:$0xff] }
 0x144   :  { %v610_v24 = vpop.f32.mrb[5].mxu1  ;;  %872 = vmatmul.mubr.f32.gmra.mrb[110].mxu1 %v375_v16  ;;  %v236_v16 = vld [vmem:[#allocation2 + $0x5f8] sm:$0xff] }
 0x145   :  { %1482 = vmatmul.mubr.f32.gmra.mrb[46].mxu0 %v187_v17  ;;  %876 = vmatprep.mubr.f32.mxu1 %v382_v19  ;;  %v423_v19 = vld [vmem:[#allocation2 + $0xbd0] sm:$0xff]  ;;  %v242_v24 = vld [vmem:[#allocation2 + $0x628] sm:$0xff] }
 0x146   :  { %1486 = vmatprep.mubr.f32.mxu0 %v194_v13  ;;  %v235_v13 = vld [vmem:[#allocation2 + $0x5f0] sm:$0xff] }
 0x147   :  { %v5962_v30 = vpop.f32.mrb[6].mxu1 }
 0x148   :  { %v615_v35 = vpop.f32.mrb[7].mxu1  ;;  %877 = vmatmul.mubr.f32.gmra.mrb[112].mxu1 %v381_v26 }
 0x149   :  { %1487 = vmatmul.mubr.f32.gmra.mrb[48].mxu0 %v193_v29  ;;  %881 = vmatprep.mubr.f32.mxu1 %v388_v31  ;;  %v246_v29 = vld [vmem:[#allocation2 + $0x648] sm:$0xff]  ;;  %v1721_v31 = vld [vmem:[%s8868_s3 + $0x110] sm:$0xff]  ;;  %v248_v35 = vld [vmem:[#allocation2 + $0x658] sm:$0xff] }
 0x14a   :  { %1491 = vmatprep.mubr.f32.mxu0 %v200_v33  ;;  %vm1785_vm2 = vcmp.ge.f32.partialorder %v1721_v31, 0.0 }
 0x14b   :  { %v5964_v39 = vpop.f32.mrb[8].mxu1 }
 0x14c   :  { %v620_v36 = vpop.f32.mrb[9].mxu1  ;;  %882 = vmatmul.mubr.f32.gmra.mrb[114].mxu1 %v387_v27 }
 0x14d   :  { %1492 = vmatmul.mubr.f32.gmra.mrb[50].mxu0 %v199_v37  ;;  %886 = vmatprep.mubr.f32.mxu1 %v394_v38  ;;  %v4037_v37 = vsel %vm1785_vm2, 1.0, %v8871_v25  ;;  %v4038_v38 = vsel %vm1786_vm3, 1.0, %v8871_v25 }
 0x14e   :  { %1496 = vmatprep.mubr.f32.mxu0 %v206_v40  ;;  %v245_v40 = vld [vmem:[#allocation2 + $0x640] sm:$0xff]  ;;  %v4657_v36 = vpack.i.bf16 %v4038_v38, %v4037_v37  ;;  %v294_v38 = vld [vmem:[#allocation2 + $0x7c8] sm:$0xff] }
 0x14f   :  { %v5974_v48 = vpop.f32.mrb[10].mxu1  ;;  %v289_v37 = vld [vmem:[#allocation2 + $0x7a0] sm:$0xff] }
 0x150   :  { %v625_v41 = vpop.f32.mrb[11].mxu1  ;;  %887 = vmatmul.mubr.f32.gmra.mrb[116].mxu1 %v393_v34  ;;  %4658 = vperm.xlu1 %4581, %v4657_v36   ;;  %v296_v36 = vld [vmem:[#allocation2 + $0x7d8] sm:$0xff] }
 0x151   :  { %1497 = vmatmul.mubr.f32.gmra.mrb[52].mxu0 %v205_v45  ;;  %891 = vmatprep.mubr.f32.mxu1 %v400_v46  ;;  %v254_v45 = vld [vmem:[#allocation2 + $0x688] sm:$0xff]  ;;  %v260_v41 = vld [vmem:[#allocation2 + $0x6b8] sm:$0xff] }
 0x152   :  { %1501 = vmatprep.mubr.f32.mxu0 %v212_v44  ;;  %v258_v44 = vld [vmem:[#allocation2 + $0x6a8] sm:$0xff] }
 0x153   :  { %v5976_v54 = vpop.f32.mrb[12].mxu1 }
 0x154   :  { %v630_v50 = vpop.f32.mrb[13].mxu1  ;;  %892 = vmatmul.mubr.f32.gmra.mrb[118].mxu1 %v399_v51 }
 0x155   :  { %1502 = vmatmul.mubr.f32.gmra.mrb[54].mxu0 %v211_v52  ;;  %896 = vmatprep.mubr.f32.mxu1 %v406_v53  ;;  %v257_v52 = vld [vmem:[#allocation2 + $0x6a0] sm:$0xff]  ;;  %v259_v53 = vld [vmem:[#allocation2 + $0x6b0] sm:$0xff] }
 0x156   :  { %1506 = vmatprep.mubr.f32.mxu0 %v218_v55  ;;  %v264_v55 = vld [vmem:[#allocation2 + $0x6d8] sm:$0xff] }
 0x157   :  { %v5978_v8 = vpop.f32.mrb[14].mxu1 }
 0x158   :  { %v635_v61 = vpop.f32.mrb[15].mxu1  ;;  %897 = vmatmul.mubr.f32.gmra.mrb[120].mxu1 %v405_v57  ;;  %v266_v57 = vld [vmem:[#allocation2 + $0x6e8] sm:$0xff] }
 0x159   :  { %1507 = vmatmul.mubr.f32.gmra.mrb[56].mxu0 %v217_v58  ;;  %901 = vmatprep.mubr.f32.mxu1 %v412_v59  ;;  %v263_v59 = vld [vmem:[#allocation2 + $0x6d0] sm:$0xff]  ;;  %v270_v61 = vld [vmem:[#allocation2 + $0x708] sm:$0xff] }
 0x15a   :  { %1511 = vmatprep.mubr.f32.mxu0 %v224_v60  ;;  %v265_v60 = vld [vmem:[#allocation2 + $0x6e0] sm:$0xff] }
 0x15b   :  { %v5986_v6 = vpop.f32.mrb[16].mxu1 }
 0x15c   :  { %v640_v9 = vpop.f32.mrb[17].mxu1  ;;  %902 = vmatmul.mubr.f32.gmra.mrb[122].mxu1 %v411_v56 }
 0x15d   :  { %1512 = vmatmul.mubr.f32.gmra.mrb[58].mxu0 %v223_v2  ;;  %906 = vmatprep.mubr.f32.mxu1 %v418_v3  ;;  %v269_v2 = vld [vmem:[#allocation2 + $0x700] sm:$0xff]  ;;  %v271_v3 = vld [vmem:[#allocation2 + $0x710] sm:$0xff] }
 0x15e   :  { %1516 = vmatprep.mubr.f32.mxu0 %v230_v62  ;;  %v276_v62 = vld [vmem:[#allocation2 + $0x738] sm:$0xff]  ;;  %v1723_v9 = vld [vmem:[%s8868_s3 + $0x120] sm:$0xff] }
 0x15f   :  { %v5990_v18 = vpop.f32.mrb[18].mxu1  ;;  %vm1787_vm4 = vcmp.ge.f32.partialorder %v1723_v9, 0.0 }
 0x160   :  { %v645_v17 = vpop.f32.mrb[19].mxu1  ;;  %907 = vmatmul.mubr.f32.gmra.mrb[124].mxu1 %v417_v11 }
 0x161   :  { %1517 = vmatmul.mubr.f32.gmra.mrb[60].mxu0 %v229_v14  ;;  %911 = vmatprep.mubr.f32.mxu1 %v424_v15  ;;  %v275_v14 = vld [vmem:[#allocation2 + $0x730] sm:$0xff]  ;;  %v4039_v15 = vsel %vm1787_vm4, 1.0, %v8871_v25  ;;  %v277_v17 = vld [vmem:[#allocation2 + $0x740] sm:$0xff] }
 0x162   :  { %1521 = vmatprep.mubr.f32.mxu0 %v236_v16  ;;  %v4040_v16 = vsel %vm1788_vm5, 1.0, %v8871_v25 }
 0x163   :  { %v5992_v23 = vpop.f32.mrb[20].mxu1 }
 0x164   :  { %v650_v26 = vpop.f32.mrb[21].mxu1  ;;  %912 = vmatmul.mubr.f32.gmra.mrb[126].mxu1 %v423_v19  ;;  %v282_v19 = vld [vmem:[#allocation2 + $0x768] sm:$0xff] }
 0x165   :  { %1522 = vmatmul.mubr.f32.gmra.mrb[62].mxu0 %v235_v13  ;;  %1141 = vmatprep.mubr.f32.mxu1 %v240_v22  ;;  %v4662_v13 = vpack.i.bf16 %v4040_v16, %v4039_v15  ;;  %v320_v16 = vld [vmem:[#allocation2 + $0x898] sm:$0xff] }
 0x166   :  { %1526 = vmatprep.mubr.f32.mxu0 %v242_v24  ;;  %v284_v24 = vld [vmem:[#allocation2 + $0x778] sm:$0xff] }
 0x167   :  { %v6000_v33 = vpop.f32.mrb[22].mxu1  ;;  %4663 = vperm.xlu0 %4570, %v4662_v13  }
 0x168   :  { %v655_v27 = vpop.f32.mrb[23].mxu1  ;;  %1142 = vmatmul.mubr.f32.vlgmr.msra.gmra.mrb[64].mxu1 %v239_v28  ;;  %v281_v28 = vld [vmem:[#allocation2 + $0x760] sm:$0xff] }
 0x169   :  { %1527 = vmatmul.mubr.f32.gmra.mrb[64].mxu0 %v241_v20  ;;  %1146 = vmatprep.mubr.f32.mxu1 %v246_v29  ;;  %v283_v20 = vld [vmem:[#allocation2 + $0x770] sm:$0xff]  ;;  %v288_v29 = vld [vmem:[#allocation2 + $0x798] sm:$0xff] }
 0x16a   :  { %1531 = vmatprep.mubr.f32.mxu0 %v248_v35  ;;  %v287_v27 = vld [vmem:[#allocation2 + $0x790] sm:$0xff] }
 0x16b   :  { %v6004_v34 = vpop.f32.mrb[24].mxu1 }
 0x16c   :  { %v660_v46 = vpop.f32.mrb[25].mxu1  ;;  %1147 = vmatmul.mubr.f32.gmra.mrb[66].mxu1 %v245_v40 }
 0x16d   :  { %1532 = vmatmul.mubr.f32.gmra.mrb[66].mxu0 %v247_v42  ;;  %1151 = vmatprep.mubr.f32.mxu1 %v252_v43  ;;  %v1725_v43 = vld [vmem:[%s8868_s3 + $0x130] sm:$0xff]  ;;  %v293_v46 = vld [vmem:[#allocation2 + $0x7c0] sm:$0xff] }
 0x16e   :  { %1536 = vmatprep.mubr.f32.mxu0 %v254_v45  ;;  %v1726_v45 = vld [vmem:[%s8868_s3 + $0x138] sm:$0xff]  ;;  %vm1789_vm6 = vcmp.ge.f32.partialorder %v1725_v43, 0.0 }
 0x16f   :  { %v6006_v49 = vpop.f32.mrb[26].mxu1  ;;  %vm1790_vm7 = vcmp.ge.f32.partialorder %v1726_v45, 0.0  ;;  %v332_v45 = vld [vmem:[#allocation2 + $0x8f8] sm:$0xff] }
 0x170   :  { %v665_v51 = vpop.f32.mrb[27].mxu1  ;;  %1152 = vmatmul.mubr.f32.gmra.mrb[68].mxu1 %v251_v47  ;;  %v295_v47 = vld [vmem:[#allocation2 + $0x7d0] sm:$0xff] }
 0x171   :  { %1537 = vmatmul.mubr.f32.gmra.mrb[68].mxu0 %v253_v0  ;;  %1156 = vmatprep.mubr.f32.mxu1 %v258_v44  ;;  %v300_v0 = vld [vmem:[#allocation2 + $0x7f8] sm:$0xff]  ;;  %v4041_v44 = vsel %vm1789_vm6, 1.0, %v8871_v25  ;;  %vm2711_vm6 = vcmask 15360  }
 0x172   :  { %1541 = vmatprep.mubr.f32.mxu0 %v260_v41  ;;  %v4042_v41 = vsel %vm1790_vm7, 1.0, %v8871_v25 }
 0x173   :  { %v6008_v50 = vpop.f32.mrb[28].mxu1 }
 0x174   :  { %v670_v58 = vpop.f32.mrb[29].mxu1  ;;  %1157 = vmatmul.mubr.f32.gmra.mrb[70].mxu1 %v257_v52  ;;  %v302_v52 = vld [vmem:[#allocation2 + $0x808] sm:$0xff] }
 0x175   :  { %1542 = vmatmul.mubr.f32.gmra.mrb[70].mxu0 %v259_v53  ;;  %1161 = vmatprep.mubr.f32.mxu1 %v264_v55  ;;  %v4667_v53 = vpack.i.bf16 %v4042_v41, %v4041_v44  ;;  %v301_v58 = vld [vmem:[#allocation2 + $0x800] sm:$0xff]  ;;  %v336_v44 = vld [vmem:[#allocation2 + $0x918] sm:$0xff]  ;;  %v1729_v41 = vld [vmem:[%s8868_s3 + $0x150] sm:$0xff] }
 0x176   :  { %1546 = vmatprep.mubr.f32.mxu0 %v266_v57  ;;  %v299_v57 = vld [vmem:[#allocation2 + $0x7f0] sm:$0xff]  ;;  %vm1793_vm10 = vcmp.ge.f32.partialorder %v1729_v41, 0.0  ;;  %v6082_v41 = vpop.permute.xlu0 %4572 }
 0x177   :  { %v6010_v56 = vpop.f32.mrb[30].mxu1  ;;  %4668 = vperm.xlu1 %4581, %v4667_v53  }
 0x178   :  { %v675_v1 = vpop.f32.mrb[31].mxu1  ;;  %1162 = vmatmul.mubr.f32.gmra.mrb[72].mxu1 %v263_v59  ;;  %v306_v59 = vld [vmem:[#allocation2 + $0x828] sm:$0xff] }
 0x179   :  { %1547 = vmatmul.mubr.f32.gmra.mrb[72].mxu0 %v265_v60  ;;  %1166 = vmatprep.mubr.f32.mxu1 %v270_v61  ;;  %v308_v61 = vld [vmem:[#allocation2 + $0x838] sm:$0xff]  ;;  %v305_v1 = vld [vmem:[#allocation2 + $0x820] sm:$0xff] }
 0x17a   :  { %1551 = vmatprep.mubr.f32.mxu0 %v272_v63 }
 0x17b   :  { %v6012_v12 = vpop.f32.mrb[32].mxu1 }
 0x17c   :  { %v680_v11 = vpop.f32.mrb[33].mxu1  ;;  %1167 = vmatmul.mubr.f32.gmra.mrb[74].mxu1 %v269_v2  ;;  %v307_v2 = vld [vmem:[#allocation2 + $0x830] sm:$0xff] }
 0x17d   :  { %1552 = vmatmul.mubr.f32.gmra.mrb[74].mxu0 %v271_v3  ;;  %1171 = vmatprep.mubr.f32.mxu1 %v276_v62  ;;  %v312_v3 = vld [vmem:[#allocation2 + $0x858] sm:$0xff]  ;;  %v313_v11 = vld [vmem:[#allocation2 + $0x860] sm:$0xff] }
 0x17e   :  { %1556 = vmatprep.mubr.f32.mxu0 %v278_v7  ;;  %v314_v7 = vld [vmem:[#allocation2 + $0x868] sm:$0xff] }
 0x17f   :  { %v6022_v22 = vpop.f32.mrb[34].mxu1 }
 0x180   :  { %v685_v26 = vpop.f32.mrb[35].mxu1  ;;  %1172 = vmatmul.mubr.f32.gmra.mrb[76].mxu1 %v275_v14  ;;  %v318_v14 = vld [vmem:[#allocation2 + $0x888] sm:$0xff] }
 0x181   :  { %1557 = vmatmul.mubr.f32.gmra.mrb[76].mxu0 %v277_v17  ;;  %1176 = vmatprep.mubr.f32.mxu1 %v282_v19  ;;  %v1727_v17 = vld [vmem:[%s8868_s3 + $0x140] sm:$0xff]  ;;  %v1728_v19 = vld [vmem:[%s8868_s3 + $0x148] sm:$0xff] }
 0x182   :  { %1561 = vmatprep.mubr.f32.mxu0 %v284_v24  ;;  %vm1791_vm8 = vcmp.ge.f32.partialorder %v1727_v17, 0.0  ;;  %vm1792_vm9 = vcmp.ge.f32.partialorder %v1728_v19, 0.0  ;;  %v317_v24 = vld [vmem:[#allocation2 + $0x880] sm:$0xff]  ;;  %v350_v17 = vld [vmem:[#allocation2 + $0x988] sm:$0xff] }
 0x183   :  { %v6024_v31 = vpop.f32.mrb[36].mxu1  ;;  %v4043_v26 = vsel %vm1791_vm8, 1.0, %v8871_v25  ;;  %v1731_v19 = vld [vmem:[%s8868_s3 + $0x160] sm:$0xff] }
 0x184   :  { %v690_v35 = vpop.f32.mrb[37].mxu1  ;;  %1177 = vmatmul.mubr.f32.gmra.mrb[78].mxu1 %v281_v28  ;;  %v4044_v28 = vsel %vm1792_vm9, 1.0, %v8871_v25  ;;  %vm1795_vm12 = vcmp.ge.f32.partialorder %v1731_v19, 0.0  ;;  %v6125_v19 = vpop.permute.xlu1 %4583 }
 0x185   :  { %1562 = vmatmul.mubr.f32.gmra.mrb[78].mxu0 %v283_v20  ;;  %1181 = vmatprep.mubr.f32.mxu1 %v288_v29  ;;  %v319_v20 = vld [vmem:[#allocation2 + $0x890] sm:$0xff]  ;;  %v324_v29 = vld [vmem:[#allocation2 + $0x8b8] sm:$0xff] }
 0x186   :  { %1566 = vmatprep.mubr.f32.mxu0 %v290_v32  ;;  %v4672_v32 = vpack.i.bf16 %v4044_v28, %v4043_v26  ;;  %v347_v26 = vld [vmem:[#allocation2 + $0x970] sm:$0xff]  ;;  %v4047_v28 = vsel %vm1795_vm12, 1.0, %v8871_v25 }
 0x187   :  { %v6026_v40 = vpop.f32.mrb[38].mxu1 }
 0x188   :  { %v695_v42 = vpop.f32.mrb[39].mxu1  ;;  %1182 = vmatmul.mubr.f32.gmra.mrb[80].mxu1 %v287_v27  ;;  %v326_v27 = vld [vmem:[#allocation2 + $0x8c8] sm:$0xff]  ;;  %4673 = vperm.xlu0 %4570, %v4672_v32  }
 0x189   :  { %1567 = vmatmul.mubr.f32.gmra.mrb[80].mxu0 %v289_v37  ;;  %1186 = vmatprep.mubr.f32.mxu1 %v294_v38  ;;  %v323_v38 = vld [vmem:[#allocation2 + $0x8b0] sm:$0xff]  ;;  %v330_v42 = vld [vmem:[#allocation2 + $0x8e8] sm:$0xff] }
 0x18a   :  { %1571 = vmatprep.mubr.f32.mxu0 %v296_v36  ;;  %v325_v36 = vld [vmem:[#allocation2 + $0x8c0] sm:$0xff]  ;;  %v354_v32 = vld [vmem:[#allocation2 + $0x9a8] sm:$0xff] }
 0x18b   :  { %v6036_v51 = vpop.f32.mrb[40].mxu1 }
 0x18c   :  { %v700_v55 = vpop.f32.mrb[41].mxu1  ;;  %1187 = vmatmul.mubr.f32.gmra.mrb[82].mxu1 %v293_v46 }
 0x18d   :  { %1572 = vmatmul.mubr.f32.gmra.mrb[82].mxu0 %v295_v47  ;;  %1191 = vmatprep.mubr.f32.mxu1 %v300_v0  ;;  %v329_v47 = vld [vmem:[#allocation2 + $0x8e0] sm:$0xff]  ;;  %v331_v0 = vld [vmem:[#allocation2 + $0x8f0] sm:$0xff]  ;;  %v338_v55 = vld [vmem:[#allocation2 + $0x928] sm:$0xff] }
 0x18e   :  { %1576 = vmatprep.mubr.f32.mxu0 %v302_v52  ;;  %v1730_v52 = vld [vmem:[%s8868_s3 + $0x158] sm:$0xff] }
 0x18f   :  { %v6038_v60 = vpop.f32.mrb[42].mxu1  ;;  %vm1794_vm11 = vcmp.ge.f32.partialorder %v1730_v52, 0.0  ;;  %v6084_v52 = vld [vmem:[#allocation4] ss:$0 sm:$0xff] }
 0x190   :  { %v705_v63 = vpop.f32.mrb[43].mxu1  ;;  %1192 = vmatmul.mubr.f32.gmra.mrb[84].mxu1 %v299_v57 }
 0x191   :  { %1577 = vmatmul.mubr.f32.gmra.mrb[84].mxu0 %v301_v58  ;;  %1196 = vmatprep.mubr.f32.mxu1 %v306_v59  ;;  %v4045_v58 = vsel %vm1793_vm10, 1.0, %v8871_v25  ;;  %v4046_v59 = vsel %vm1794_vm11, 1.0, %v8871_v25 }
 0x192   :  { %1581 = vmatprep.mubr.f32.mxu0 %v308_v61  ;;  %v335_v61 = vld [vmem:[#allocation2 + $0x910] sm:$0xff]  ;;  %v4677_v63 = vpack.i.bf16 %v4046_v59, %v4045_v58  ;;  %v366_v58 = vld [vmem:[#allocation2 + $0xa08] sm:$0xff] }
 0x193   :  { %v6040_v62 = vpop.f32.mrb[44].mxu1 }
 0x194   :  { %v710_v9 = vpop.f32.mrb[45].mxu1  ;;  %1197 = vmatmul.mubr.f32.gmra.mrb[86].mxu1 %v305_v1  ;;  %v337_v1 = vld [vmem:[#allocation2 + $0x920] sm:$0xff]  ;;  %4678 = vperm.xlu1 %4581, %v4677_v63   ;;  %v599_v63 = vadd.f32 %v6084_v52, %v5946_v4  ;;  %v6110_v4 = vadd.f32 %v6084_v52, %v5974_v48 }
 0x195   :  { %1582 = vmatmul.mubr.f32.gmra.mrb[86].mxu0 %v307_v2  ;;  %1201 = vmatprep.mubr.f32.mxu1 %v312_v3  ;;  %v342_v2 = vld [vmem:[#allocation2 + $0x948] sm:$0xff] }
 0x196   :  { %1586 = vmatprep.mubr.f32.mxu0 %v314_v7  ;;  %v344_v7 = vld [vmem:[#allocation2 + $0x958] sm:$0xff] }
 0x197   :  { %v6042_v15 = vpop.f32.mrb[46].mxu1 }
 0x198   :  { %v715_v13 = vpop.f32.mrb[47].mxu1  ;;  %1202 = vmatmul.mubr.f32.gmra.mrb[88].mxu1 %v311_v10  ;;  %v341_v10 = vld [vmem:[#allocation2 + $0x940] sm:$0xff] }
 0x199   :  { %1587 = vmatmul.mubr.f32.gmra.mrb[88].mxu0 %v313_v11  ;;  %1206 = vmatprep.mubr.f32.mxu1 %v318_v14  ;;  %v343_v11 = vld [vmem:[#allocation2 + $0x950] sm:$0xff]  ;;  %v348_v14 = vld [vmem:[#allocation2 + $0x978] sm:$0xff]  ;;  %v1732_v13 = vld [vmem:[%s8868_s3 + $0x168] sm:$0xff] }
 0x19a   :  { %1591 = vmatprep.mubr.f32.mxu0 %v320_v16  ;;  %vm1796_vm13 = vcmp.ge.f32.partialorder %v1732_v13, 0.0  ;;  %v6129_v13 = vadd.f32 %v6084_v52, %v5990_v18  ;;  %v6145_v18 = vadd.f32 %v6084_v52, %v6000_v33 }
 0x19b   :  { %v6052_v35 = vpop.f32.mrb[48].mxu1 }
 0x19c   :  { %v720_v37 = vpop.f32.mrb[49].mxu1  ;;  %1207 = vmatmul.mubr.f32.gmra.mrb[90].mxu1 %v317_v24 }
 0x19d   :  { %1592 = vmatmul.mubr.f32.gmra.mrb[90].mxu0 %v319_v20  ;;  %1211 = vmatprep.mubr.f32.mxu1 %v324_v29  ;;  %v4048_v20 = vsel %vm1796_vm13, 1.0, %v8871_v25  ;;  %v349_v29 = vld [vmem:[#allocation2 + $0x980] sm:$0xff] }
 0x19e   :  { %1596 = vmatprep.mubr.f32.mxu0 %v326_v27  ;;  %v4682_v27 = vpack.i.bf16 %v4048_v20, %v4047_v28  ;;  %v1734_v28 = vld [vmem:[%s8868_s3 + $0x178] sm:$0xff] }
 0x19f   :  { %v6054_v43 = vpop.f32.mrb[50].mxu1  ;;  %vm1798_vm15 = vcmp.ge.f32.partialorder %v1734_v28, 0.0 }
 0x1a0   :  { %v725_v46 = vpop.f32.mrb[51].mxu1  ;;  %1212 = vmatmul.mubr.f32.gmra.mrb[92].mxu1 %v323_v38  ;;  %v356_v38 = vld [vmem:[#allocation2 + $0x9b8] sm:$0xff]  ;;  %4683 = vperm.xlu0 %4570, %v4682_v27   ;;  %v4050_v33 = vsel %vm1798_vm15, 1.0, %v8871_v25 }
 0x1a1   :  { %1597 = vmatmul.mubr.f32.gmra.mrb[92].mxu0 %v325_v36  ;;  %1216 = vmatprep.mubr.f32.mxu1 %v330_v42  ;;  %v353_v42 = vld [vmem:[#allocation2 + $0x9a0] sm:$0xff]  ;;  %v360_v46 = vld [vmem:[#allocation2 + $0x9d8] sm:$0xff] }
 0x1a2   :  { %1601 = vmatprep.mubr.f32.mxu0 %v332_v45  ;;  %v355_v45 = vld [vmem:[#allocation2 + $0x9b0] sm:$0xff] }
 0x1a3   :  { %v6062_v53 = vpop.f32.mrb[52].mxu1 }
 0x1a4   :  { %v730_v57 = vpop.f32.mrb[53].mxu1  ;;  %1217 = vmatmul.mubr.f32.gmra.mrb[94].mxu1 %v329_v47 }
 0x1a5   :  { %1602 = vmatmul.mubr.f32.gmra.mrb[94].mxu0 %v331_v0  ;;  %1221 = vmatprep.mubr.f32.mxu1 %v336_v44  ;;  %v362_v0 = vld [vmem:[#allocation2 + $0x9e8] sm:$0xff]  ;;  %v361_v57 = vld [vmem:[#allocation2 + $0x9e0] sm:$0xff] }
 0x1a6   :  { %1606 = vmatprep.mubr.f32.mxu0 %v338_v55  ;;  %v359_v55 = vld [vmem:[#allocation2 + $0x9d0] sm:$0xff] }
 0x1a7   :  { %v6066_v3 = vpop.f32.mrb[54].mxu1 }
 0x1a8   :  { %v735_v9 = vpop.f32.mrb[55].mxu1  ;;  %1222 = vmatmul.mubr.f32.gmra.mrb[96].mxu1 %v335_v61  ;;  %v368_v61 = vld [vmem:[#allocation2 + $0xa18] sm:$0xff] }
 0x1a9   :  { %1607 = vmatmul.mubr.f32.gmra.mrb[96].mxu0 %v337_v1  ;;  %1226 = vmatprep.mubr.f32.mxu1 %v342_v2  ;;  %v6092_v1 = vadd.f32 %v6084_v52, %v5950_v5  ;;  %v6096_v2 = vadd.f32 %v6084_v52, %v5952_v21  ;;  %v6098_v9 = vpop.permute.xlu0 %4577  ;;  %v365_v5 = vld [vmem:[#allocation2 + $0xa00] sm:$0xff]  ;;  %v6114_v21 = vadd.f32 %v6084_v52, %v5976_v54 }
 0x1aa   :  { %1611 = vmatprep.mubr.f32.mxu0 %v344_v7  ;;  %v6133_v54 = vadd.f32 %v6084_v52, %v5992_v23 }
 0x1ab   :  { %v6068_v16 = vpop.f32.mrb[56].mxu1 }
 0x1ac   :  { %v740_v24 = vpop.f32.mrb[57].mxu1  ;;  %1227 = vmatmul.mubr.f32.gmra.mrb[98].mxu1 %v341_v10  ;;  %v6102_v10 = vadd.f32 %v6084_v52, %v5962_v30  ;;  %v6122_v30 = vadd.f32 %v6084_v52, %v5986_v6 }
 0x1ad   :  { %1612 = vmatmul.mubr.f32.gmra.mrb[98].mxu0 %v343_v11  ;;  %1231 = vmatprep.mubr.f32.mxu1 %v348_v14  ;;  %v6106_v11 = vadd.f32 %v6084_v52, %v5964_v39  ;;  %v6118_v14 = vadd.f32 %v6084_v52, %v5978_v8  ;;  %v367_v39 = vld [vmem:[#allocation2 + $0xa10] sm:$0xff]  ;;  %v374_v8 = vld [vmem:[#allocation2 + $0xa48] sm:$0xff] }
 0x1ae   :  { %1616 = vmatprep.mubr.f32.mxu0 %v350_v17  ;;  %v372_v17 = vld [vmem:[#allocation2 + $0xa38] sm:$0xff] }
 0x1af   :  { %v6078_v37 = vpop.f32.mrb[58].mxu1 }
 0x1b0   :  { %v745_v36 = vpop.f32.mrb[59].mxu1  ;;  %1232 = vmatmul.mubr.f32.gmra.mrb[100].mxu1 %v347_v26  ;;  %v1733_v26 = vld [vmem:[%s8868_s3 + $0x170] sm:$0xff] }
 0x1b1   :  { %1617 = vmatmul.mubr.f32.gmra.mrb[100].mxu0 %v349_v29  ;;  %1236 = vmatprep.mubr.f32.mxu1 %v354_v32  ;;  %vm1797_vm14 = vcmp.ge.f32.partialorder %v1733_v26, 0.0  ;;  %v6150_v29 = vadd.f32 %v6084_v52, %v6004_v34  ;;  %v373_v34 = vld [vmem:[#allocation2 + $0xa40] sm:$0xff] }
 0x1b2   :  { %1621 = vmatprep.mubr.f32.mxu0 %v356_v38  ;;  %v371_v38 = vld [vmem:[#allocation2 + $0xa30] sm:$0xff]  ;;  %v4049_v36 = vsel %vm1797_vm14, 1.0, %v8871_v25 }
 0x1b3   :  { %v6080_v47 = vpop.f32.mrb[60].mxu1 }
 0x1b4   :  { %v750_v44 = vpop.f32.mrb[61].mxu1  ;;  %1237 = vmatmul.mubr.f32.gmra.mrb[102].mxu1 %v353_v42  ;;  %v6158_v42 = vadd.f32 %v6084_v52, %v6006_v49 }
 0x1b5   :  { %1622 = vmatmul.mubr.f32.gmra.mrb[102].mxu0 %v355_v45  ;;  %1241 = vmatprep.mubr.f32.mxu1 %v360_v46  ;;  %v6162_v45 = vadd.f32 %v6084_v52, %v6008_v50  ;;  %v378_v46 = vld [vmem:[#allocation2 + $0xa68] sm:$0xff]  ;;  %v6165_v44 = vpop.permute.xlu1 %4588  ;;  %v391_v50 = vld [vmem:[#allocation2 + $0xad0] sm:$0xff] }
 0x1b6   :  { %1626 = vmatprep.mubr.f32.mxu0 %v362_v0  ;;  %v396_v0 = vld [vmem:[#allocation2 + $0xaf8] sm:$0xff] }
 0x1b7   :  { %v6086_v59 = vpop.f32.mrb[62].mxu1 }
 0x1b8   :  { %v755_v7 = vpop.f32.mrb[63].mxu1  ;;  %1242 = vmatmul.mubr.f32.gmra.mrb[104].mxu1 %v359_v55  ;;  %v4687_v55 = vpack.i.bf16 %v4050_v33, %v4049_v36  ;;  %v6208_v33 = vadd.f32 %v6084_v52, %v6040_v62  ;;  %v6224_v62 = vadd.f32 %v6084_v52, %v6054_v43  ;;  %v383_v43 = vld [vmem:[#allocation2 + $0xa90] sm:$0xff]  ;;  %v1736_v36 = vld [vmem:[%s8868_s3 + $0x188] sm:$0xff] }
 0x1b9   :  { %1627 = vmatmul.mubr.f32.gmra.mrb[104].mxu0 %v361_v57  ;;  %1246 = vmatprep.mubr.f32.mxu1 %v366_v58  ;;  %v6169_v57 = vadd.f32 %v6084_v52, %v6010_v56  ;;  %v6180_v7 = vadd.f32 %v6084_v52, %v6022_v22  ;;  %v377_v22 = vld [vmem:[#allocation2 + $0xa60] sm:$0xff]  ;;  %vm1800_vm3 = vcmp.ge.f32.partialorder %v1736_v36, 0.0 }
 0x1ba   :  { %1631 = vmatprep.mubr.f32.mxu0 %v368_v61  ;;  %v380_v61 = vld [vmem:[#allocation2 + $0xa78] sm:$0xff]  ;;  %4688 = vperm.xlu1 %4581, %v4687_v55   ;;  %v6212_v55 = vpop.permute.xlu1 %4598 }
 0x1bc   :  { %v1368_v20 = vpop.f32.mrb[0].mxu0  ;;  %1247 = vmatmul.mubr.f32.gmra.mrb[106].mxu1 %v365_v5  ;;  %v6184_v5 = vadd.f32 %v6084_v52, %v6024_v31  ;;  %v6195_v31 = vadd.f32 %v6084_v52, %v6026_v40 }
 0x1bd   :  { %v6152_v32 = vadd.f32 %v1368_v20, %v599_v63  ;;  %v1370_v27 = vpop.f32.mrb[1].mxu0  ;;  %1632 = vmatmul.mubr.f32.gmra.mrb[106].mxu0 %v367_v39  ;;  %1251 = vmatprep.mubr.f32.mxu1 %v372_v17  ;;  %v6176_v63 = vadd.f32 %v6084_v52, %v6012_v12  ;;  %v6187_v17 = vpop.permute.xlu0 %4593  ;;  %v6199_v20 = vadd.f32 %v6084_v52, %v6036_v51 }
 0x1be   :  { %1636 = vmatprep.mubr.f32.mxu0 %v374_v8  ;;  %v6203_v27 = vadd.f32 %v6084_v52, %v6038_v60  ;;  %v6216_v60 = vadd.f32 %v6084_v52, %v6042_v15  ;;  %v1738_v15 = vld [vmem:[%s8868_s3 + $0x198] sm:$0xff]  ;;  %v6290_v6 = vpop.permute.xlu1 %4608 }
 0x1bf   :  { %v4067_v58 = vmul.f32 -1.442695, %v6152_v32  ;;  %v2968_v49 = vand.u32 2147483647, %v6152_v32  ;;  %vm1802_vm1 = vcmp.ge.f32.partialorder %v1738_v15, 0.0 }
 0x1c0   :  { %v1373_v56 = vpop.f32.mrb[2].mxu0  ;;  %1252 = vmatmul.mubr.f32.gmra.mrb[108].mxu1 %v371_v38  ;;  %v384_v38 = vld [vmem:[#allocation2 + $0xa98] sm:$0xff] }
 0x1c1   :  { %4732 = vpow2.f32 %v4067_v58  ;;  %v3032_v8 = vsub.f32 0.0, %v2968_v49  ;;  %v6190_v12 = vadd.f32 %v1373_v56, %v6092_v1  ;;  %v1375_v26 = vpop.f32.mrb[3].mxu0  ;;  %1637 = vmatmul.mubr.f32.gmra.mrb[108].mxu0 %v373_v34  ;;  %1256 = vmatprep.mubr.f32.mxu1 %v378_v46  ;;  %v379_v1 = vld [vmem:[#allocation2 + $0xa70] sm:$0xff]  ;;  %v386_v46 = vld [vmem:[#allocation2 + $0xaa8] sm:$0xff]  ;;  %v6220_v58 = vadd.f32 %v6084_v52, %v6052_v35 }
 0x1c2   :  { %1641 = vmatprep.mubr.f32.mxu0 %v380_v61  ;;  %v1737_v56 = vld [vmem:[%s8868_s3 + $0x190] sm:$0xff]  ;;  %v392_v26 = vld [vmem:[#allocation2 + $0xad8] sm:$0xff] }
 0x1c3   :  { %v3096_v34 = vmul.f32 1.442695, %v3032_v8  ;;  %v4068_v40 = vmul.f32 -1.442695, %v6190_v12  ;;  %v2969_v49 = vand.u32 2147483647, %v6190_v12 }
 0x1c4   :  { %v1378_v61 = vpop.f32.mrb[4].mxu0  ;;  %1257 = vmatmul.mubr.f32.gmra.mrb[110].mxu1 %v377_v22  ;;  %vm1801_vm0 = vcmp.ge.f32.partialorder %v1737_v56, 0.0  ;;  %v1735_v22 = vld [vmem:[%s8868_s3 + $0x180] sm:$0xff] }
 0x1c5   :  { %4734 = vpow2.f32 %v3096_v34  ;;  %v6234_v35 = vadd.f32 %v1378_v61, %v6096_v2  ;;  %v1380_v8 = vpop.f32.mrb[5].mxu0  ;;  %1642 = vmatmul.mubr.f32.gmra.mrb[110].mxu0 %v379_v1  ;;  %1261 = vmatprep.mubr.f32.mxu1 %v384_v38  ;;  %v3033_v34 = vsub.f32 0.0, %v2969_v49  ;;  %v385_v2 = vld [vmem:[#allocation2 + $0xaa0] sm:$0xff]  ;;  %v390_v61 = vld [vmem:[#allocation2 + $0xac8] sm:$0xff]  ;;  %v6246_v38 = vadd.f32 %v6084_v52, %v6062_v53 }
 0x1c6   :  { %4736 = vpow2.f32 %v4068_v40  ;;  %1646 = vmatprep.mubr.f32.mxu0 %v386_v46  ;;  %v4053_v51 = vsel %vm1801_vm0, 1.0, %v8871_v25  ;;  %v6251_v46 = vpop.permute.xlu0 %4603  ;;  %v4054_v49 = vsel %vm1802_vm1, 1.0, %v8871_v25  ;;  %vm1799_vm2 = vcmp.ge.f32.partialorder %v1735_v22, 0.0 }
 0x1c7   :  { %v4069_v56 = vmul.f32 -1.442695, %v6234_v35  ;;  %v2970_v8 = vand.u32 2147483647, %v6234_v35  ;;  %v3098_v39 = vmul.f32 1.442695, %v3033_v34  ;;  %v6256_v53 = vadd.f32 %v6084_v52, %v6066_v3 }
 0x1c8   :  { %v1383_v40 = vpop.f32.mrb[6].mxu0  ;;  %1262 = vmatmul.mubr.f32.gmra.mrb[112].mxu1 %v383_v43  ;;  %v389_v34 = vld [vmem:[#allocation2 + $0xac0] sm:$0xff]  ;;  %v1741_v43 = vld [vmem:[%s8868_s3 + $0x1b0] sm:$0xff]  ;;  %v4697_v23 = vpack.i.bf16 %v4054_v49, %v4053_v51  ;;  %v4051_v3 = vsel %vm1799_vm2, 1.0, %v8871_v25  ;;  %v6281_v49 = vadd.f32 %v6084_v52, %v6078_v37  ;;  %v402_v37 = vld [vmem:[#allocation2 + $0xb28] sm:$0xff] }
 0x1c9   :  { %8892 = vst [vmem:[#allocation8_spill] sm:$0xff] %v6256_v53  ;;  %4738 = vpow2.f32 %v4069_v56  ;;  %v3034_v15 = vsub.f32 0.0, %v2970_v8  ;;  %v6259_v1 = vadd.f32 %v1383_v40, %v6102_v10  ;;  %v1385_v28 = vpop.f32.mrb[7].mxu0  ;;  %1647 = vmatmul.mubr.f32.gmra.mrb[112].mxu0 %v385_v2  ;;  %1266 = vmatprep.mubr.f32.mxu1 %v390_v61  ;;  %v4052_v10 = vsel %vm1800_vm3, 1.0, %v8871_v25 }
 0x1ca   :  { %4740 = vpow2.f32 %v3098_v39  ;;  %1651 = vmatprep.mubr.f32.mxu0 %v392_v26  ;;  %v1742_v28 = vld [vmem:[%s8868_s3 + $0x1b8] sm:$0xff]  ;;  %v6273_v61 = vadd.f32 %v6084_v52, %v6068_v16  ;;  %v398_v26 = vld [vmem:[#allocation2 + $0xb08] sm:$0xff]  ;;  %4698 = vperm.xlu1 %4581, %v4697_v23   ;;  %v4692_v40 = vpack.i.bf16 %v4052_v10, %v4051_v3  ;;  %vm1805_vm4 = vcmp.ge.f32.partialorder %v1741_v43, 0.0  ;;  %8894 = vst [vmem:[#allocation10_spill] sm:$0xff] %v6281_v49 }
 0x1cb   :  { %v4733_v2 = vpop.eup %4732  ;;  %v4070_v39 = vmul.f32 -1.442695, %v6259_v1  ;;  %v2971_v36 = vand.u32 2147483647, %v6259_v1  ;;  %v6285_v16 = vadd.f32 %v6084_v52, %v6080_v47  ;;  %vm1806_vm5 = vcmp.ge.f32.partialorder %v1742_v28, 0.0  ;;  %v404_v10 = vld [vmem:[#allocation2 + $0xb38] sm:$0xff] }
 0x1cc   :  { %8893 = vst [vmem:[#allocation9_spill] sm:$0xff] %v6273_v61  ;;  %v2135_v56 = vadd.f32 1.0, %v4733_v2  ;;  %v1388_v8 = vpop.f32.mrb[8].mxu0  ;;  %1267 = vmatmul.mubr.f32.gmra.mrb[114].mxu1 %v389_v34  ;;  %v395_v2 = vld [vmem:[#allocation2 + $0xaf0] sm:$0xff]  ;;  %v3100_v23 = vmul.f32 1.442695, %v3034_v15  ;;  %4693 = vperm.xlu0 %4570, %v4692_v40  }
 0x1cd   :  { %8895 = vst [vmem:[#allocation11_spill] sm:$0xff] %v6285_v16  ;;  %v6288_v51 = vadd.f32 %v1388_v8, %v6106_v11  ;;  %v1390_v22 = vpop.f32.mrb[9].mxu0  ;;  %1652 = vmatmul.mubr.f32.gmra.mrb[114].mxu0 %v391_v50  ;;  %1271 = vmatprep.mubr.f32.mxu1 %v396_v0  ;;  %v397_v34 = vld [vmem:[#allocation2 + $0xb00] sm:$0xff]  ;;  %v4057_v47 = vsel %vm1805_vm4, 1.0, %v8871_v25  ;;  %v4058_v3 = vsel %vm1806_vm5, 1.0, %v8871_v25  ;;  %v3035_v50 = vsub.f32 0.0, %v2971_v36 }
 0x1ce   :  { %4742 = vrcp.f32 %v2135_v56  ;;  %1656 = vmatprep.mubr.f32.mxu0 %v398_v26  ;;  %v4707_v8 = vpack.i.bf16 %v4058_v3, %v4057_v47  ;;  %v401_v28 = vld [vmem:[#allocation2 + $0xb20] sm:$0xff]  ;;  %v408_v3 = vld [vmem:[#allocation2 + $0xb58] sm:$0xff] }
 0x1cf   :  { %v6295_v11 = vpop.eup %4734  ;;  %4744 = vpow2.f32 %v4070_v39  ;;  %v4071_v0 = vmul.f32 -1.442695, %v6288_v51  ;;  %v2972_v15 = vand.u32 2147483647, %v6288_v51  ;;  %v6304_v39 = vadd.f32 %v6084_v52, %v6086_v59  ;;  %v5244_v56 = vld [vmem:[%s8868_s3] sm:$0xff]  ;;  %v403_v59 = vld [vmem:[#allocation2 + $0xb30] sm:$0xff] }
 0x1d0   :  { %v4737_v22 = vpop.eup %4736  ;;  %v1393_v26 = vpop.f32.mrb[10].mxu0  ;;  %1272 = vmatmul.mubr.f32.gmra.mrb[116].mxu1 %v395_v2  ;;  %v3224_v43 = vadd.f32 1.0, %v6295_v11  ;;  %v2776_v2 = vmax.f32 %v6152_v32, 0.0  ;;  %v2840_v47 = vmul.f32 %v5244_v56, %v6152_v32  ;;  %v2777_v52 = vmax.f32 %v6190_v12, 0.0  ;;  %4708 = vperm.xlu1 %4581, %v4707_v8   ;;  %v5245_v32 = vld [vmem:[%s8868_s3 + $0x8] sm:$0xff] }
 0x1d1   :  { %8896 = vst [vmem:[#allocation12_spill] sm:$0xff] %v6304_v39  ;;  %v2136_v36 = vadd.f32 1.0, %v4737_v22  ;;  %4746 = vpow2.f32 %v4071_v0  ;;  %v6307_v40 = vadd.f32 %v1393_v26, %v6110_v4  ;;  %v1395_v25 = vpop.f32.mrb[11].mxu0  ;;  %1657 = vmatmul.mubr.f32.gmra.mrb[116].mxu0 %v397_v34  ;;  %1276 = vmatprep.mubr.f32.mxu1 %v402_v37  ;;  %v3036_v34 = vsub.f32 0.0, %v2972_v15  ;;  %v410_v0 = vld [vmem:[#allocation2 + $0xb68] sm:$0xff] }
 0x1d2   :  { %4748 = vpow2.f32 %v3100_v23  ;;  %1661 = vmatprep.mubr.f32.mxu0 %v404_v10  ;;  %v3102_v25 = vmul.f32 1.442695, %v3035_v50  ;;  %v2841_v26 = vmul.f32 %v5245_v32, %v6190_v12  ;;  %v2778_v10 = vmax.f32 %v6234_v35, 0.0  ;;  %v5246_v50 = vld [vmem:[%s8868_s3 + $0x10] sm:$0xff]  ;;  %v414_v32 = vld [vmem:[#allocation2 + $0xb88] sm:$0xff] }
 0x1d3   :  { %v4739_v4 = vpop.eup %4738  ;;  %4750 = vrcp.f32 %v2136_v36  ;;  %v4072_v37 = vmul.f32 -1.442695, %v6307_v40  ;;  %v2842_v15 = vmul.f32 %v5246_v50, %v6234_v35  ;;  %v2973_v8 = vand.u32 2147483647, %v6307_v40  ;;  %v407_v12 = vld [vmem:[#allocation2 + $0xb50] sm:$0xff] }
 0x1d4   :  { %v6316_v22 = vpop.eup %4740  ;;  %v2137_v23 = vadd.f32 1.0, %v4739_v4  ;;  %v1398_v56 = vpop.f32.mrb[12].mxu0  ;;  %1277 = vmatmul.mubr.f32.gmra.mrb[118].mxu1 %v401_v28  ;;  %4752 = vlog2.f32 %v3224_v43  ;;  %v2779_v28 = vmax.f32 %v6259_v1, 0.0  ;;  %v5247_v43 = vld [vmem:[%s8868_s3 + $0x18] sm:$0xff]  ;;  %v6341_v50 = vsub.f32 %v2776_v2, %v2840_v47  ;;  %v413_v2 = vld [vmem:[#allocation2 + $0xb80] sm:$0xff] }
 0x1d5   :  { %4754 = vpow2.f32 %v4072_v37  ;;  %v6329_v36 = vadd.f32 %v1398_v56, %v6114_v21  ;;  %v1400_v24 = vpop.f32.mrb[13].mxu0  ;;  %1662 = vmatmul.mubr.f32.gmra.mrb[118].mxu0 %v403_v59  ;;  %1281 = vmatprep.mubr.f32.mxu1 %v408_v3  ;;  %v6331_v4 = vpop.permute.xlu0 %4613  ;;  %v2843_v35 = vmul.f32 %v5247_v43, %v6259_v1  ;;  %v3233_v37 = vadd.f32 1.0, %v6316_v22  ;;  %v409_v21 = vld [vmem:[#allocation2 + $0xb60] sm:$0xff] }
 0x1d6   :  { %4756 = vrcp.f32 %v2137_v23  ;;  %1666 = vmatprep.mubr.f32.mxu0 %v410_v0  ;;  %v3104_v24 = vmul.f32 1.442695, %v3036_v34  ;;  %v3227_v3 = vmul.f32 -0.5, %v6295_v11  ;;  %v416_v23 = vld [vmem:[#allocation2 + $0xb98] sm:$0xff]  ;;  %v3037_v39 = vsub.f32 0.0, %v2973_v8  ;;  %v415_v8 = vld [vmem:[#allocation2 + $0xb90] sm:$0xff] }
 0x1d7   :  { %4758 = vpow2.f32 %v3102_v25  ;;  %v4073_v59 = vmul.f32 -1.442695, %v6329_v36  ;;  %v8897_v25 = vunpack.i.l.bf16 %v6082_v41  ;;  %v3236_v16 = vmul.f32 -0.5, %v6316_v22 }
 0x1d8   :  { %v4743_v56 = vpop.eup %4742  ;;  %4760 = vlog2.f32 %v3233_v37  ;;  %v1403_v48 = vpop.f32.mrb[14].mxu0  ;;  %1282 = vmatmul.mubr.f32.gmra.mrb[120].mxu1 %v407_v12  ;;  %v6348_v37 = vsub.f32 %v2777_v52, %v2841_v26  ;;  %v6353_v1 = vsub.f32 %v2778_v10, %v2842_v15  ;;  %v6360_v52 = vsub.f32 %v2779_v28, %v2843_v35  ;;  %v419_v26 = vld [vmem:[#allocation2 + $0xbb0] sm:$0xff] }
 0x1d9   :  { %v4745_v0 = vpop.eup %4744  ;;  %4762 = vpow2.f32 %v4073_v59  ;;  %v2647_v34 = vmul.f32 %v4743_v56, %v8897_v25  ;;  %v1405_v49 = vpop.f32.mrb[15].mxu0  ;;  %1667 = vmatmul.mubr.f32.gmra.mrb[120].mxu0 %v409_v21  ;;  %1286 = vmatprep.mubr.f32.mxu1 %v414_v32  ;;  %v6351_v12 = vadd.f32 %v1403_v48, %v6118_v14  ;;  %v420_v59 = vld [vmem:[#allocation2 + $0xbb8] sm:$0xff]  ;;  %v422_v14 = vld [vmem:[#allocation2 + $0xbc8] sm:$0xff]  ;;  %v3230_v15 = vand.u32 2147483647, %v6295_v11 }
 0x1da   :  { %v2138_v47 = vadd.f32 1.0, %v4745_v0  ;;  %1671 = vmatprep.mubr.f32.mxu0 %v416_v23  ;;  %4764 = vpow2.f32 %v3104_v24  ;;  %v3228_v49 = vadd.f32 1.0, %v3227_v3  ;;  %v3106_v23 = vmul.f32 1.442695, %v3037_v39 }
 0x1db   :  { %v4747_v43 = vpop.eup %4746  ;;  %2712 = vst.msk [vmem:[%s8869_s4] sm:$0xff] %vm2711_vm6, %v2647_v34  ;;  %v4074_v21 = vmul.f32 -1.442695, %v6351_v12  ;;  %v2974_v0 = vand.u32 2147483647, %v6329_v36  ;;  %v3237_v25 = vadd.f32 1.0, %v3236_v16 }
 0x1dc   :  { %v6362_v48 = vpop.eup %4748  ;;  %4766 = vrcp.f32 %v2138_v47  ;;  %v2139_v10 = vadd.f32 1.0, %v4747_v43  ;;  %v1408_v32 = vpop.f32.mrb[16].mxu0  ;;  %1287 = vmatmul.mubr.f32.gmra.mrb[122].mxu1 %v413_v2  ;;  %v5248_v43 = vld [vmem:[%s8868_s3 + $0x20] sm:$0xff]  ;;  %v8898_v2 = vunpack.i.h.bf16 %v6082_v41  ;;  %v3239_v47 = vand.u32 2147483647, %v6316_v22 }
 0x1dd   :  { %v4751_v24 = vpop.eup %4750  ;;  %v6368_v28 = vadd.f32 %v1408_v32, %v6122_v30  ;;  %v1410_v35 = vpop.f32.mrb[17].mxu0  ;;  %1672 = vmatmul.mubr.f32.gmra.mrb[122].mxu0 %v415_v8  ;;  %1291 = vmatprep.mubr.f32.mxu1 %v420_v59  ;;  %v2844_v34 = vmul.f32 %v5248_v43, %v6288_v51  ;;  %v421_v16 = vld [vmem:[#allocation2 + $0xbc0] sm:$0xff]  ;;  %v426_v30 = vld [vmem:[#allocation2 + $0xbe8] sm:$0xff]  ;;  %v428_v32 = vld [vmem:[#allocation2 + $0xbf8] sm:$0xff]  ;;  %v3229_v59 = vmul.f32 %v6295_v11, %v3228_v49  ;;  %vm6384_vm7 = vcmp.lt.f32.partialorder %v3230_v15, 0.0004427343 }
 0x1de   :  { %v4753_v3 = vpop.eup %4752  ;;  %4768 = vrcp.f32 %v2139_v10  ;;  %v2648_v39 = vmul.f32 %v4751_v24, %v8898_v2  ;;  %1676 = vmatprep.mubr.f32.mxu0 %v422_v14  ;;  %v2975_v10 = vand.u32 2147483647, %v6351_v12  ;;  %v3242_v24 = vadd.f32 1.0, %v6362_v48  ;;  %v425_v15 = vld [vmem:[#allocation2 + $0xbe0] sm:$0xff]  ;;  %v427_v14 = vld [vmem:[#allocation2 + $0xbf0] sm:$0xff] }
 0x1df   :  { %v4755_v35 = vpop.eup %4754  ;;  %v3226_v8 = vmul.f32 0.6931472, %v4753_v3  ;;  %v4075_v56 = vmul.f32 -1.442695, %v6368_v28  ;;  %4770 = vpow2.f32 %v4074_v21  ;;  %v3038_v49 = vsub.f32 0.0, %v2974_v0 }
 0x1e0   :  { %v4757_v61 = vpop.eup %4756  ;;  %v2140_v53 = vadd.f32 1.0, %v4755_v35  ;;  %2713 = vst.msk [vmem:[%s8869_s4 + $0x8] sm:$0xff] %vm2711_vm6, %v2648_v39  ;;  %v1413_v3 = vpop.f32.mrb[18].mxu0  ;;  %1292 = vmatmul.mubr.f32.gmra.mrb[124].mxu1 %v419_v26  ;;  %4772 = vpow2.f32 %v3106_v23  ;;  %v3238_v2 = vmul.f32 %v6316_v22, %v3237_v25  ;;  %vm6394_vm8 = vcmp.lt.f32.partialorder %v3239_v47, 0.0004427343 }
 0x1e1   :  { %v6389_v11 = vpop.eup %4758  ;;  %v3232_v43 = vsel %vm6384_vm7, %v3229_v59, %v3226_v8  ;;  %v1415_v35 = vpop.f32.mrb[19].mxu0  ;;  %1677 = vmatmul.mubr.f32.gmra.mrb[124].mxu0 %v421_v16  ;;  %1296 = vmatprep.mubr.f32.mxu1 %v426_v30  ;;  %v8903_v23 = vunpack.i.l.bf16 %v6098_v9  ;;  %v3039_v22 = vsub.f32 0.0, %v2975_v10  ;;  %v2976_v25 = vand.u32 2147483647, %v6368_v28 }
 0x1e2   :  { %v4761_v39 = vpop.eup %4760  ;;  %4774 = vrcp.f32 %v2140_v53  ;;  %v3800_v26 = vadd.f32 %v3232_v43, %v6341_v50  ;;  %1681 = vmatprep.mubr.f32.mxu0 %v428_v32  ;;  %v8904_v53 = vunpack.i.l.bf16 %v6082_v41  ;;  %v3108_v32 = vmul.f32 1.442695, %v3038_v49 }
 0x1e3   :  { %v2649_v0 = vmul.f32 %v4757_v61, %v8903_v23  ;;  %v4763_v8 = vpop.eup %4762  ;;  %v3235_v59 = vmul.f32 0.6931472, %v4761_v39  ;;  %4776 = vpow2.f32 %v4075_v56  ;;  %v3251_v61 = vadd.f32 1.0, %v6389_v11 }
 0x1e4   :  { %v2141_v16 = vadd.f32 1.0, %v4763_v8  ;;  %v3864_v47 = vmul.f32 %v8904_v53, %v3800_v26  ;;  %4778 = vlog2.f32 %v3242_v24  ;;  %v1418_v50 = vpop.f32.mrb[20].mxu0  ;;  %1297 = vmatmul.mubr.f32.gmra.mrb[126].mxu1 %v425_v15  ;;  %v6409_v30 = vpop.eup %4764  ;;  %v8905_v35 = vmax.f32 %v6288_v51, 0.0  ;;  %v5249_v51 = vld [vmem:[%s8868_s3 + $0x28] sm:$0xff]  ;;  %v5250_v53 = vld [vmem:[%s8868_s3 + $0x30] sm:$0xff] }
 0x1e5   :  { %2714 = vst.msk [vmem:[%s8869_s4 + $0x10] sm:$0xff] %vm2711_vm6, %v2649_v0  ;;  %v3241_v10 = vsel %vm6394_vm8, %v3238_v2, %v3235_v59  ;;  %v1420_v43 = vpop.f32.mrb[21].mxu0  ;;  %1682 = vmatmul.mubr.f32.gmra.mrb[126].mxu0 %v427_v14  ;;  %v3245_v15 = vmul.f32 -0.5, %v6362_v48  ;;  %v6425_v49 = vadd.f32 %v1413_v3, %v6129_v13  ;;  %v6428_v2 = vadd.f32 %v1418_v50, %v6133_v54 }
 0x1e6   :  { %v6416_v39 = vsub.f32 %v8905_v35, %v2844_v34  ;;  %v4767_v26 = vpop.eup %4766  ;;  %v3801_v24 = vadd.f32 %v3241_v10, %v6348_v37  ;;  %3928 = vst.msk [vmem:[%s8870_s5] sm:$0xff] %vm2711_vm6, %v3864_v47  ;;  %v6434_v34 = vmul.f32 %v5249_v51, %v6307_v40  ;;  %4780 = vrcp.f32 %v2141_v16 }
 0x1e7   :  { %v3110_v37 = vmul.f32 1.442695, %v3039_v22  ;;  %v8906_v21 = vunpack.i.h.bf16 %v6098_v9  ;;  %v8907_v14 = vunpack.i.h.bf16 %v6082_v41  ;;  %v3040_v3 = vsub.f32 0.0, %v2976_v25 }
 0x1e8   :  { %v4769_v0 = vpop.eup %4768  ;;  %4782 = vlog2.f32 %v3251_v61  ;;  %v4076_v54 = vmul.f32 -1.442695, %v6425_v49  ;;  %v1423_v8 = vpop.f32.mrb[22].mxu0  ;;  %v6446_v22 = vmul.f32 %v5250_v53, %v6329_v36  ;;  %v4077_v41 = vmul.f32 -1.442695, %v6428_v2 }
 0x1e9   :  { %v2650_v23 = vmul.f32 %v4767_v26, %v8906_v21  ;;  %v3865_v13 = vmul.f32 %v8907_v14, %v3801_v24  ;;  %4784 = vpow2.f32 %v3108_v32  ;;  %v1425_v25 = vpop.f32.mrb[23].mxu0  ;;  %v4771_v16 = vpop.eup %4770  ;;  %v3246_v47 = vadd.f32 1.0, %v3245_v15 }
 0x1ea   :  { %v3248_v61 = vand.u32 2147483647, %v6362_v48  ;;  %4786 = vpow2.f32 %v4076_v54  ;;  %v2977_v50 = vand.u32 2147483647, %v6425_v49  ;;  %v6459_v32 = vpop.eup %4772  ;;  %v2142_v10 = vadd.f32 1.0, %v4771_v16 }
 0x1eb   :  { %2715 = vst.msk [vmem:[%s8869_s4 + $0x18] sm:$0xff] %vm2711_vm6, %v2650_v23  ;;  %3929 = vst.msk [vmem:[%s8870_s5 + $0x8] sm:$0xff] %vm2711_vm6, %v3865_v13  ;;  %4788 = vpow2.f32 %v3110_v37  ;;  %v3254_v43 = vmul.f32 -0.5, %v6389_v11  ;;  %v8908_v35 = vunpack.i.l.bf16 %v6125_v19  ;;  %v3112_v21 = vmul.f32 1.442695, %v3040_v3 }
 0x1ec   :  { %v4775_v24 = vpop.eup %4774  ;;  %v3257_v15 = vand.u32 2147483647, %v6389_v11  ;;  %4790 = vpow2.f32 %v4077_v41  ;;  %v1428_v23 = vpop.f32.mrb[24].mxu0  ;;  %v2978_v13 = vand.u32 2147483647, %v6428_v2  ;;  %v8909_v54 = vunpack.i.h.bf16 %v6125_v19  ;;  %v5251_v41 = vld [vmem:[%s8868_s3 + $0x38] sm:$0xff] }
 0x1ed   :  { %v2651_v26 = vmul.f32 %v4769_v0, %v8908_v35  ;;  %v4777_v14 = vpop.eup %4776  ;;  %4792 = vrcp.f32 %v2142_v10  ;;  %v3260_v0 = vadd.f32 1.0, %v6409_v30  ;;  %v1430_v53 = vpop.f32.mrb[25].mxu0  ;;  %v6478_v25 = vmul.f32 %v5251_v41, %v6351_v12 }
 0x1ee   :  { %v2652_v37 = vmul.f32 %v4775_v24, %v8909_v54  ;;  %v4779_v3 = vpop.eup %4778  ;;  %v3041_v10 = vsub.f32 0.0, %v2977_v50  ;;  %v3269_v35 = vadd.f32 1.0, %v6459_v32  ;;  %v3247_v53 = vmul.f32 %v6362_v48, %v3246_v47 }
 0x1ef   :  { %2716 = vst.msk [vmem:[%s8869_s4 + $0x20] sm:$0xff] %vm2711_vm6, %v2651_v26  ;;  %v5252_v26 = vld [vmem:[%s8868_s3 + $0x40] sm:$0xff]  ;;  %v3244_v54 = vmul.f32 0.6931472, %v4779_v3  ;;  %v3255_v51 = vadd.f32 1.0, %v3254_v43  ;;  %4794 = vpow2.f32 %v3112_v21  ;;  %v6498_v41 = vadd.f32 %v1423_v8, %v6145_v18 }
 0x1f0   :  { %v6486_v24 = vmul.f32 %v5252_v26, %v6368_v28  ;;  %2717 = vst.msk [vmem:[%s8869_s4 + $0x28] sm:$0xff] %vm2711_vm6, %v2652_v37  ;;  %vm3249_vm9 = vcmp.lt.f32.partialorder %v3248_v61, 0.0004427343  ;;  %vm6493_vm10 = vcmp.lt.f32.partialorder %v3257_v15, 0.0004427343  ;;  %v6500_v26 = vpop.f32.mrb[26].mxu0  ;;  %v4781_v3 = vpop.eup %4780  ;;  %4796 = vlog2.f32 %v3260_v0 }
 0x1f1   :  { %v2143_v16 = vadd.f32 1.0, %v4777_v14  ;;  %v3250_v48 = vsel %vm3249_vm9, %v3247_v53, %v3244_v54  ;;  %v3042_v47 = vsub.f32 0.0, %v2978_v13  ;;  %v1435_v43 = vpop.f32.mrb[27].mxu0  ;;  %v3114_v21 = vmul.f32 1.442695, %v3041_v10 }
 0x1f2   :  { %v4783_v59 = vpop.eup %4782  ;;  %v3802_v37 = vadd.f32 %v3250_v48, %v6353_v1  ;;  %4798 = vlog2.f32 %v3269_v35  ;;  %v4078_v61 = vmul.f32 -1.442695, %v6498_v41  ;;  %v3256_v18 = vmul.f32 %v6389_v11, %v3255_v51 }
 0x1f3   :  { %v6504_v15 = vpop.eup %4784  ;;  %v3253_v56 = vmul.f32 0.6931472, %v4783_v59  ;;  %v3263_v14 = vmul.f32 -0.5, %v6409_v30  ;;  %v8912_v13 = vunpack.i.l.bf16 %v6098_v9  ;;  %v3272_v53 = vmul.f32 -0.5, %v6459_v32 }
 0x1f4   :  { %v4787_v54 = vpop.eup %4786  ;;  %4800 = vpow2.f32 %v4078_v61  ;;  %v6513_v1 = vadd.f32 %v1428_v23, %v6150_v29  ;;  %v1438_v10 = vpop.f32.mrb[28].mxu0  ;;  %v8913_v51 = vunpack.i.l.bf16 %v6165_v44  ;;  %v3116_v29 = vmul.f32 1.442695, %v3042_v47 }
 0x1f5   :  { %v3866_v0 = vmul.f32 %v8912_v13, %v3802_v37  ;;  %v6515_v35 = vpop.eup %4788  ;;  %4802 = vrcp.f32 %v2143_v16  ;;  %v3259_v11 = vsel %vm6493_vm10, %v3256_v18, %v3253_v56  ;;  %v2144_v59 = vadd.f32 1.0, %v4787_v54  ;;  %v1440_v43 = vpop.f32.mrb[29].mxu0  ;;  %v5253_v56 = vld [vmem:[%s8868_s3 + $0x48] sm:$0xff] }
 0x1f6   :  { %v2653_v48 = vmul.f32 %v4781_v3, %v8913_v51  ;;  %v4791_v8 = vpop.eup %4790  ;;  %v3803_v37 = vadd.f32 %v3259_v11, %v6360_v52  ;;  %4804 = vpow2.f32 %v3114_v21  ;;  %v4079_v23 = vmul.f32 -1.442695, %v6513_v1 }
 0x1f7   :  { %3930 = vst.msk [vmem:[%s8870_s5 + $0x10] sm:$0xff] %vm2711_vm6, %v3866_v0  ;;  %v4793_v16 = vpop.eup %4792  ;;  %4806 = vrcp.f32 %v2144_v59  ;;  %v6531_v50 = vmul.f32 %v5253_v56, %v6425_v49  ;;  %v3264_v3 = vadd.f32 1.0, %v3263_v14  ;;  %v3266_v52 = vand.u32 2147483647, %v6409_v30 }
 0x1f8   :  { %2718 = vst.msk [vmem:[%s8869_s4 + $0x30] sm:$0xff] %vm2711_vm6, %v2653_v48  ;;  %v8914_v47 = vunpack.i.h.bf16 %v6098_v9  ;;  %v3273_v61 = vadd.f32 1.0, %v3272_v53  ;;  %v3275_v18 = vand.u32 2147483647, %v6459_v32  ;;  %v8915_v54 = vunpack.i.h.bf16 %v6165_v44  ;;  %v6543_v0 = vpop.f32.mrb[30].mxu0  ;;  %v5254_v53 = vld [vmem:[%s8868_s3 + $0x50] sm:$0xff] }
 0x1f9   :  { %v2145_v11 = vadd.f32 1.0, %v4791_v8  ;;  %v2979_v14 = vand.u32 2147483647, %v6498_v41  ;;  %4808 = vpow2.f32 %v4079_v23  ;;  %v3278_v59 = vadd.f32 1.0, %v6504_v15  ;;  %v1445_v51 = vpop.f32.mrb[31].mxu0  ;;  %v6547_v43 = vpop.eup %4794 }
 0x1fa   :  { %v3867_v21 = vmul.f32 %v8914_v47, %v3803_v37  ;;  %v2654_v13 = vmul.f32 %v4793_v16, %v8915_v54  ;;  %v6558_v8 = vmul.f32 %v5254_v53, %v6428_v2  ;;  %4810 = vpow2.f32 %v3116_v29  ;;  %v4797_v37 = vpop.eup %4796 }
 0x1fb   :  { %v3287_v48 = vadd.f32 1.0, %v6515_v35  ;;  %v8916_v23 = vmax.f32 %v6307_v40, 0.0  ;;  %v3265_v56 = vmul.f32 %v6409_v30, %v3264_v3  ;;  %vm6569_vm11 = vcmp.lt.f32.partialorder %v3266_v52, 0.0004427343 }
 0x1fc   :  { %3931 = vst.msk [vmem:[%s8870_s5 + $0x18] sm:$0xff] %vm2711_vm6, %v3867_v21  ;;  %2719 = vst.msk [vmem:[%s8869_s4 + $0x38] sm:$0xff] %vm2711_vm6, %v2654_v13  ;;  %4812 = vlog2.f32 %v3278_v59  ;;  %v4799_v29 = vpop.eup %4798  ;;  %v3262_v21 = vmul.f32 0.6931472, %v4797_v37  ;;  %v3274_v54 = vmul.f32 %v6459_v32, %v3273_v61  ;;  %vm6574_vm12 = vcmp.lt.f32.partialorder %v3275_v18, 0.0004427343 }
 0x1fd   :  { %v2909_v16 = vsub.f32 %v8916_v23, %v6434_v34  ;;  %4814 = vlog2.f32 %v3287_v48  ;;  %v6578_v51 = vpop.f32.mrb[32].mxu0  ;;  %v3271_v40 = vmul.f32 0.6931472, %v4799_v29  ;;  %v3043_v34 = vsub.f32 0.0, %v2979_v14 }
 0x1fe   :  { %4816 = vrcp.f32 %v2145_v11  ;;  %v2980_v30 = vand.u32 2147483647, %v6513_v1  ;;  %v1450_v3 = vpop.f32.mrb[33].mxu0  ;;  %v4801_v52 = vpop.eup %4800  ;;  %v3268_v59 = vsel %vm6569_vm11, %v3265_v56, %v3262_v21  ;;  %v3281_v53 = vmul.f32 -0.5, %v6504_v15 }
 0x1ff   :  { %v6586_v32 = vadd.f32 %v6500_v26, %v6158_v42  ;;  %v6589_v61 = vadd.f32 %v1438_v10, %v6162_v45  ;;  %v4803_v18 = vpop.eup %4802  ;;  %v3277_v11 = vsel %vm6574_vm12, %v3274_v54, %v3271_v40  ;;  %v3804_v14 = vadd.f32 %v3268_v59, %v6416_v39  ;;  %v5255_v42 = vld [vmem:[%s8868_s3 + $0x58] sm:$0xff] }
 0x200   :  { %v2146_v48 = vadd.f32 1.0, %v4801_v52  ;;  %v3290_v37 = vmul.f32 -0.5, %v6515_v35  ;;  %v6595_v23 = vpop.eup %4804  ;;  %v3805_v56 = vadd.f32 %v3277_v11, %v2909_v16  ;;  %v6602_v45 = vmul.f32 %v5255_v42, %v6498_v41  ;;  %v6605_v10 = vpop.f32.mrb[34].mxu0 }
 0x201   :  { %v4080_v26 = vmul.f32 -1.442695, %v6586_v32  ;;  %v4807_v39 = vpop.eup %4806  ;;  %v8921_v29 = vunpack.i.l.bf16 %v6125_v19  ;;  %v3118_v54 = vmul.f32 1.442695, %v3043_v34  ;;  %v8922_v16 = vmax.f32 %v6329_v36, 0.0  ;;  %v1455_v40 = vpop.f32.mrb[35].mxu0 }
 0x202   :  { %4818 = vrcp.f32 %v2146_v48  ;;  %v8923_v3 = vunpack.i.h.bf16 %v6125_v19  ;;  %v3044_v59 = vsub.f32 0.0, %v2980_v30  ;;  %v3282_v11 = vadd.f32 1.0, %v3281_v53 }
 0x203   :  { %v3868_v21 = vmul.f32 %v8921_v29, %v3804_v14  ;;  %v2910_v13 = vsub.f32 %v8922_v16, %v6446_v22  ;;  %4820 = vpow2.f32 %v4080_v26  ;;  %v4809_v42 = vpop.eup %4808  ;;  %v3284_v14 = vand.u32 2147483647, %v6504_v15 }
 0x204   :  { %v3869_v52 = vmul.f32 %v8923_v3, %v3805_v56  ;;  %v3291_v34 = vadd.f32 1.0, %v3290_v37  ;;  %v4081_v48 = vmul.f32 -1.442695, %v6589_v61  ;;  %v8924_v36 = vunpack.i.l.bf16 %v6187_v17  ;;  %v6622_v29 = vpop.eup %4810 }
 0x205   :  { %3932 = vst.msk [vmem:[%s8870_s5 + $0x20] sm:$0xff] %vm2711_vm6, %v3868_v21  ;;  %v8925_v19 = vmax.f32 %v6351_v12, 0.0  ;;  %v3293_v53 = vand.u32 2147483647, %v6515_v35  ;;  %v2981_v37 = vand.u32 2147483647, %v6586_v32  ;;  %v8926_v56 = vunpack.i.h.bf16 %v6187_v17 }
 0x206   :  { %v2655_v22 = vmul.f32 %v4803_v18, %v8924_v36  ;;  %3933 = vst.msk [vmem:[%s8870_s5 + $0x28] sm:$0xff] %vm2711_vm6, %v3869_v52  ;;  %v6635_v21 = vpop.f32.mrb[36].mxu0  ;;  %v4813_v18 = vpop.eup %4812  ;;  %4822 = vpow2.f32 %v3118_v54  ;;  %v2147_v16 = vadd.f32 1.0, %v4809_v42  ;;  %v2982_v40 = vand.u32 2147483647, %v6589_v61 }
 0x207   :  { %v2911_v30 = vsub.f32 %v8925_v19, %v6478_v25  ;;  %v2656_v26 = vmul.f32 %v4807_v39, %v8926_v56  ;;  %v3296_v12 = vadd.f32 1.0, %v6547_v43  ;;  %v1460_v25 = vpop.f32.mrb[37].mxu0  ;;  %v4815_v3 = vpop.eup %4814  ;;  %v3120_v52 = vmul.f32 1.442695, %v3044_v59 }
 0x208   :  { %2720 = vst.msk [vmem:[%s8869_s4 + $0x40] sm:$0xff] %vm2711_vm6, %v2655_v22  ;;  %v3280_v36 = vmul.f32 0.6931472, %v4813_v18  ;;  %v3283_v39 = vmul.f32 %v6504_v15, %v3282_v11  ;;  %v3305_v54 = vadd.f32 1.0, %v6595_v23  ;;  %v4817_v42 = vpop.eup %4816  ;;  %vm3285_vm13 = vcmp.lt.f32.partialorder %v3284_v14, 0.0004427343 }
 0x209   :  { %2721 = vst.msk [vmem:[%s8869_s4 + $0x48] sm:$0xff] %vm2711_vm6, %v2656_v26  ;;  %v3289_v19 = vmul.f32 0.6931472, %v4815_v3  ;;  %v3292_v22 = vmul.f32 %v6515_v35, %v3291_v34  ;;  %4824 = vpow2.f32 %v4081_v48  ;;  %vm3294_vm14 = vcmp.lt.f32.partialorder %v3293_v53, 0.0004427343 }
 0x20a   :  { %v3286_v56 = vsel %vm3285_vm13, %v3283_v39, %v3280_v36  ;;  %v3045_v25 = vsub.f32 0.0, %v2981_v37  ;;  %4826 = vlog2.f32 %v3296_v12  ;;  %v6650_v59 = vpop.f32.mrb[38].mxu0  ;;  %v3046_v18 = vsub.f32 0.0, %v2982_v40 }
 0x20b   :  { %4828 = vrcp.f32 %v2147_v16  ;;  %v3295_v15 = vsel %vm3294_vm14, %v3292_v22, %v3289_v19  ;;  %v3806_v11 = vadd.f32 %v3286_v56, %v2910_v13  ;;  %v1465_v47 = vpop.f32.mrb[39].mxu0  ;;  %v3299_v9 = vmul.f32 -0.5, %v6547_v43 }
 0x20c   :  { %v3807_v26 = vadd.f32 %v3295_v15, %v2911_v30  ;;  %4830 = vlog2.f32 %v3305_v54  ;;  %v3308_v14 = vmul.f32 -0.5, %v6595_v23  ;;  %v4819_v3 = vpop.eup %4818  ;;  %v8927_v35 = vunpack.i.l.bf16 %v6165_v44  ;;  %v6671_v54 = vpop.f32.mrb[40].mxu0 }
 0x20d   :  { %v6658_v48 = vadd.f32 %v6543_v0, %v6169_v57  ;;  %v6662_v53 = vadd.f32 %v6578_v51, %v6176_v63  ;;  %v8928_v47 = vunpack.i.l.bf16 %v6212_v55  ;;  %v4821_v30 = vpop.eup %4820  ;;  %v2788_v37 = vmax.f32 %v6513_v1, 0.0  ;;  %v5256_v57 = vld [vmem:[%s8868_s3 + $0x60] sm:$0xff]  ;;  %v1470_v51 = vpop.f32.mrb[41].mxu0 }
 0x20e   :  { %v3870_v34 = vmul.f32 %v8927_v35, %v3806_v11  ;;  %v8929_v16 = vunpack.i.h.bf16 %v6165_v44  ;;  %v3122_v12 = vmul.f32 1.442695, %v3045_v25  ;;  %v8930_v36 = vunpack.i.h.bf16 %v6212_v55 }
 0x20f   :  { %v2657_v13 = vmul.f32 %v4817_v42, %v8928_v47  ;;  %v6677_v63 = vmul.f32 %v5256_v57, %v6513_v1  ;;  %4832 = vpow2.f32 %v3120_v52  ;;  %v2148_v44 = vadd.f32 1.0, %v4821_v30  ;;  %v5257_v42 = vld [vmem:[%s8868_s3 + $0x68] sm:$0xff]  ;;  %v5258_v30 = vld [vmem:[%s8868_s3 + $0x70] sm:$0xff] }
 0x210   :  { %v3871_v40 = vmul.f32 %v8929_v16, %v3807_v26  ;;  %v2658_v39 = vmul.f32 %v4819_v3, %v8930_v36  ;;  %3934 = vst.msk [vmem:[%s8870_s5 + $0x30] sm:$0xff] %vm2711_vm6, %v3870_v34  ;;  %v4082_v0 = vmul.f32 -1.442695, %v6658_v48  ;;  %v2789_v52 = vmax.f32 %v6586_v32, 0.0  ;;  %v6704_v25 = vpop.eup %4822  ;;  %v6710_v34 = vpop.f32.mrb[42].mxu0 }
 0x211   :  { %2722 = vst.msk [vmem:[%s8869_s4 + $0x50] sm:$0xff] %vm2711_vm6, %v2657_v13  ;;  %v6697_v19 = vmul.f32 %v5257_v42, %v6586_v32  ;;  %v3124_v22 = vmul.f32 1.442695, %v3046_v18  ;;  %v3302_v56 = vand.u32 2147483647, %v6547_v43  ;;  %4834 = vrcp.f32 %v2148_v44 }
 0x212   :  { %3935 = vst.msk [vmem:[%s8870_s5 + $0x38] sm:$0xff] %vm2711_vm6, %v3871_v40  ;;  %2723 = vst.msk [vmem:[%s8869_s4 + $0x58] sm:$0xff] %vm2711_vm6, %v2658_v39  ;;  %v3300_v15 = vadd.f32 1.0, %v3299_v9  ;;  %v3309_v11 = vadd.f32 1.0, %v3308_v14  ;;  %v3311_v26 = vand.u32 2147483647, %v6595_v23  ;;  %4836 = vpow2.f32 %v3122_v12 }
 0x213   :  { %v2983_v3 = vand.u32 2147483647, %v6658_v48  ;;  %v4083_v35 = vmul.f32 -1.442695, %v6662_v53  ;;  %v3314_v18 = vadd.f32 1.0, %v6622_v29  ;;  %v4825_v47 = vpop.eup %4824  ;;  %v2790_v13 = vmax.f32 %v6589_v61, 0.0 }
 0x214   :  { %v6717_v9 = vmul.f32 %v5258_v30, %v6589_v61  ;;  %4838 = vpow2.f32 %v4082_v0  ;;  %v2984_v14 = vand.u32 2147483647, %v6662_v53  ;;  %v1475_v16 = vpop.f32.mrb[43].mxu0  ;;  %v4827_v40 = vpop.eup %4826  ;;  %v8931_v12 = vmax.f32 %v6368_v28, 0.0 }
 0x215   :  { %4840 = vpow2.f32 %v3124_v22  ;;  %v8932_v39 = vmax.f32 %v6425_v49, 0.0  ;;  %v3323_v44 = vadd.f32 1.0, %v6704_v25  ;;  %v4829_v51 = vpop.eup %4828  ;;  %v3298_v42 = vmul.f32 0.6931472, %v4827_v40 }
 0x216   :  { %v2912_v36 = vsub.f32 %v8931_v12, %v6486_v24  ;;  %v3301_v30 = vmul.f32 %v6547_v43, %v3300_v15  ;;  %vm3303_vm15 = vcmp.lt.f32.partialorder %v3302_v56, 0.0004427343  ;;  %4842 = vlog2.f32 %v3314_v18  ;;  %v4831_v0 = vpop.eup %4830  ;;  %v6733_v24 = vpop.f32.mrb[44].mxu0 }
 0x217   :  { %v2913_v57 = vsub.f32 %v8932_v39, %v6531_v50  ;;  %v3310_v16 = vmul.f32 %v6595_v23, %v3309_v11  ;;  %vm6729_vm0 = vcmp.lt.f32.partialorder %v3311_v26, 0.0004427343  ;;  %v3047_v28 = vsub.f32 0.0, %v2983_v3  ;;  %v1480_v39 = vpop.f32.mrb[45].mxu0 }
 0x218   :  { %4844 = vpow2.f32 %v4083_v35  ;;  %v3304_v49 = vsel %vm3303_vm15, %v3301_v30, %v3298_v42  ;;  %v3307_v50 = vmul.f32 0.6931472, %v4831_v0  ;;  %v2791_v12 = vmax.f32 %v6658_v48, 0.0  ;;  %v6754_v30 = vpop.f32.mrb[46].mxu0 }
 0x219   :  { %v3048_v40 = vsub.f32 0.0, %v2984_v14  ;;  %v2149_v43 = vadd.f32 1.0, %v4825_v47  ;;  %v3808_v56 = vadd.f32 %v3304_v49, %v2912_v36  ;;  %v3317_v15 = vmul.f32 -0.5, %v6622_v29  ;;  %v6737_v23 = vpop.eup %4832 }
 0x21a   :  { %4846 = vlog2.f32 %v3323_v44  ;;  %v3313_v11 = vsel %vm6729_vm0, %v3310_v16, %v3307_v50  ;;  %v6743_v26 = vadd.f32 %v6605_v10, %v6180_v7  ;;  %v6747_v3 = vadd.f32 %v6635_v21, %v6184_v5  ;;  %v5259_v7 = vld [vmem:[%s8868_s3 + $0x78] sm:$0xff] }
 0x21b   :  { %v8935_v35 = vunpack.i.l.bf16 %v6251_v46  ;;  %v3809_v47 = vadd.f32 %v3313_v11, %v2913_v57  ;;  %v8936_v14 = vunpack.i.l.bf16 %v6187_v17  ;;  %v3126_v44 = vmul.f32 1.442695, %v3047_v28  ;;  %v4835_v0 = vpop.eup %4834 }
 0x21c   :  { %v3326_v42 = vmul.f32 -0.5, %v6704_v25  ;;  %v6760_v5 = vmul.f32 %v5259_v7, %v6658_v48  ;;  %v2792_v10 = vmax.f32 %v6662_v53, 0.0  ;;  %v3128_v21 = vmul.f32 1.442695, %v3048_v40  ;;  %v6768_v16 = vpop.eup %4836  ;;  %v1739_v48 = vld [vmem:[%s8868_s3 + $0x1a0] sm:$0xff] }
 0x21d   :  { %v2659_v18 = vmul.f32 %v4829_v51, %v8935_v35  ;;  %v3872_v36 = vmul.f32 %v8936_v14, %v3808_v56  ;;  %v4084_v57 = vmul.f32 -1.442695, %v6743_v26  ;;  %v1485_v51 = vpop.f32.mrb[47].mxu0  ;;  %4848 = vrcp.f32 %v2149_v43 }
 0x21e   :  { %v8937_v22 = vunpack.i.h.bf16 %v6187_v17  ;;  %v3318_v49 = vadd.f32 1.0, %v3317_v15  ;;  %v3320_v50 = vand.u32 2147483647, %v6622_v29  ;;  %v4839_v40 = vpop.eup %4838  ;;  %v2985_v39 = vand.u32 2147483647, %v6743_v26 }
 0x21f   :  { %2724 = vst.msk [vmem:[%s8869_s4 + $0x60] sm:$0xff] %vm2711_vm6, %v2659_v18  ;;  %3936 = vst.msk [vmem:[%s8870_s5 + $0x40] sm:$0xff] %vm2711_vm6, %v3872_v36  ;;  %4850 = vpow2.f32 %v4084_v57  ;;  %v4085_v56 = vmul.f32 -1.442695, %v6747_v3  ;;  %v8938_v11 = vunpack.i.h.bf16 %v6251_v46  ;;  %v6781_v35 = vpop.eup %4840  ;;  %v2150_v17 = vadd.f32 1.0, %v4839_v40  ;;  %v5260_v36 = vld [vmem:[%s8868_s3 + $0x80] sm:$0xff] }
 0x220   :  { %v3873_v28 = vmul.f32 %v8937_v22, %v3809_v47  ;;  %4852 = vpow2.f32 %v3126_v44  ;;  %v3327_v15 = vadd.f32 1.0, %v3326_v42  ;;  %v3329_v18 = vand.u32 2147483647, %v6704_v25  ;;  %v6788_v47 = vpop.f32.mrb[48].mxu0  ;;  %v4843_v14 = vpop.eup %4842 }
 0x221   :  { %v2660_v43 = vmul.f32 %v4835_v0, %v8938_v11  ;;  %v6794_v0 = vmul.f32 %v5260_v36, %v6662_v53  ;;  %4854 = vpow2.f32 %v3128_v21  ;;  %v8939_v7 = vmax.f32 %v6428_v2, 0.0  ;;  %v1490_v40 = vpop.f32.mrb[49].mxu0 }
 0x222   :  { %3937 = vst.msk [vmem:[%s8870_s5 + $0x48] sm:$0xff] %vm2711_vm6, %v3873_v28  ;;  %v8940_v44 = vmax.f32 %v6498_v41, 0.0  ;;  %v4845_v51 = vpop.eup %4844  ;;  %4856 = vrcp.f32 %v2150_v17  ;;  %v3316_v22 = vmul.f32 0.6931472, %v4843_v14  ;;  %v3319_v28 = vmul.f32 %v6622_v29, %v3318_v49  ;;  %v6815_v17 = vpop.f32.mrb[50].mxu0 }
 0x223   :  { %v2914_v57 = vsub.f32 %v8939_v7, %v6558_v8  ;;  %2725 = vst.msk [vmem:[%s8869_s4 + $0x68] sm:$0xff] %vm2711_vm6, %v2660_v43  ;;  %v3332_v21 = vadd.f32 1.0, %v6737_v23  ;;  %vm3321_vm1 = vcmp.lt.f32.partialorder %v3320_v50, 0.0004427343  ;;  %v3049_v2 = vsub.f32 0.0, %v2985_v39  ;;  %v1495_v39 = vpop.f32.mrb[51].mxu0 }
 0x224   :  { %v2915_v42 = vsub.f32 %v8940_v44, %v6602_v45  ;;  %4858 = vpow2.f32 %v4085_v56  ;;  %v3341_v8 = vadd.f32 1.0, %v6768_v16  ;;  %v4847_v41 = vpop.eup %4846  ;;  %v3322_v45 = vsel %vm3321_vm1, %v3319_v28, %v3316_v22 }
 0x225   :  { %v3328_v11 = vmul.f32 %v6704_v25, %v3327_v15  ;;  %vm6810_vm2 = vcmp.lt.f32.partialorder %v3329_v18, 0.0004427343  ;;  %v2986_v43 = vand.u32 2147483647, %v6747_v3  ;;  %v2151_v29 = vadd.f32 1.0, %v4845_v51 }
 0x226   :  { %v3325_v49 = vmul.f32 0.6931472, %v4847_v41  ;;  %v3810_v14 = vadd.f32 %v3322_v45, %v2914_v57  ;;  %v6820_v50 = vsub.f32 %v2788_v37, %v6677_v63  ;;  %4860 = vlog2.f32 %v3332_v21 }
 0x227   :  { %v3335_v25 = vmul.f32 -0.5, %v6737_v23  ;;  %v6825_v56 = vadd.f32 %v6650_v59, %v6195_v31  ;;  %v6829_v15 = vadd.f32 %v6671_v54, %v6199_v20  ;;  %v8943_v7 = vunpack.i.l.bf16 %v6212_v55  ;;  %v4849_v63 = vpop.eup %4848  ;;  %v6841_v20 = vpop.f32.mrb[52].mxu0 }
 0x228   :  { %v3331_v18 = vsel %vm6810_vm2, %v3328_v11, %v3325_v49  ;;  %v3130_v37 = vmul.f32 1.442695, %v3049_v2  ;;  %4862 = vlog2.f32 %v3341_v8  ;;  %v3050_v44 = vsub.f32 0.0, %v2986_v43  ;;  %v1500_v32 = vpop.f32.mrb[53].mxu0 }
 0x229   :  { %v3874_v1 = vmul.f32 %v8943_v7, %v3810_v14  ;;  %v3811_v57 = vadd.f32 %v3331_v18, %v2915_v42  ;;  %v6838_v31 = vsub.f32 %v2789_v52, %v6697_v19  ;;  %v4086_v59 = vmul.f32 -1.442695, %v6825_v56  ;;  %v4851_v54 = vpop.eup %4850  ;;  %v6871_v14 = vpop.f32.mrb[54].mxu0 }
 0x22a   :  { %4864 = vrcp.f32 %v2151_v29  ;;  %v2793_v51 = vmax.f32 %v6743_v26, 0.0  ;;  %v3338_v42 = vand.u32 2147483647, %v6737_v23  ;;  %v3344_v22 = vmul.f32 -0.5, %v6768_v16  ;;  %v6850_v52 = vpop.eup %4852 }
 0x22b   :  { %3938 = vst.msk [vmem:[%s8870_s5 + $0x50] sm:$0xff] %vm2711_vm6, %v3874_v1  ;;  %v8944_v19 = vunpack.i.h.bf16 %v6212_v55  ;;  %v2152_v21 = vadd.f32 1.0, %v4851_v54  ;;  %4866 = vpow2.f32 %v4086_v59  ;;  %v2987_v40 = vand.u32 2147483647, %v6825_v56  ;;  %v6855_v2 = vpop.eup %4854  ;;  %v5261_v55 = vld [vmem:[%s8868_s3 + $0x88] sm:$0xff] }
 0x22c   :  { %4868 = vpow2.f32 %v3130_v37  ;;  %v3336_v8 = vadd.f32 1.0, %v3335_v25  ;;  %v4087_v41 = vmul.f32 -1.442695, %v6829_v15  ;;  %v8945_v45 = vunpack.i.l.bf16 %v6290_v6  ;;  %v4857_v36 = vpop.eup %4856 }
 0x22d   :  { %v3875_v28 = vmul.f32 %v8944_v19, %v3811_v57  ;;  %4870 = vrcp.f32 %v2152_v21  ;;  %v6868_v43 = vmul.f32 %v5261_v55, %v6743_v26  ;;  %v3132_v29 = vmul.f32 1.442695, %v3050_v44  ;;  %v5262_v44 = vld [vmem:[%s8868_s3 + $0x90] sm:$0xff] }
 0x22e   :  { %v2661_v11 = vmul.f32 %v4849_v63, %v8945_v45  ;;  %v2988_v49 = vand.u32 2147483647, %v6829_v15  ;;  %v4859_v39 = vpop.eup %4858  ;;  %v3345_v25 = vadd.f32 1.0, %v3344_v22  ;;  %v3347_v18 = vand.u32 2147483647, %v6768_v16  ;;  %v1505_v63 = vpop.f32.mrb[55].mxu0 }
 0x22f   :  { %3939 = vst.msk [vmem:[%s8870_s5 + $0x58] sm:$0xff] %vm2711_vm6, %v3875_v28  ;;  %v8946_v7 = vunpack.i.h.bf16 %v6290_v6  ;;  %v3350_v37 = vadd.f32 1.0, %v6781_v35  ;;  %v2794_v57 = vmax.f32 %v6747_v3, 0.0  ;;  %v6886_v59 = vmul.f32 %v5262_v44, %v6747_v3  ;;  %v1750_v3 = vld [vmem:[%s8868_s3 + $0x1f8] sm:$0xff] }
 0x230   :  { %2726 = vst.msk [vmem:[%s8869_s4 + $0x70] sm:$0xff] %vm2711_vm6, %v2661_v11  ;;  %v3051_v54 = vsub.f32 0.0, %v2987_v40  ;;  %v3359_v22 = vadd.f32 1.0, %v6850_v52  ;;  %v3337_v32 = vmul.f32 %v6737_v23, %v3336_v8  ;;  %vm6890_vm3 = vcmp.lt.f32.partialorder %v3338_v42, 0.0004427343  ;;  %v4861_v21 = vpop.eup %4860  ;;  %v6906_v42 = vpop.f32.mrb[56].mxu0 }
 0x231   :  { %v2662_v1 = vmul.f32 %v4857_v36, %v8946_v7  ;;  %4872 = vpow2.f32 %v4087_v41  ;;  %v6900_v28 = vadd.f32 %v6710_v34, %v6203_v27  ;;  %v2153_v40 = vadd.f32 1.0, %v4859_v39  ;;  %v1510_v27 = vpop.f32.mrb[57].mxu0 }
 0x232   :  { %4874 = vpow2.f32 %v3132_v29  ;;  %v3052_v45 = vsub.f32 0.0, %v2988_v49  ;;  %v6904_v23 = vadd.f32 %v6733_v24, %v6208_v33  ;;  %v4863_v8 = vpop.eup %4862  ;;  %v3334_v41 = vmul.f32 0.6931472, %v4861_v21  ;;  %v5263_v24 = vld [vmem:[%s8868_s3 + $0x98] sm:$0xff]  ;;  %v6927_v63 = vpop.f32.mrb[58].mxu0 }
 0x233   :  { %2727 = vst.msk [vmem:[%s8869_s4 + $0x78] sm:$0xff] %vm2711_vm6, %v2662_v1  ;;  %v3346_v11 = vmul.f32 %v6768_v16, %v3345_v25  ;;  %vm6909_vm4 = vcmp.lt.f32.partialorder %v3347_v18, 0.0004427343  ;;  %4876 = vlog2.f32 %v3350_v37  ;;  %v3343_v34 = vmul.f32 0.6931472, %v4863_v8 }
 0x234   :  { %v2795_v55 = vmax.f32 %v6825_v56, 0.0  ;;  %v3134_v29 = vmul.f32 1.442695, %v3051_v54  ;;  %4878 = vlog2.f32 %v3359_v22  ;;  %v4865_v49 = vpop.eup %4864  ;;  %v3340_v33 = vsel %vm6890_vm3, %v3337_v32, %v3334_v41  ;;  %v1515_v21 = vpop.f32.mrb[59].mxu0 }
 0x235   :  { %v6920_v16 = vmul.f32 %v5263_v24, %v6825_v56  ;;  %v3353_v25 = vmul.f32 -0.5, %v6781_v35  ;;  %v4867_v18 = vpop.eup %4866  ;;  %4880 = vrcp.f32 %v2153_v40  ;;  %v3349_v7 = vsel %vm6909_vm4, %v3346_v11, %v3343_v34 }
 0x236   :  { %v3812_v1 = vadd.f32 %v3340_v33, %v6820_v50  ;;  %v3136_v37 = vmul.f32 1.442695, %v3052_v45  ;;  %v6929_v44 = vpop.eup %4868  ;;  %v3813_v54 = vadd.f32 %v3349_v7, %v6838_v31  ;;  %v3362_v22 = vmul.f32 -0.5, %v6850_v52 }
 0x237   :  { %v4088_v32 = vmul.f32 -1.442695, %v6900_v28  ;;  %v2989_v19 = vand.u32 2147483647, %v6900_v28  ;;  %v4871_v40 = vpop.eup %4870  ;;  %v8951_v8 = vunpack.i.l.bf16 %v6251_v46  ;;  %v2154_v11 = vadd.f32 1.0, %v4867_v18  ;;  %v6958_v18 = vpop.f32.mrb[60].mxu0 }
 0x238   :  { %4882 = vpow2.f32 %v3134_v29  ;;  %v3356_v50 = vand.u32 2147483647, %v6781_v35  ;;  %v8952_v45 = vunpack.i.h.bf16 %v6251_v46  ;;  %v3354_v27 = vadd.f32 1.0, %v3353_v25  ;;  %v5264_v29 = vld [vmem:[%s8868_s3 + $0xa0] sm:$0xff] }
 0x239   :  { %v3876_v41 = vmul.f32 %v8951_v8, %v3812_v1  ;;  %v3365_v31 = vand.u32 2147483647, %v6850_v52  ;;  %v8953_v34 = vunpack.i.l.bf16 %v6331_v4  ;;  %v6951_v24 = vmul.f32 %v5264_v29, %v6829_v15  ;;  %v7023_v8 = vpop.permute.xlu1 %4618 }
 0x23a   :  { %v3877_v36 = vmul.f32 %v8952_v45, %v3813_v54  ;;  %4884 = vpow2.f32 %v3136_v37  ;;  %v2918_v46 = vsub.f32 %v2790_v13, %v6717_v9  ;;  %v8954_v25 = vunpack.i.h.bf16 %v6331_v4  ;;  %v1520_v13 = vpop.f32.mrb[61].mxu0 }
 0x23b   :  { %v2663_v33 = vmul.f32 %v4865_v49, %v8953_v34  ;;  %3940 = vst.msk [vmem:[%s8870_s5 + $0x60] sm:$0xff] %vm2711_vm6, %v3876_v41  ;;  %v4873_v7 = vpop.eup %4872  ;;  %v3363_v1 = vadd.f32 1.0, %v3362_v22  ;;  %4886 = vpow2.f32 %v4088_v32  ;;  %v3053_v54 = vsub.f32 0.0, %v2989_v19 }
 0x23c   :  { %v2664_v49 = vmul.f32 %v4871_v40, %v8954_v25  ;;  %3941 = vst.msk [vmem:[%s8870_s5 + $0x68] sm:$0xff] %vm2711_vm6, %v3877_v36  ;;  %v3368_v61 = vadd.f32 1.0, %v6855_v2  ;;  %v6969_v9 = vpop.eup %4874  ;;  %4888 = vrcp.f32 %v2154_v11  ;;  %v2919_v37 = vsub.f32 %v2791_v12, %v6760_v5 }
 0x23d   :  { %2728 = vst.msk [vmem:[%s8869_s4 + $0x80] sm:$0xff] %vm2711_vm6, %v2663_v33  ;;  %v4089_v21 = vmul.f32 -1.442695, %v6904_v23  ;;  %v3377_v22 = vadd.f32 1.0, %v6929_v44  ;;  %v4877_v32 = vpop.eup %4876  ;;  %v3355_v19 = vmul.f32 %v6781_v35, %v3354_v27  ;;  %vm6981_vm5 = vcmp.lt.f32.partialorder %v3356_v50, 0.0004427343 }
 0x23e   :  { %2729 = vst.msk [vmem:[%s8869_s4 + $0x88] sm:$0xff] %vm2711_vm6, %v2664_v49  ;;  %vm6985_vm7 = vcmp.lt.f32.partialorder %v3365_v31, 0.0004427343  ;;  %4890 = vlog2.f32 %v3368_v61  ;;  %v4879_v12 = vpop.eup %4878  ;;  %v2155_v5 = vadd.f32 1.0, %v4873_v7  ;;  %v3352_v41 = vmul.f32 0.6931472, %v4877_v32 }
 0x23f   :  { %v2990_v11 = vand.u32 2147483647, %v6904_v23  ;;  %4892 = vlog2.f32 %v3377_v22  ;;  %v6993_v35 = vpop.f32.mrb[62].mxu0  ;;  %v3361_v50 = vmul.f32 0.6931472, %v4879_v12  ;;  %v3364_v45 = vmul.f32 %v6850_v52, %v3363_v1  ;;  %v4881_v34 = vpop.eup %4880  ;;  %v1740_v52 = vld [vmem:[%s8868_s3 + $0x1a8] sm:$0xff] }
 0x240   :  { %v6997_v27 = vmul.f32 1.442695, %v3053_v54  ;;  %v1525_v31 = vpop.f32.mrb[63].mxu0  ;;  %v3358_v33 = vsel %vm6981_vm5, %v3355_v19, %v3352_v41  ;;  %4894 = vpow2.f32 %v4089_v21  ;;  %v3371_v29 = vmul.f32 -0.5, %v6855_v2  ;;  %v7012_v54 = vpop.f32.mrb[64].mxu1 }
 0x241   :  { %v7004_v25 = vadd.f32 %v6754_v30, %v6216_v60  ;;  %v3367_v49 = vsel %vm6985_vm7, %v3364_v45, %v3361_v50  ;;  %v3814_v7 = vadd.f32 %v3358_v33, %v2918_v46  ;;  %v3380_v1 = vmul.f32 -0.5, %v6929_v44  ;;  %v1145_v30 = vpop.f32.mrb[65].mxu1  ;;  %v7017_v22 = vpop.f32.mrb[64].mxu0 }
 0x242   :  { %vm1803_vm8 = vcmp.ge.f32.partialorder %v1739_v48, 0.0  ;;  %v7014_v61 = vpop.eup %4882  ;;  %4896 = vrcp.f32 %v2155_v5  ;;  %v3815_v13 = vadd.f32 %v3367_v49, %v2919_v37  ;;  %v3054_v21 = vsub.f32 0.0, %v2990_v11  ;;  %v1530_v12 = vpop.f32.mrb[65].mxu0 }
 0x243   :  { %v3374_v60 = vand.u32 2147483647, %v6855_v2  ;;  %v8959_v32 = vunpack.i.l.bf16 %v6290_v6  ;;  %v3383_v46 = vand.u32 2147483647, %v6929_v44  ;;  %v4090_v40 = vmul.f32 -1.442695, %v7004_v25 }
 0x244   :  { %vm1804_vm9 = vcmp.ge.f32.partialorder %v1740_v52, 0.0  ;;  %v7025_v41 = vpop.eup %4884  ;;  %v8960_v37 = vunpack.i.h.bf16 %v6290_v6  ;;  %v3372_v11 = vadd.f32 1.0, %v3371_v29  ;;  %v8961_v50 = vmov 0.0   ;;  %v7041_v29 = vpop.f32.mrb[66].mxu1 }
 0x245   :  { %v3878_v19 = vmul.f32 %v8959_v32, %v3814_v7  ;;  %v4055_v45 = vsel %vm1803_vm8, 1.0, %v8961_v50  ;;  %v4056_v31 = vsel %vm1804_vm9, 1.0, %v8961_v50  ;;  %v4887_v33 = vpop.eup %4886  ;;  %v3381_v52 = vadd.f32 1.0, %v3380_v1  ;;  %v7052_v32 = vpop.f32.mrb[66].mxu0 }
 0x246   :  { %v3879_v5 = vmul.f32 %v8960_v37, %v3815_v13  ;;  %v4702_v49 = vpack.i.bf16 %v4056_v31, %v4055_v45  ;;  %v7038_v7 = vadd.f32 %v6788_v47, %v6220_v58  ;;  %v4621_v6 = vunpack.i.h.bf16 %v7023_v8  ;;  %v4889_v48 = vpop.eup %4888  ;;  %v1150_v47 = vpop.f32.mrb[67].mxu1 }
 0x247   :  { %3942 = vst.msk [vmem:[%s8870_s5 + $0x70] sm:$0xff] %vm2711_vm6, %v3878_v19  ;;  %v3140_v13 = vmul.f32 1.442695, %v3054_v21  ;;  %v2920_v1 = vsub.f32 %v2792_v10, %v6794_v0  ;;  %v2991_v30 = vand.u32 2147483647, %v7004_v25  ;;  %v4620_v58 = vunpack.i.l.bf16 %v7023_v8  ;;  %v7259_v8 = vpop.permute.xlu1 %4628 }
 0x248   :  { %3943 = vst.msk [vmem:[%s8870_s5 + $0x78] sm:$0xff] %vm2711_vm6, %v3879_v5  ;;  %v4891_v19 = vpop.eup %4890  ;;  %v2921_v12 = vsub.f32 %v2793_v51, %v6868_v43  ;;  %vm7057_vm10 = vcmp.lt.f32.partialorder %v3374_v60, 0.0004427343  ;;  %vm7061_vm11 = vcmp.lt.f32.partialorder %v3383_v46, 0.0004427343  ;;  %4898 = vpow2.f32 %v4090_v40  ;;  %4703 = vperm.xlu0 %4570, %v4702_v49   ;;  %v1535_v53 = vpop.f32.mrb[67].mxu0 }
 0x249   :  { %v4893_v10 = vpop.eup %4892  ;;  %v2156_v0 = vadd.f32 1.0, %v4887_v33  ;;  %v3370_v5 = vmul.f32 0.6931472, %v4891_v19  ;;  %v3373_v45 = vmul.f32 %v6855_v2, %v3372_v11  ;;  %v2665_v26 = vmul.f32 %v4881_v34, %v4620_v58  ;;  %v7072_v31 = vpop.f32.mrb[68].mxu1 }
 0x24a   :  { %v3379_v51 = vmul.f32 0.6931472, %v4893_v10  ;;  %v3382_v43 = vmul.f32 %v6929_v44, %v3381_v52  ;;  %v2666_v60 = vmul.f32 %v4889_v48, %v4621_v6  ;;  %v3386_v46 = vadd.f32 1.0, %v6969_v9  ;;  %v4895_v40 = vpop.eup %4894  ;;  %v1155_v44 = vpop.f32.mrb[69].mxu1  ;;  %v5265_v52 = vld [vmem:[%s8868_s3 + $0xa8] sm:$0xff] }
 0x24b   :  { %4900 = vpow2.f32 %v6997_v27  ;;  %v3376_v33 = vsel %vm7057_vm10, %v3373_v45, %v3370_v5  ;;  %v3055_v2 = vsub.f32 0.0, %v2991_v30  ;;  %v4091_v11 = vmul.f32 -1.442695, %v7038_v7  ;;  %2730 = vst.msk [vmem:[%s8869_s4 + $0x90] sm:$0xff] %vm2711_vm6, %v2665_v26  ;;  %v7082_v34 = vpop.f32.mrb[68].mxu0  ;;  %v1745_v30 = vld [vmem:[%s8868_s3 + $0x1d0] sm:$0xff] }
 0x24c   :  { %v7088_v27 = vmul.f32 %v5265_v52, %v6900_v28  ;;  %v3385_v49 = vsel %vm7061_vm11, %v3382_v43, %v3379_v51  ;;  %v3816_v48 = vadd.f32 %v3376_v33, %v2920_v1  ;;  %2731 = vst.msk [vmem:[%s8869_s4 + $0x98] sm:$0xff] %vm2711_vm6, %v2666_v60  ;;  %4902 = vlog2.f32 %v3386_v46  ;;  %v1540_v47 = vpop.f32.mrb[69].mxu0  ;;  %v7099_v19 = vpop.eup %4896  ;;  %v1746_v26 = vld [vmem:[%s8868_s3 + $0x1d8] sm:$0xff]  ;;  %v1743_v51 = vld [vmem:[%s8868_s3 + $0x1c0] sm:$0xff] }
 0x24d   :  { %4904 = vpow2.f32 %v3140_v13  ;;  %v3817_v53 = vadd.f32 %v3385_v49, %v2921_v12  ;;  %v3395_v21 = vadd.f32 1.0, %v7014_v61  ;;  %v7103_v1 = vadd.f32 1.0, %v4895_v40  ;;  %v1744_v13 = vld [vmem:[%s8868_s3 + $0x1c8] sm:$0xff]  ;;  %v7117_v12 = vpop.f32.mrb[70].mxu1  ;;  %v7123_v40 = vpop.f32.mrb[70].mxu0 }
 0x24e   :  { %4906 = vrcp.f32 %v2156_v0  ;;  %v8966_v10 = vunpack.i.l.bf16 %v6331_v4  ;;  %v3389_v45 = vmul.f32 -0.5, %v6969_v9  ;;  %v8967_v0 = vunpack.i.h.bf16 %v6331_v4  ;;  %v1160_v46 = vpop.f32.mrb[71].mxu1 }
 0x24f   :  { %v7121_v60 = vmul.f32 1.442695, %v3055_v2  ;;  %4908 = vpow2.f32 %v4091_v11  ;;  %vm1809_vm12 = vcmp.ge.f32.partialorder %v1745_v30, 0.0  ;;  %v2992_v33 = vand.u32 2147483647, %v7038_v7  ;;  %v1749_v2 = vld [vmem:[%s8868_s3 + $0x1f0] sm:$0xff] }
 0x250   :  { %v3880_v5 = vmul.f32 %v8966_v10, %v3816_v48  ;;  %v3881_v43 = vmul.f32 %v8967_v0, %v3817_v53  ;;  %v7133_v44 = vsub.f32 %v2794_v57, %v6886_v59  ;;  %v3392_v4 = vand.u32 2147483647, %v6969_v9  ;;  %v1545_v11 = vpop.f32.mrb[71].mxu0  ;;  %v1747_v57 = vld [vmem:[%s8868_s3 + $0x1e0] sm:$0xff]  ;;  %v7153_v53 = vpop.f32.mrb[72].mxu1 }
 0x251   :  { %4910 = vlog2.f32 %v3395_v21  ;;  %vm1810_vm13 = vcmp.ge.f32.partialorder %v1746_v26, 0.0  ;;  %v4061_v52 = vsel %vm1809_vm12, 1.0, %v8961_v50  ;;  %vm1807_vm14 = vcmp.ge.f32.partialorder %v1743_v51, 0.0  ;;  %v1165_v26 = vpop.f32.mrb[73].mxu1  ;;  %v7163_v51 = vpop.f32.mrb[72].mxu0 }
 0x252   :  { %3944 = vst.msk [vmem:[%s8870_s5 + $0x80] sm:$0xff] %vm2711_vm6, %v3880_v5  ;;  %3945 = vst.msk [vmem:[%s8870_s5 + $0x88] sm:$0xff] %vm2711_vm6, %v3881_v43  ;;  %vm1808_vm15 = vcmp.ge.f32.partialorder %v1744_v13, 0.0  ;;  %v4899_v59 = vpop.eup %4898  ;;  %v3390_v49 = vadd.f32 1.0, %v3389_v45  ;;  %v3398_v48 = vmul.f32 -0.5, %v7014_v61  ;;  %v4062_v30 = vsel %vm1810_vm13, 1.0, %v8961_v50 }
 0x253   :  { %v4059_v47 = vsel %vm1807_vm14, 1.0, %v8961_v50  ;;  %v4717_v21 = vpack.i.bf16 %v4062_v30, %v4061_v52  ;;  %v4060_v10 = vsel %vm1808_vm15, 1.0, %v8961_v50  ;;  %v7158_v5 = vadd.f32 %v6815_v17, %v6224_v62  ;;  %v1748_v45 = vld [vmem:[%s8868_s3 + $0x1e8] sm:$0xff]  ;;  %v1550_v43 = vpop.f32.mrb[73].mxu0 }
 0x254   :  { %vm1813_vm0 = vcmp.ge.f32.partialorder %v1749_v2, 0.0  ;;  %v4712_v13 = vpack.i.bf16 %v4060_v10, %v4059_v47  ;;  %vm1814_vm1 = vcmp.ge.f32.partialorder %v1750_v3, 0.0  ;;  %vm1811_vm2 = vcmp.ge.f32.partialorder %v1747_v57, 0.0  ;;  %v7176_v47 = vpop.permute.xlu0 %4623  ;;  %v7182_v43 = vpop.f32.mrb[74].mxu0 }
 0x255   :  { %v4065_v0 = vsel %vm1813_vm0, 1.0, %v8961_v50  ;;  %v7166_v46 = vpop.eup %4900  ;;  %v2158_v11 = vadd.f32 1.0, %v4899_v59  ;;  %v3056_v52 = vsub.f32 0.0, %v2992_v33  ;;  %vm7168_vm3 = vcmp.lt.f32.partialorder %v3392_v4, 0.0004427343  ;;  %4718 = vperm.xlu1 %4581, %v4717_v21   ;;  %v7178_v59 = vpop.f32.mrb[74].mxu1 }
 0x256   :  { %v4092_v17 = vmul.f32 -1.442695, %v7158_v5  ;;  %v4903_v2 = vpop.eup %4902  ;;  %v3391_v30 = vmul.f32 %v6969_v9, %v3390_v49  ;;  %4713 = vperm.xlu0 %4570, %v4712_v13   ;;  %v4066_v3 = vsel %vm1814_vm1, 1.0, %v8961_v50  ;;  %vm1812_vm4 = vcmp.ge.f32.partialorder %v1748_v45, 0.0  ;;  %v1170_v26 = vpop.f32.mrb[75].mxu1 }
 0x257   :  { %v4063_v57 = vsel %vm1811_vm2, 1.0, %v8961_v50  ;;  %v7180_v33 = vpop.eup %4904  ;;  %v3388_v4 = vmul.f32 0.6931472, %v4903_v2  ;;  %v3399_v10 = vadd.f32 1.0, %v3398_v48  ;;  %v4727_v21 = vpack.i.bf16 %v4066_v3, %v4065_v0  ;;  %v1555_v36 = vpop.f32.mrb[75].mxu0 }
 0x258   :  { %4912 = vpow2.f32 %v4092_v17  ;;  %v4907_v9 = vpop.eup %4906  ;;  %v3401_v49 = vand.u32 2147483647, %v7014_v61  ;;  %v4064_v45 = vsel %vm1812_vm4, 1.0, %v8961_v50  ;;  %v7188_v13 = vadd.f32 %v6841_v20, %v6246_v38  ;;  %v7200_v50 = vpop.f32.mrb[76].mxu1 }
 0x259   :  { %v8875_v37 = vunpack.i.h.bf16 %v7176_v47  ;;  %v4909_v39 = vpop.eup %4908  ;;  %4914 = vrcp.f32 %v2158_v11  ;;  %v3394_v48 = vsel %vm7168_vm3, %v3391_v30, %v3388_v4  ;;  %4728 = vperm.xlu1 %4581, %v4727_v21   ;;  %v4722_v0 = vpack.i.bf16 %v4064_v45, %v4063_v57  ;;  %v1175_v30 = vpop.f32.mrb[77].mxu1 }
 0x25a   :  { %v8876_v17 = vunpack.i.l.bf16 %v7176_v47  ;;  %4916 = vrcp.f32 %v7103_v1  ;;  %v2923_v38 = vsub.f32 %v2795_v55, %v6920_v16  ;;  %v3818_v20 = vadd.f32 %v3394_v48, %v7133_v44  ;;  %v7207_v3 = vpop.f32.mrb[76].mxu0  ;;  %v7235_v21 = vpop.f32.mrb[78].mxu1 }
 0x25b   :  { %v4911_v2 = vpop.eup %4910  ;;  %v4093_v36 = vmul.f32 -1.442695, %v7188_v13  ;;  %4918 = vpow2.f32 %v7121_v60  ;;  %v3400_v62 = vmul.f32 %v7014_v61, %v3399_v10  ;;  %4723 = vperm.xlu0 %4570, %v4722_v0   ;;  %vm3402_vm5 = vcmp.lt.f32.partialorder %v3401_v49, 0.0004427343  ;;  %v1560_v60 = vpop.f32.mrb[77].mxu0 }
 0x25c   :  { %v3397_v11 = vmul.f32 0.6931472, %v4911_v2  ;;  %v2667_v1 = vmul.f32 %v7099_v19, %v8876_v17  ;;  %v3882_v56 = vmul.f32 %v4620_v58, %v3818_v20  ;;  %v2993_v55 = vand.u32 2147483647, %v7158_v5  ;;  %v5266_v58 = vld [vmem:[%s8868_s3 + $0xb0] sm:$0xff]  ;;  %v1180_v48 = vpop.f32.mrb[79].mxu1 }
 0x25d   :  { %v2668_v16 = vmul.f32 %v4907_v9, %v8875_v37  ;;  %v3144_v44 = vmul.f32 1.442695, %v3056_v52  ;;  %v2994_v57 = vand.u32 2147483647, %v7188_v13  ;;  %v3404_v19 = vadd.f32 1.0, %v7025_v41  ;;  %v5267_v9 = vld [vmem:[%s8868_s3 + $0xb8] sm:$0xff] }
 0x25e   :  { %v3403_v61 = vsel %vm3402_vm5, %v3400_v62, %v3397_v11  ;;  %2732 = vst.msk [vmem:[%s8869_s4 + $0xa0] sm:$0xff] %vm2711_vm6, %v2667_v1  ;;  %v7224_v4 = vmul.f32 %v5266_v58, %v6904_v23  ;;  %3946 = vst.msk [vmem:[%s8870_s5 + $0x90] sm:$0xff] %vm2711_vm6, %v3882_v56  ;;  %4920 = vpow2.f32 %v4093_v36  ;;  %v3413_v52 = vadd.f32 1.0, %v7166_v46  ;;  %v7247_v20 = vpop.f32.mrb[78].mxu0  ;;  %v5268_v11 = vld [vmem:[%s8868_s3 + $0xc0] sm:$0xff] }
 0x25f   :  { %v3819_v10 = vadd.f32 %v3403_v61, %v2923_v38  ;;  %2733 = vst.msk [vmem:[%s8869_s4 + $0xa8] sm:$0xff] %vm2711_vm6, %v2668_v16  ;;  %v7242_v49 = vmul.f32 %v5267_v9, %v7004_v25  ;;  %v2159_v45 = vadd.f32 1.0, %v4909_v39  ;;  %4922 = vlog2.f32 %v3404_v19  ;;  %v8970_v1 = vld [vmem:[#allocation8_spill] sm:$0xff]  ;;  %v8971_v16 = vld [vmem:[#allocation9_spill] sm:$0xff]  ;;  %v7271_v61 = vpop.f32.mrb[80].mxu1 }
 0x260   :  { %v3057_v38 = vsub.f32 0.0, %v2993_v55  ;;  %4924 = vlog2.f32 %v3413_v52  ;;  %v7253_v62 = vmul.f32 %v5268_v11, %v7038_v7  ;;  %v3058_v39 = vsub.f32 0.0, %v2994_v57 }
 0x261   :  { %v3883_v2 = vmul.f32 %v4621_v6, %v3819_v10  ;;  %4926 = vpow2.f32 %v3144_v44  ;;  %v7257_v30 = vadd.f32 %v6871_v14, %v8970_v1  ;;  %v1565_v6 = vpop.f32.mrb[79].mxu0  ;;  %v3407_v55 = vmul.f32 -0.5, %v7025_v41  ;;  %v1185_v10 = vpop.f32.mrb[81].mxu1 }
 0x262   :  { %v4913_v36 = vpop.eup %4912  ;;  %v7268_v60 = vadd.f32 %v6906_v42, %v8971_v16  ;;  %v8873_v44 = vunpack.i.h.bf16 %v7259_v8  ;;  %4928 = vrcp.f32 %v2159_v45  ;;  %v3416_v19 = vmul.f32 -0.5, %v7166_v46  ;;  %v7276_v52 = vpop.f32.mrb[80].mxu0  ;;  %v5269_v42 = vld [vmem:[%s8868_s3 + $0xc8] sm:$0xff] }
 0x263   :  { %3947 = vst.msk [vmem:[%s8870_s5 + $0x98] sm:$0xff] %vm2711_vm6, %v3883_v2  ;;  %v2160_v56 = vadd.f32 1.0, %v4913_v36  ;;  %v4915_v14 = vpop.eup %4914  ;;  %v4094_v58 = vmul.f32 -1.442695, %v7257_v30  ;;  %v7282_v48 = vmul.f32 %v5269_v42, %v7158_v5  ;;  %v3146_v2 = vmul.f32 1.442695, %v3057_v38 }
 0x264   :  { %v4917_v9 = vpop.eup %4916  ;;  %v4095_v45 = vmul.f32 -1.442695, %v7268_v60  ;;  %v1570_v36 = vpop.f32.mrb[81].mxu0  ;;  %v3148_v1 = vmul.f32 1.442695, %v3058_v39  ;;  %v8874_v16 = vunpack.i.l.bf16 %v7259_v8  ;;  %v2670_v42 = vmul.f32 %v4915_v14, %v8873_v44 }
 0x265   :  { %4930 = vrcp.f32 %v2160_v56  ;;  %v7285_v11 = vpop.eup %4918  ;;  %v3410_v6 = vand.u32 2147483647, %v7025_v41  ;;  %v3408_v56 = vadd.f32 1.0, %v3407_v55  ;;  %v2995_v10 = vand.u32 2147483647, %v7257_v30  ;;  %v7292_v57 = vpop.f32.mrb[82].mxu1 }
 0x266   :  { %4932 = vpow2.f32 %v4094_v58  ;;  %8972 = vst [vmem:[#allocation8_spill] sm:$0xff] %v7292_v57  ;;  %v3417_v36 = vadd.f32 1.0, %v3416_v19  ;;  %v3419_v0 = vand.u32 2147483647, %v7166_v46  ;;  %v2669_v39 = vmul.f32 %v4917_v9, %v8874_v16  ;;  %v1190_v58 = vpop.f32.mrb[83].mxu1  ;;  %v7298_v26 = vpop.f32.mrb[82].mxu0 }
 0x267   :  { %4934 = vpow2.f32 %v4095_v45  ;;  %8973 = vst [vmem:[#allocation9_spill] sm:$0xff] %v7298_v26  ;;  %v5270_v45 = vld [vmem:[%s8868_s3 + $0xd0] sm:$0xff]  ;;  %v8974_v19 = vmax.f32 %v6829_v15, 0.0  ;;  %2735 = vst.msk [vmem:[%s8869_s4 + $0xb8] sm:$0xff] %vm2711_vm6, %v2670_v42  ;;  %v3422_v9 = vadd.f32 1.0, %v7180_v33  ;;  %v3431_v15 = vadd.f32 1.0, %v7285_v11 }
 0x268   :  { %v4921_v55 = vpop.eup %4920  ;;  %4936 = vpow2.f32 %v3146_v2  ;;  %v7304_v14 = vmul.f32 %v5270_v45, %v7188_v13  ;;  %v8975_v2 = vmax.f32 %v6900_v28, 0.0  ;;  %vm7317_vm7 = vcmp.lt.f32.partialorder %v3410_v6, 0.0004427343  ;;  %2734 = vst.msk [vmem:[%s8869_s4 + $0xb0] sm:$0xff] %vm2711_vm6, %v2669_v39  ;;  %v7328_v6 = vpop.f32.mrb[84].mxu1 }
 0x269   :  { %v2924_v38 = vsub.f32 %v8974_v19, %v6951_v24  ;;  %v4923_v58 = vpop.eup %4922  ;;  %v2996_v45 = vand.u32 2147483647, %v7268_v60  ;;  %v1575_v24 = vpop.f32.mrb[83].mxu0  ;;  %4938 = vpow2.f32 %v3148_v1  ;;  %v3409_v28 = vmul.f32 %v7025_v41, %v3408_v56  ;;  %8978 = vst [vmem:[#allocation13_spill] sm:$0xff] %v7328_v6  ;;  %v8979_v1 = vld [vmem:[#allocation10_spill] sm:$0xff] }
 0x26a   :  { %v2925_v44 = vsub.f32 %v8975_v2, %v7088_v27  ;;  %v4925_v42 = vpop.eup %4924  ;;  %v3406_v19 = vmul.f32 0.6931472, %v4923_v58  ;;  %v3059_v27 = vsub.f32 0.0, %v2995_v10  ;;  %v3418_v17 = vmul.f32 %v7166_v46, %v3417_v36  ;;  %v1195_v39 = vpop.f32.mrb[85].mxu1 }
 0x26b   :  { %v7330_v2 = vpop.eup %4926  ;;  %v3415_v37 = vmul.f32 0.6931472, %v4925_v42  ;;  %vm3420_vm8 = vcmp.lt.f32.partialorder %v3419_v0, 0.0004427343  ;;  %v2161_v57 = vadd.f32 1.0, %v4921_v55  ;;  %4940 = vlog2.f32 %v3422_v9  ;;  %v7340_v56 = vpop.f32.mrb[84].mxu0 }
 0x26c   :  { %v3412_v24 = vsel %vm7317_vm7, %v3409_v28, %v3406_v19  ;;  %v7338_v41 = vadd.f32 %v6927_v63, %v8979_v1  ;;  %v4929_v10 = vpop.eup %4928  ;;  %v3060_v6 = vsub.f32 0.0, %v2996_v45  ;;  %4942 = vlog2.f32 %v3431_v15  ;;  %v1580_v46 = vpop.f32.mrb[85].mxu0 }
 0x26d   :  { %v3421_v58 = vsel %vm3420_vm8, %v3418_v17, %v3415_v37  ;;  %v3820_v42 = vadd.f32 %v3412_v24, %v2924_v38  ;;  %v3150_v39 = vmul.f32 1.442695, %v3059_v27  ;;  %v3425_v55 = vmul.f32 -0.5, %v7180_v33  ;;  %v7344_v9 = vpop.permute.xlu0 %4633  ;;  %v7346_v19 = vpop.f32.mrb[86].mxu1  ;;  %v8981_v38 = vld [vmem:[#allocation11_spill] sm:$0xff] }
 0x26e   :  { %v3821_v36 = vadd.f32 %v3421_v58, %v2925_v44  ;;  %v4096_v16 = vmul.f32 -1.442695, %v7338_v41  ;;  %v8980_v28 = vunpack.i.l.bf16 %v7176_v47  ;;  %v3434_v37 = vmul.f32 -0.5, %v7285_v11  ;;  %v1200_v45 = vpop.f32.mrb[87].mxu1  ;;  %v7356_v15 = vpop.f32.mrb[86].mxu0 }
 0x26f   :  { %v4931_v0 = vpop.eup %4930  ;;  %v2997_v17 = vand.u32 2147483647, %v7338_v41  ;;  %v7354_v44 = vadd.f32 %v6958_v18, %v8981_v38  ;;  %8982 = vst [vmem:[#allocation10_spill] sm:$0xff] %v7356_v15  ;;  %v8983_v24 = vunpack.i.h.bf16 %v7176_v47  ;;  %v8877_v26 = vunpack.i.h.bf16 %v7344_v9  ;;  %v5271_v18 = vld [vmem:[%s8868_s3 + $0xd8] sm:$0xff]  ;;  %v7379_v38 = vpop.f32.mrb[88].mxu1 }
 0x270   :  { %v4933_v63 = vpop.eup %4932  ;;  %v3884_v1 = vmul.f32 %v8980_v28, %v3820_v42  ;;  %4944 = vpow2.f32 %v4096_v16  ;;  %v1585_v42 = vpop.f32.mrb[87].mxu0  ;;  %v7369_v28 = vmul.f32 %v5271_v18, %v7257_v30  ;;  %v3426_v45 = vadd.f32 1.0, %v3425_v55 }
 0x271   :  { %v4935_v27 = vpop.eup %4934  ;;  %v3885_v58 = vmul.f32 %v8983_v24, %v3821_v36  ;;  %v2162_v46 = vadd.f32 1.0, %v4933_v63  ;;  %4946 = vrcp.f32 %v2161_v57  ;;  %v3152_v36 = vmul.f32 1.442695, %v3060_v6  ;;  %v1205_v42 = vpop.f32.mrb[89].mxu1 }
 0x272   :  { %3948 = vst.msk [vmem:[%s8870_s5 + $0xa0] sm:$0xff] %vm2711_vm6, %v3884_v1  ;;  %v7372_v16 = vpop.eup %4936  ;;  %v2163_v57 = vadd.f32 1.0, %v4935_v27  ;;  %v3061_v63 = vsub.f32 0.0, %v2997_v17  ;;  %v8878_v1 = vunpack.i.l.bf16 %v7344_v9  ;;  %v3428_v24 = vand.u32 2147483647, %v7180_v33  ;;  %v7384_v18 = vpop.f32.mrb[88].mxu0 }
 0x273   :  { %3949 = vst.msk [vmem:[%s8870_s5 + $0xa8] sm:$0xff] %vm2711_vm6, %v3885_v58  ;;  %4948 = vrcp.f32 %v2162_v46  ;;  %v2672_v6 = vmul.f32 %v4931_v0, %v8877_v26  ;;  %v7386_v47 = vpop.eup %4938  ;;  %v3435_v58 = vadd.f32 1.0, %v3434_v37  ;;  %v3437_v27 = vand.u32 2147483647, %v7285_v11 }
 0x274   :  { %4950 = vpow2.f32 %v3150_v39  ;;  %v4097_v17 = vmul.f32 -1.442695, %v7354_v44  ;;  %v2671_v46 = vmul.f32 %v4929_v10, %v8878_v1  ;;  %v1590_v39 = vpop.f32.mrb[89].mxu0  ;;  %v8984_v55 = vmax.f32 %v6904_v23, 0.0 }
 0x275   :  { %4952 = vpow2.f32 %v3152_v36  ;;  %v2998_v0 = vand.u32 2147483647, %v7354_v44  ;;  %2737 = vst.msk [vmem:[%s8869_s4 + $0xc8] sm:$0xff] %vm2711_vm6, %v2672_v6  ;;  %v3440_v37 = vadd.f32 1.0, %v7330_v2  ;;  %v4941_v42 = vpop.eup %4940  ;;  %v8985_v10 = vmax.f32 %v7004_v25, 0.0 }
 0x276   :  { %v2926_v15 = vsub.f32 %v8984_v55, %v7224_v4  ;;  %4954 = vrcp.f32 %v2163_v57  ;;  %v3154_v36 = vmul.f32 1.442695, %v3061_v63  ;;  %2736 = vst.msk [vmem:[%s8869_s4 + $0xc0] sm:$0xff] %vm2711_vm6, %v2671_v46  ;;  %v3449_v23 = vadd.f32 1.0, %v7372_v16  ;;  %v4943_v4 = vpop.eup %4942  ;;  %v7414_v57 = vpop.f32.mrb[90].mxu1 }
 0x277   :  { %v2927_v39 = vsub.f32 %v8985_v10, %v7242_v49  ;;  %v3424_v55 = vmul.f32 0.6931472, %v4941_v42  ;;  %v3427_v6 = vmul.f32 %v7180_v33, %v3426_v45  ;;  %vm7410_vm9 = vcmp.lt.f32.partialorder %v3428_v24, 0.0004427343  ;;  %8988 = vst [vmem:[#allocation11_spill] sm:$0xff] %v7414_v57  ;;  %v1210_v46 = vpop.f32.mrb[91].mxu1 }
 0x278   :  { %4956 = vlog2.f32 %v3440_v37  ;;  %v3433_v25 = vmul.f32 0.6931472, %v4943_v4  ;;  %v3436_v49 = vmul.f32 %v7285_v11, %v3435_v58  ;;  %vm7417_vm10 = vcmp.lt.f32.partialorder %v3437_v27, 0.0004427343  ;;  %v8991_v45 = vld [vmem:[#allocation12_spill] sm:$0xff]  ;;  %v7427_v37 = vpop.permute.xlu1 %4638  ;;  %v7429_v10 = vpop.f32.mrb[90].mxu0 }
 0x279   :  { %4958 = vpow2.f32 %v4097_v17  ;;  %v3430_v42 = vsel %vm7410_vm9, %v3427_v6, %v3424_v55  ;;  %v3062_v33 = vsub.f32 0.0, %v2998_v0  ;;  %v7425_v24 = vadd.f32 %v6993_v35, %v8991_v45  ;;  %8992 = vst [vmem:[#allocation12_spill] sm:$0xff] %v7429_v10  ;;  %v1595_v26 = vpop.f32.mrb[91].mxu0  ;;  %v7434_v4 = vpop.f32.mrb[92].mxu1 }
 0x27a   :  { %4960 = vlog2.f32 %v3449_v23  ;;  %v4945_v11 = vpop.eup %4944  ;;  %v3439_v58 = vsel %vm7417_vm10, %v3436_v49, %v3433_v25  ;;  %v3822_v27 = vadd.f32 %v3430_v42, %v2926_v15  ;;  %v3443_v17 = vmul.f32 -0.5, %v7330_v2  ;;  %8993 = vst [vmem:[#allocation14_spill] sm:$0xff] %v7434_v4  ;;  %v1215_v46 = vpop.f32.mrb[93].mxu1  ;;  %v7443_v49 = vld [vmem:[#allocation4] ss:$0 sm:$0xff] }
 0x27b   :  { %4962 = vpow2.f32 %v3154_v36  ;;  %v4947_v0 = vpop.eup %4946  ;;  %v3823_v23 = vadd.f32 %v3439_v58, %v2927_v39  ;;  %v2164_v55 = vadd.f32 1.0, %v4945_v11  ;;  %v3452_v35 = vmul.f32 -0.5, %v7372_v16  ;;  %v7438_v45 = vpop.f32.mrb[92].mxu0 }
 0x27c   :  { %v4098_v6 = vmul.f32 -1.442695, %v7425_v24  ;;  %8994 = vst [vmem:[#allocation15_spill] sm:$0xff] %v7438_v45  ;;  %v8995_v25 = vunpack.i.l.bf16 %v7259_v8  ;;  %v3446_v36 = vand.u32 2147483647, %v7330_v2  ;;  %v4371_v63 = vadd.f32 %v7443_v49, %v7012_v54  ;;  %v1600_v42 = vpop.f32.mrb[93].mxu0 }
 0x27d   :  { %v4949_v1 = vpop.eup %4948  ;;  %v8879_v39 = vunpack.i.h.bf16 %v7427_v37  ;;  %v8996_v58 = vunpack.i.h.bf16 %v7259_v8  ;;  %4964 = vrcp.f32 %v2164_v55  ;;  %v2999_v46 = vand.u32 2147483647, %v7425_v24  ;;  %v7460_v45 = vpop.f32.mrb[94].mxu1 }
 0x27e   :  { %v3886_v15 = vmul.f32 %v8995_v25, %v3822_v27  ;;  %v7448_v11 = vpop.eup %4950  ;;  %v8880_v27 = vunpack.i.l.bf16 %v7427_v37  ;;  %v3156_v25 = vmul.f32 1.442695, %v3062_v33  ;;  %v3444_v54 = vadd.f32 1.0, %v3443_v17  ;;  %8997 = vst [vmem:[#allocation16_spill] sm:$0xff] %v7460_v45 }
 0x27f   :  { %v3887_v26 = vmul.f32 %v8996_v58, %v3823_v23  ;;  %4966 = vpow2.f32 %v4098_v6  ;;  %v2674_v42 = vmul.f32 %v4949_v1, %v8879_v39  ;;  %v7462_v8 = vpop.eup %4952  ;;  %v3453_v23 = vadd.f32 1.0, %v3452_v35  ;;  %v1220_v6 = vpop.f32.mrb[95].mxu1  ;;  %v5273_v58 = vld [vmem:[%s8868_s3 + $0xe0] sm:$0xff] }
 0x280   :  { %3950 = vst.msk [vmem:[%s8870_s5 + $0xb0] sm:$0xff] %vm2711_vm6, %v3886_v15  ;;  %v3455_v55 = vand.u32 2147483647, %v7372_v16  ;;  %v2673_v33 = vmul.f32 %v4947_v0, %v8880_v27  ;;  %v3458_v17 = vadd.f32 1.0, %v7386_v47  ;;  %v7472_v15 = vpop.f32.mrb[94].mxu0  ;;  %v4955_v1 = vpop.eup %4954  ;;  %v7478_v39 = vmul.f32 %v5273_v58, %v7268_v60 }
 0x281   :  { %3951 = vst.msk [vmem:[%s8870_s5 + $0xb8] sm:$0xff] %vm2711_vm6, %v3887_v26  ;;  %8998 = vst [vmem:[#allocation17_spill] sm:$0xff] %v7472_v15  ;;  %v5274_v26 = vld [vmem:[%s8868_s3 + $0xe8] sm:$0xff]  ;;  %v3467_v6 = vadd.f32 1.0, %v7448_v11  ;;  %v8999_v58 = vmax.f32 %v7038_v7, 0.0  ;;  %v9000_v35 = vmax.f32 %v7158_v5, 0.0  ;;  %4968 = vpow2.f32 %v3156_v25 }
 0x282   :  { %v7485_v0 = vmul.f32 %v5274_v26, %v7338_v41  ;;  %2739 = vst.msk [vmem:[%s8869_s4 + $0xd8] sm:$0xff] %vm2711_vm6, %v2674_v42  ;;  %v4957_v27 = vpop.eup %4956  ;;  %v3063_v10 = vsub.f32 0.0, %v2999_v46  ;;  %2738 = vst.msk [vmem:[%s8869_s4 + $0xd0] sm:$0xff] %vm2711_vm6, %v2673_v33  ;;  %v7503_v26 = vadd.f32 %v4371_v63, %v7017_v22  ;;  %v1605_v42 = vpop.f32.mrb[95].mxu0  ;;  %v3445_v7 = vmul.f32 %v7330_v2, %v3444_v54 }
 0x283   :  { %v2928_v15 = vsub.f32 %v8999_v58, %v7253_v62  ;;  %v2929_v45 = vsub.f32 %v9000_v35, %v7282_v48  ;;  %v4959_v4 = vpop.eup %4958  ;;  %v3442_v57 = vmul.f32 0.6931472, %v4957_v27  ;;  %vm7506_vm11 = vcmp.lt.f32.partialorder %v3446_v36, 0.0004427343  ;;  %v7510_v5 = vpop.f32.mrb[96].mxu1 }
 0x284   :  { %v4961_v48 = vpop.eup %4960  ;;  %v3454_v46 = vmul.f32 %v7372_v16, %v3453_v23  ;;  %vm7513_vm12 = vcmp.lt.f32.partialorder %v3455_v55, 0.0004427343  ;;  %4970 = vlog2.f32 %v3458_v17  ;;  %v3461_v22 = vmul.f32 -0.5, %v7386_v47  ;;  %v1225_v63 = vpop.f32.mrb[97].mxu1 }
 0x285   :  { %v7518_v27 = vpop.f32.mrb[96].mxu0  ;;  %v7520_v2 = vpop.eup %4962  ;;  %v3448_v36 = vsel %vm7506_vm11, %v3445_v7, %v3442_v57  ;;  %v3451_v25 = vmul.f32 0.6931472, %v4961_v48  ;;  %4972 = vlog2.f32 %v3467_v6  ;;  %v4099_v54 = vmul.f32 -1.442695, %v7503_v26 }
 0x286   :  { %9005 = vst [vmem:[#allocation18_spill] sm:$0xff] %v7518_v27  ;;  %v7525_v16 = vpop.permute.xlu0 %4643  ;;  %v1610_v23 = vpop.f32.mrb[97].mxu0  ;;  %v2165_v55 = vadd.f32 1.0, %v4959_v4  ;;  %v3824_v35 = vadd.f32 %v3448_v36, %v2928_v15  ;;  %v3158_v17 = vmul.f32 1.442695, %v3063_v10  ;;  %v3470_v63 = vmul.f32 -0.5, %v7448_v11 }
 0x287   :  { %v3464_v58 = vand.u32 2147483647, %v7386_v47  ;;  %v3457_v42 = vsel %vm7513_vm12, %v3454_v46, %v3451_v25  ;;  %v3000_v62 = vand.u32 2147483647, %v7503_v26  ;;  %v4373_v57 = vadd.f32 %v7443_v49, %v7041_v29  ;;  %v7534_v6 = vpop.f32.mrb[98].mxu1  ;;  %v4965_v7 = vpop.eup %4964 }
 0x288   :  { %9006 = vst [vmem:[#allocation19_spill] sm:$0xff] %v7534_v6  ;;  %v3825_v48 = vadd.f32 %v3457_v42, %v2929_v45  ;;  %v9007_v4 = vunpack.i.l.bf16 %v7344_v9  ;;  %v8881_v10 = vunpack.i.h.bf16 %v7525_v16  ;;  %v8882_v36 = vunpack.i.l.bf16 %v7525_v16  ;;  %v1230_v33 = vpop.f32.mrb[99].mxu1  ;;  %v7540_v46 = vpop.f32.mrb[98].mxu0 }
 0x289   :  { %v4967_v25 = vpop.eup %4966  ;;  %v3462_v23 = vadd.f32 1.0, %v3461_v22  ;;  %4974 = vpow2.f32 %v4099_v54  ;;  %v3064_v27 = vsub.f32 0.0, %v3000_v62  ;;  %v7543_v29 = vadd.f32 %v4373_v57, %v7052_v32  ;;  %v1615_v6 = vpop.f32.mrb[99].mxu0 }
 0x28a   :  { %v3888_v15 = vmul.f32 %v9007_v4, %v3824_v35  ;;  %v9008_v45 = vunpack.i.h.bf16 %v7344_v9  ;;  %v2166_v35 = vadd.f32 1.0, %v4967_v25  ;;  %v2675_v4 = vmul.f32 %v4955_v1, %v8882_v36  ;;  %v7560_v57 = vpop.f32.mrb[100].mxu1 }
 0x28b   :  { %v2676_v22 = vmul.f32 %v4965_v7, %v8881_v10  ;;  %4976 = vrcp.f32 %v2165_v55  ;;  %v9009_v54 = vmax.f32 %v7188_v13, 0.0  ;;  %v4100_v62 = vmul.f32 -1.442695, %v7543_v29  ;;  %v7576_v55 = vpop.f32.mrb[100].mxu0  ;;  %v7578_v7 = vpop.eup %4968 }
 0x28c   :  { %v3889_v42 = vmul.f32 %v9008_v45, %v3825_v48  ;;  %3952 = vst.msk [vmem:[%s8870_s5 + $0xc0] sm:$0xff] %vm2711_vm6, %v3888_v15  ;;  %4978 = vrcp.f32 %v2166_v35  ;;  %v3471_v1 = vadd.f32 1.0, %v3470_v63  ;;  %v3001_v6 = vand.u32 2147483647, %v7543_v29  ;;  %2740 = vst.msk [vmem:[%s8869_s4 + $0xe0] sm:$0xff] %vm2711_vm6, %v2675_v4  ;;  %v1620_v33 = vpop.f32.mrb[101].mxu0 }
 0x28d   :  { %v2930_v9 = vsub.f32 %v9009_v54, %v7304_v14  ;;  %2741 = vst.msk [vmem:[%s8869_s4 + $0xe8] sm:$0xff] %vm2711_vm6, %v2676_v22  ;;  %v3476_v13 = vadd.f32 1.0, %v7462_v8  ;;  %v1235_v14 = vpop.f32.mrb[101].mxu1  ;;  %4980 = vpow2.f32 %v3158_v17  ;;  %vm7580_vm13 = vcmp.lt.f32.partialorder %v3464_v58, 0.0004427343 }
 0x28e   :  { %3953 = vst.msk [vmem:[%s8870_s5 + $0xc8] sm:$0xff] %vm2711_vm6, %v3889_v42  ;;  %v3473_v48 = vand.u32 2147483647, %v7448_v11  ;;  %v3485_v15 = vadd.f32 1.0, %v7520_v2  ;;  %v4971_v25 = vpop.eup %4970  ;;  %v3463_v45 = vmul.f32 %v7386_v47, %v3462_v23  ;;  %v3160_v42 = vmul.f32 1.442695, %v3064_v27 }
 0x28f   :  { %4982 = vpow2.f32 %v4100_v62  ;;  %v4375_v35 = vadd.f32 %v7443_v49, %v7072_v31  ;;  %v4973_v4 = vpop.eup %4972  ;;  %v3460_v22 = vmul.f32 0.6931472, %v4971_v25  ;;  %v3065_v17 = vsub.f32 0.0, %v3001_v6  ;;  %v7590_v54 = vpop.f32.mrb[102].mxu1 }
 0x290   :  { %4984 = vlog2.f32 %v3476_v13  ;;  %v3479_v58 = vmul.f32 -0.5, %v7462_v8  ;;  %v3469_v14 = vmul.f32 0.6931472, %v4973_v4  ;;  %v3472_v32 = vmul.f32 %v7448_v11, %v3471_v1  ;;  %v1240_v47 = vpop.f32.mrb[103].mxu1  ;;  %v7594_v27 = vpop.f32.mrb[102].mxu0 }
 0x291   :  { %4986 = vlog2.f32 %v3485_v15  ;;  %v3488_v33 = vmul.f32 -0.5, %v7520_v2  ;;  %v9012_v31 = vmax.f32 %v7257_v30, 0.0  ;;  %v3466_v62 = vsel %vm7580_vm13, %v3463_v45, %v3460_v22  ;;  %v1625_v11 = vpop.f32.mrb[103].mxu0 }
 0x292   :  { %vm3474_vm14 = vcmp.lt.f32.partialorder %v3473_v48, 0.0004427343  ;;  %v9013_v6 = vmax.f32 %v7268_v60, 0.0  ;;  %v3826_v15 = vadd.f32 %v3466_v62, %v2930_v9  ;;  %v3482_v25 = vand.u32 2147483647, %v7462_v8  ;;  %v7612_v48 = vpop.permute.xlu1 %4648  ;;  %v7614_v60 = vpop.f32.mrb[104].mxu1 }
 0x293   :  { %v2931_v23 = vsub.f32 %v9012_v31, %v7369_v28  ;;  %v3475_v1 = vsel %vm3474_vm14, %v3472_v32, %v3469_v14  ;;  %v7608_v4 = vadd.f32 %v4375_v35, %v7082_v34  ;;  %v4975_v47 = vpop.eup %4974  ;;  %v3162_v28 = vmul.f32 1.442695, %v3065_v17  ;;  %v1245_v34 = vpop.f32.mrb[105].mxu1 }
 0x294   :  { %v7604_v13 = vsub.f32 %v9013_v6, %v7478_v39  ;;  %v3480_v31 = vadd.f32 1.0, %v3479_v58  ;;  %v4377_v63 = vadd.f32 %v7443_v49, %v7117_v12  ;;  %v9014_v39 = vunpack.i.l.bf16 %v7427_v37  ;;  %v7619_v35 = vpop.f32.mrb[104].mxu0 }
 0x295   :  { %v3827_v30 = vadd.f32 %v3475_v1, %v2931_v23  ;;  %4988 = vpow2.f32 %v3160_v42  ;;  %v3489_v9 = vadd.f32 1.0, %v3488_v33  ;;  %v4101_v45 = vmul.f32 -1.442695, %v7608_v4  ;;  %v4977_v22 = vpop.eup %4976  ;;  %v1630_v62 = vpop.f32.mrb[105].mxu0 }
 0x296   :  { %v3890_v32 = vmul.f32 %v9014_v39, %v3826_v15  ;;  %v9015_v17 = vunpack.i.h.bf16 %v7427_v37  ;;  %v3002_v12 = vand.u32 2147483647, %v7608_v4  ;;  %v7625_v14 = vadd.f32 %v4377_v63, %v7123_v40  ;;  %v4979_v6 = vpop.eup %4978 }
 0x297   :  { %v4651_v23 = vunpack.i.h.bf16 %v7612_v48  ;;  %vm7632_vm15 = vcmp.lt.f32.partialorder %v3482_v25, 0.0004427343  ;;  %v3491_v37 = vand.u32 2147483647, %v7520_v2  ;;  %4990 = vpow2.f32 %v4101_v45  ;;  %v7638_v40 = vpop.eup %4980  ;;  %v7646_v25 = vpop.f32.mrb[106].mxu1 }
 0x298   :  { %v3891_v58 = vmul.f32 %v9015_v17, %v3827_v30  ;;  %3954 = vst.msk [vmem:[%s8870_s5 + $0xd0] sm:$0xff] %vm2711_vm6, %v3890_v32  ;;  %v4650_v33 = vunpack.i.l.bf16 %v7612_v48  ;;  %v2167_v11 = vadd.f32 1.0, %v4975_v47  ;;  %4992 = vpow2.f32 %v3162_v28  ;;  %v1250_v34 = vpop.f32.mrb[107].mxu1  ;;  %v7654_v47 = vpop.f32.mrb[106].mxu0 }
 0x299   :  { %v3481_v1 = vmul.f32 %v7462_v8, %v3480_v31  ;;  %v4102_v15 = vmul.f32 -1.442695, %v7625_v14  ;;  %v4983_v30 = vpop.eup %4982  ;;  %v3003_v63 = vand.u32 2147483647, %v7625_v14  ;;  %v2678_v32 = vmul.f32 %v4979_v6, %v4651_v23  ;;  %v7669_v6 = vpop.f32.mrb[108].mxu1 }
 0x29a   :  { %3955 = vst.msk [vmem:[%s8870_s5 + $0xd8] sm:$0xff] %vm2711_vm6, %v3891_v58  ;;  %v2677_v39 = vmul.f32 %v4977_v22, %v4650_v33  ;;  %v3494_v45 = vadd.f32 1.0, %v7578_v7  ;;  %v4985_v28 = vpop.eup %4984  ;;  %v2168_v8 = vadd.f32 1.0, %v4983_v30  ;;  %v3490_v31 = vmul.f32 %v7520_v2, %v3489_v9  ;;  %v1635_v58 = vpop.f32.mrb[107].mxu0 }
 0x29b   :  { %v3066_v17 = vsub.f32 0.0, %v3002_v12  ;;  %4994 = vpow2.f32 %v4102_v15  ;;  %v4987_v62 = vpop.eup %4986  ;;  %v3478_v10 = vmul.f32 0.6931472, %v4985_v28  ;;  %v3067_v36 = vsub.f32 0.0, %v3003_v63  ;;  %2743 = vst.msk [vmem:[%s8869_s4 + $0xf8] sm:$0xff] %vm2711_vm6, %v2678_v32 }
 0x29c   :  { %2742 = vst.msk [vmem:[%s8869_s4 + $0xf0] sm:$0xff] %vm2711_vm6, %v2677_v39  ;;  %4996 = vlog2.f32 %v3494_v45  ;;  %v3497_v22 = vmul.f32 -0.5, %v7578_v7  ;;  %v3487_v2 = vmul.f32 0.6931472, %v4987_v62  ;;  %v4379_v9 = vadd.f32 %v7443_v49, %v7153_v53  ;;  %v1255_v39 = vpop.f32.mrb[109].mxu1 }
 0x29d   :  { %4998 = vrcp.f32 %v2167_v11  ;;  %v3503_v12 = vadd.f32 1.0, %v7638_v40  ;;  %v9018_v15 = vmax.f32 %v7338_v41, 0.0  ;;  %v3484_v63 = vsel %vm7632_vm15, %v3481_v1, %v3478_v10 }
 0x29e   :  { %5000 = vrcp.f32 %v2168_v8  ;;  %vm3492_vm0 = vcmp.lt.f32.partialorder %v3491_v37, 0.0004427343  ;;  %v3828_v11 = vadd.f32 %v3484_v63, %v7604_v13  ;;  %v3164_v45 = vmul.f32 1.442695, %v3066_v17  ;;  %v7725_v63 = vpop.permute.xlu0 %4653 }
 0x29f   :  { %v2933_v30 = vsub.f32 %v9018_v15, %v7485_v0  ;;  %v3493_v32 = vsel %vm3492_vm0, %v3490_v31, %v3487_v2  ;;  %5002 = vlog2.f32 %v3503_v12  ;;  %v7677_v53 = vpop.eup %4988  ;;  %v3166_v28 = vmul.f32 1.442695, %v3067_v36  ;;  %v5275_v36 = vld [vmem:[%s8868_s3 + $0xf0] sm:$0xff]  ;;  %v5277_v2 = vld [vmem:[%s8868_s3 + $0x100] sm:$0xff] }
 0x2a0   :  { %v3498_v58 = vadd.f32 1.0, %v3497_v22  ;;  %v3506_v8 = vmul.f32 -0.5, %v7638_v40  ;;  %v9019_v41 = vunpack.i.l.bf16 %v7525_v16  ;;  %v7683_v42 = vadd.f32 %v4379_v9, %v7163_v51  ;;  %v5276_v51 = vld [vmem:[%s8868_s3 + $0xf8] sm:$0xff] }
 0x2a1   :  { %v3829_v34 = vadd.f32 %v3493_v32, %v2933_v30  ;;  %v4381_v10 = vadd.f32 %v7443_v49, %v7178_v59  ;;  %v4383_v13 = vadd.f32 %v7443_v49, %v7200_v50  ;;  %v4991_v37 = vpop.eup %4990  ;;  %v2870_v1 = vmul.f32 %v5275_v36, %v7354_v44 }
 0x2a2   :  { %v3892_v0 = vmul.f32 %v9019_v41, %v3828_v11  ;;  %v2807_v31 = vmax.f32 %v7425_v24, 0.0  ;;  %v2871_v17 = vmul.f32 %v5276_v51, %v7425_v24  ;;  %v9020_v59 = vunpack.i.h.bf16 %v7525_v16  ;;  %v7700_v22 = vpop.eup %4992 }
 0x2a3   :  { %v7707_v9 = vmul.f32 %v5277_v2, %v7503_v26  ;;  %v3500_v24 = vand.u32 2147483647, %v7578_v7  ;;  %v4103_v16 = vmul.f32 -1.442695, %v7683_v42  ;;  %v2169_v12 = vadd.f32 1.0, %v4991_v37 }
 0x2a4   :  { %v3893_v62 = vmul.f32 %v9020_v59, %v3829_v34  ;;  %3956 = vst.msk [vmem:[%s8870_s5 + $0xe0] sm:$0xff] %vm2711_vm6, %v3892_v0  ;;  %5004 = vpow2.f32 %v3164_v45  ;;  %v7720_v15 = vadd.f32 %v4381_v10, %v7182_v43  ;;  %v7723_v30 = vadd.f32 %v4383_v13, %v7207_v3 }
 0x2a5   :  { %v4995_v39 = vpop.eup %4994  ;;  %5006 = vpow2.f32 %v3166_v28  ;;  %v3499_v32 = vmul.f32 %v7578_v7, %v3498_v58  ;;  %v3507_v11 = vadd.f32 1.0, %v3506_v8  ;;  %v3509_v34 = vand.u32 2147483647, %v7638_v40 }
 0x2a6   :  { %3957 = vst.msk [vmem:[%s8870_s5 + $0xe8] sm:$0xff] %vm2711_vm6, %v3893_v62  ;;  %v4997_v41 = vpop.eup %4996  ;;  %v2170_v0 = vadd.f32 1.0, %v4995_v39  ;;  %5008 = vpow2.f32 %v4103_v16  ;;  %v3004_v45 = vand.u32 2147483647, %v7683_v42  ;;  %v4104_v43 = vmul.f32 -1.442695, %v7720_v15 }
 0x2a7   :  { %v4999_v10 = vpop.eup %4998  ;;  %v3496_v37 = vmul.f32 0.6931472, %v4997_v41  ;;  %v3005_v3 = vand.u32 2147483647, %v7720_v15  ;;  %v8885_v13 = vunpack.i.h.bf16 %v7725_v63  ;;  %v8886_v28 = vunpack.i.l.bf16 %v7725_v63  ;;  %v7741_v16 = vpop.f32.mrb[108].mxu0 }
 0x2a8   :  { %v5001_v36 = vpop.eup %5000  ;;  %5010 = vrcp.f32 %v2169_v12  ;;  %v9021_v7 = vmax.f32 %v7354_v44, 0.0  ;;  %v2935_v8 = vsub.f32 %v2807_v31, %v2871_v17  ;;  %vm3501_vm1 = vcmp.lt.f32.partialorder %v3500_v24, 0.0004427343  ;;  %v1640_v50 = vpop.f32.mrb[109].mxu0 }
 0x2a9   :  { %v5003_v51 = vpop.eup %5002  ;;  %v3502_v59 = vsel %vm3501_vm1, %v3499_v32, %v3496_v37  ;;  %v3508_v62 = vmul.f32 %v7638_v40, %v3507_v11  ;;  %vm7737_vm2 = vcmp.lt.f32.partialorder %v3509_v34, 0.0004427343  ;;  %5012 = vpow2.f32 %v4104_v43  ;;  %v7754_v50 = vpop.f32.mrb[110].mxu1 }
 0x2aa   :  { %v2934_v58 = vsub.f32 %v9021_v7, %v2870_v1  ;;  %5014 = vrcp.f32 %v2170_v0  ;;  %v3505_v39 = vmul.f32 0.6931472, %v5003_v51  ;;  %v3068_v12 = vsub.f32 0.0, %v3004_v45  ;;  %v5278_v0 = vld [vmem:[%s8868_s3 + $0x108] sm:$0xff]  ;;  %v5280_v51 = vld [vmem:[%s8868_s3 + $0x118] sm:$0xff] }
 0x2ab   :  { %v3069_v44 = vsub.f32 0.0, %v3005_v3  ;;  %v4105_v1 = vmul.f32 -1.442695, %v7723_v30  ;;  %v2679_v31 = vmul.f32 %v4999_v10, %v8886_v28  ;;  %v2680_v40 = vmul.f32 %v5001_v36, %v8885_v13 }
 0x2ac   :  { %v3830_v41 = vadd.f32 %v3502_v59, %v2934_v58  ;;  %v3511_v17 = vsel %vm7737_vm2, %v3508_v62, %v3505_v39  ;;  %v3006_v32 = vand.u32 2147483647, %v7723_v30  ;;  %v3512_v11 = vadd.f32 1.0, %v7677_v53  ;;  %v7784_v58 = vpop.f32.mrb[110].mxu0 }
 0x2ad   :  { %v2809_v34 = vmax.f32 %v7543_v29, 0.0  ;;  %v2873_v45 = vmul.f32 %v5278_v0, %v7543_v29  ;;  %v2810_v43 = vmax.f32 %v7608_v4, 0.0  ;;  %v3831_v10 = vadd.f32 %v3511_v17, %v2935_v8  ;;  %2744 = vst.msk [vmem:[%s8869_s4 + $0x100] sm:$0xff] %vm2711_vm6, %v2679_v31  ;;  %2745 = vst.msk [vmem:[%s8869_s4 + $0x108] sm:$0xff] %vm2711_vm6, %v2680_v40  ;;  %v5279_v29 = vld [vmem:[%s8868_s3 + $0x110] sm:$0xff]  ;;  %v1645_v39 = vpop.f32.mrb[111].mxu0 }
 0x2ae   :  { %v3894_v24 = vmul.f32 %v4650_v33, %v3830_v41  ;;  %v1260_v33 = vpop.f32.mrb[111].mxu1  ;;  %v7770_v37 = vpop.eup %5004  ;;  %v7776_v3 = vmul.f32 %v5279_v29, %v7608_v4  ;;  %5016 = vlog2.f32 %v3512_v11  ;;  %v3521_v7 = vadd.f32 1.0, %v7700_v22 }
 0x2af   :  { %v7786_v8 = vpop.eup %5006  ;;  %v7792_v59 = vmul.f32 %v5280_v51, %v7625_v14  ;;  %v3895_v62 = vmul.f32 %v4651_v23, %v3831_v10  ;;  %v3168_v2 = vmul.f32 1.442695, %v3068_v12  ;;  %5018 = vpow2.f32 %v4105_v1  ;;  %v7800_v11 = vpop.permute.xlu1 %4658 }
 0x2b0   :  { %3958 = vst.msk [vmem:[%s8870_s5 + $0xf0] sm:$0xff] %vm2711_vm6, %v3894_v24  ;;  %v5009_v41 = vpop.eup %5008  ;;  %v3170_v31 = vmul.f32 1.442695, %v3069_v44  ;;  %v3070_v40 = vsub.f32 0.0, %v3006_v32  ;;  %v4385_v17 = vadd.f32 %v7443_v49, %v7235_v21  ;;  %v4387_v24 = vadd.f32 %v7443_v49, %v7271_v61  ;;  %v7802_v0 = vpop.f32.mrb[112].mxu1  ;;  %v5281_v61 = vld [vmem:[%s8868_s3 + $0x120] sm:$0xff] }
 0x2b1   :  { %3959 = vst.msk [vmem:[%s8870_s5 + $0xf8] sm:$0xff] %vm2711_vm6, %v3895_v62  ;;  %v2171_v48 = vadd.f32 1.0, %v5009_v41  ;;  %v3515_v12 = vmul.f32 -0.5, %v7677_v53  ;;  %5020 = vlog2.f32 %v3521_v7  ;;  %v1265_v44 = vpop.f32.mrb[113].mxu1  ;;  %v7810_v21 = vpop.f32.mrb[112].mxu0  ;;  %v7816_v32 = vmul.f32 %v5281_v61, %v7683_v42 }
 0x2b2   :  { %v5011_v1 = vpop.eup %5010  ;;  %v9024_v10 = vmax.f32 %v7503_v26, 0.0  ;;  %v7822_v29 = vadd.f32 %v4385_v17, %v7247_v20  ;;  %v7825_v7 = vadd.f32 %v4387_v24, %v7276_v52  ;;  %v1650_v51 = vpop.f32.mrb[113].mxu0  ;;  %5022 = vpow2.f32 %v3168_v2 }
 0x2b3   :  { %v5013_v62 = vpop.eup %5012  ;;  %v3524_v39 = vmul.f32 -0.5, %v7700_v22  ;;  %v8883_v41 = vunpack.i.h.bf16 %v7800_v11  ;;  %v8884_v44 = vunpack.i.l.bf16 %v7800_v11  ;;  %5024 = vpow2.f32 %v3170_v31  ;;  %v7831_v20 = vpop.f32.mrb[114].mxu1 }
 0x2b4   :  { %v2936_v33 = vsub.f32 %v9024_v10, %v7707_v9  ;;  %v5015_v61 = vpop.eup %5014  ;;  %v2172_v23 = vadd.f32 1.0, %v5013_v62  ;;  %v3172_v26 = vmul.f32 1.442695, %v3070_v40  ;;  %v4106_v9 = vmul.f32 -1.442695, %v7822_v29  ;;  %v1270_v2 = vpop.f32.mrb[115].mxu1 }
 0x2b5   :  { %5026 = vrcp.f32 %v2171_v48  ;;  %v2937_v17 = vsub.f32 %v2809_v34, %v2873_v45  ;;  %v3516_v24 = vadd.f32 1.0, %v3515_v12  ;;  %v3518_v10 = vand.u32 2147483647, %v7677_v53  ;;  %v7838_v31 = vpop.f32.mrb[114].mxu0 }
 0x2b6   :  { %5028 = vrcp.f32 %v2172_v23  ;;  %v3527_v51 = vand.u32 2147483647, %v7700_v22  ;;  %v2681_v62 = vmul.f32 %v5011_v1, %v8884_v44  ;;  %9025 = vst [vmem:[#allocation20_spill] sm:$0xff] %v7838_v31  ;;  %v3525_v40 = vadd.f32 1.0, %v3524_v39  ;;  %v1655_v34 = vpop.f32.mrb[115].mxu0  ;;  %v5282_v23 = vld [vmem:[%s8868_s3 + $0x128] sm:$0xff]  ;;  %v7883_v31 = vpop.permute.xlu0 %4663 }
 0x2b7   :  { %5030 = vpow2.f32 %v4106_v9  ;;  %v2682_v48 = vmul.f32 %v5015_v61, %v8883_v41  ;;  %v3530_v52 = vadd.f32 1.0, %v7770_v37  ;;  %v7847_v12 = vmul.f32 %v5282_v23, %v7720_v15  ;;  %v7855_v61 = vpop.f32.mrb[116].mxu1 }
 0x2b8   :  { %v5017_v45 = vpop.eup %5016  ;;  %5032 = vpow2.f32 %v3172_v26  ;;  %v3007_v39 = vand.u32 2147483647, %v7822_v29  ;;  %2746 = vst.msk [vmem:[%s8869_s4 + $0x110] sm:$0xff] %vm2711_vm6, %v2681_v62  ;;  %v3517_v34 = vmul.f32 %v7677_v53, %v3516_v24  ;;  %v3008_v41 = vand.u32 2147483647, %v7825_v7  ;;  %v1275_v23 = vpop.f32.mrb[117].mxu1 }
 0x2b9   :  { %v5019_v9 = vpop.eup %5018  ;;  %v3514_v2 = vmul.f32 0.6931472, %v5017_v45  ;;  %2747 = vst.msk [vmem:[%s8869_s4 + $0x118] sm:$0xff] %vm2711_vm6, %v2682_v48  ;;  %v3539_v26 = vadd.f32 1.0, %v7786_v8  ;;  %v5283_v62 = vld [vmem:[%s8868_s3 + $0x130] sm:$0xff]  ;;  %5034 = vlog2.f32 %v3530_v52  ;;  %v7871_v24 = vpop.f32.mrb[116].mxu0  ;;  %v3526_v48 = vmul.f32 %v7700_v22, %v3525_v40 }
 0x2ba   :  { %v7868_v1 = vmul.f32 %v5283_v62, %v7723_v30  ;;  %vm3519_vm3 = vcmp.lt.f32.partialorder %v3518_v10, 0.0004427343  ;;  %v4107_v53 = vmul.f32 -1.442695, %v7825_v7  ;;  %9026 = vst [vmem:[#allocation21_spill] sm:$0xff] %v7871_v24  ;;  %v7881_v23 = vsub.f32 %v2810_v43, %v7776_v3  ;;  %v1660_v62 = vpop.f32.mrb[117].mxu0 }
 0x2bb   :  { %v5021_v45 = vpop.eup %5020  ;;  %v3520_v44 = vsel %vm3519_vm3, %v3517_v34, %v3514_v2  ;;  %vm7874_vm4 = vcmp.lt.f32.partialorder %v3527_v51, 0.0004427343  ;;  %v2173_v10 = vadd.f32 1.0, %v5019_v9  ;;  %v3071_v52 = vsub.f32 0.0, %v3007_v39  ;;  %v7885_v24 = vpop.f32.mrb[118].mxu1  ;;  %v9030_v40 = vld [vmem:[#allocation8_spill] sm:$0xff] }
 0x2bc   :  { %v3523_v36 = vmul.f32 0.6931472, %v5021_v45  ;;  %v3832_v28 = vadd.f32 %v3520_v44, %v2936_v33  ;;  %9029 = vst [vmem:[#allocation22_spill] sm:$0xff] %v7885_v24  ;;  %v7887_v2 = vpop.eup %5022  ;;  %v3072_v22 = vsub.f32 0.0, %v3008_v41  ;;  %v3533_v51 = vmul.f32 -0.5, %v7770_v37  ;;  %v1280_v43 = vpop.f32.mrb[119].mxu1 }
 0x2bd   :  { %5036 = vlog2.f32 %v3539_v26  ;;  %v4389_v4 = vadd.f32 %v7443_v49, %v9030_v40  ;;  %v7892_v3 = vpop.f32.mrb[118].mxu0  ;;  %v7894_v9 = vpop.eup %5024  ;;  %v9032_v44 = vunpack.i.l.bf16 %v7725_v63  ;;  %v9033_v34 = vld [vmem:[#allocation13_spill] sm:$0xff]  ;;  %v9034_v40 = vmax.f32 %v7625_v14, 0.0 }
 0x2be   :  { %9031 = vst [vmem:[#allocation8_spill] sm:$0xff] %v7892_v3  ;;  %v3529_v33 = vsel %vm7874_vm4, %v3526_v48, %v3523_v36  ;;  %5038 = vpow2.f32 %v4107_v53  ;;  %v4391_v41 = vadd.f32 %v7443_v49, %v9033_v34  ;;  %v1665_v45 = vpop.f32.mrb[119].mxu0  ;;  %v9035_v3 = vld [vmem:[#allocation9_spill] sm:$0xff]  ;;  %v8888_v13 = vunpack.i.l.bf16 %v7883_v31 }
 0x2bf   :  { %v3896_v39 = vmul.f32 %v9032_v44, %v3832_v28  ;;  %v5027_v26 = vpop.eup %5026  ;;  %v3833_v62 = vadd.f32 %v3529_v33, %v2937_v17  ;;  %v7905_v43 = vsub.f32 %v9034_v40, %v7792_v59  ;;  %v7908_v24 = vadd.f32 %v4389_v4, %v9035_v3  ;;  %v7920_v59 = vpop.f32.mrb[120].mxu1 }
 0x2c0   :  { %v5029_v36 = vpop.eup %5028  ;;  %v3174_v28 = vmul.f32 1.442695, %v3071_v52  ;;  %v3542_v53 = vmul.f32 -0.5, %v7786_v8  ;;  %v7917_v17 = vadd.f32 %v4391_v41, %v7340_v56  ;;  %v8887_v14 = vunpack.i.h.bf16 %v7883_v31  ;;  %v7926_v52 = vpop.f32.mrb[120].mxu0 }
 0x2c1   :  { %3960 = vst.msk [vmem:[%s8870_s5 + $0x100] sm:$0xff] %vm2711_vm6, %v3896_v39  ;;  %v5031_v48 = vpop.eup %5030  ;;  %v9036_v4 = vunpack.i.h.bf16 %v7725_v63  ;;  %v3534_v44 = vadd.f32 1.0, %v3533_v51  ;;  %v4108_v34 = vmul.f32 -1.442695, %v7908_v24  ;;  %v1285_v39 = vpop.f32.mrb[121].mxu1  ;;  %5040 = vrcp.f32 %v2173_v10  ;;  %v5284_v63 = vld [vmem:[%s8868_s3 + $0x138] sm:$0xff] }
 0x2c2   :  { %v7928_v45 = vpop.eup %5032  ;;  %v2174_v56 = vadd.f32 1.0, %v5031_v48  ;;  %v3176_v41 = vmul.f32 1.442695, %v3072_v22  ;;  %v3536_v40 = vand.u32 2147483647, %v7770_v37  ;;  %v7939_v51 = vmul.f32 %v5284_v63, %v7822_v29 }
 0x2c3   :  { %v3897_v3 = vmul.f32 %v9036_v4, %v3833_v62  ;;  %5042 = vpow2.f32 %v4108_v34  ;;  %v2683_v10 = vmul.f32 %v5027_v26, %v8888_v13  ;;  %v3548_v22 = vadd.f32 1.0, %v7887_v2  ;;  %v1670_v62 = vpop.f32.mrb[121].mxu0  ;;  %v5035_v48 = vpop.eup %5034 }
 0x2c4   :  { %5044 = vrcp.f32 %v2174_v56  ;;  %v3543_v4 = vadd.f32 1.0, %v3542_v53  ;;  %v3545_v39 = vand.u32 2147483647, %v7786_v8  ;;  %v3532_v33 = vmul.f32 0.6931472, %v5035_v48  ;;  %v7970_v26 = vpop.f32.mrb[122].mxu0 }
 0x2c5   :  { %3961 = vst.msk [vmem:[%s8870_s5 + $0x108] sm:$0xff] %vm2711_vm6, %v3897_v3  ;;  %v2684_v3 = vmul.f32 %v5029_v36, %v8887_v14  ;;  %5046 = vpow2.f32 %v3174_v28  ;;  %v3535_v63 = vmul.f32 %v7770_v37, %v3534_v44  ;;  %v4109_v34 = vmul.f32 -1.442695, %v7917_v17  ;;  %2748 = vst.msk [vmem:[%s8869_s4 + $0x120] sm:$0xff] %vm2711_vm6, %v2683_v10  ;;  %v5285_v37 = vld [vmem:[%s8868_s3 + $0x140] sm:$0xff] }
 0x2c6   :  { %5048 = vpow2.f32 %v3176_v41  ;;  %vm3537_vm5 = vcmp.lt.f32.partialorder %v3536_v40, 0.0004427343  ;;  %v3557_v36 = vadd.f32 1.0, %v7894_v9  ;;  %v7963_v53 = vmul.f32 %v5285_v37, %v7825_v7  ;;  %v7966_v41 = vpop.f32.mrb[122].mxu1  ;;  %9037 = vst [vmem:[#allocation13_spill] sm:$0xff] %v7970_v26 }
 0x2c7   :  { %2749 = vst.msk [vmem:[%s8869_s4 + $0x128] sm:$0xff] %vm2711_vm6, %v2684_v3  ;;  %v5037_v28 = vpop.eup %5036  ;;  %v3538_v44 = vsel %vm3537_vm5, %v3535_v63, %v3532_v33  ;;  %v3009_v56 = vand.u32 2147483647, %v7908_v24  ;;  %5050 = vlog2.f32 %v3548_v22  ;;  %v3544_v62 = vmul.f32 %v7786_v8, %v3543_v4  ;;  %v1290_v3 = vpop.f32.mrb[123].mxu1 }
 0x2c8   :  { %v5039_v40 = vpop.eup %5038  ;;  %v3541_v10 = vmul.f32 0.6931472, %v5037_v28  ;;  %vm3546_vm7 = vcmp.lt.f32.partialorder %v3545_v39, 0.0004427343  ;;  %v3834_v48 = vadd.f32 %v3538_v44, %v7881_v23  ;;  %5052 = vpow2.f32 %v4109_v34  ;;  %v7983_v8 = vpop.permute.xlu1 %4668 }
 0x2c9   :  { %v9038_v37 = vmax.f32 %v7683_v42, 0.0  ;;  %v9039_v22 = vmax.f32 %v7720_v15, 0.0  ;;  %v3551_v28 = vmul.f32 -0.5, %v7887_v2  ;;  %v1675_v4 = vpop.f32.mrb[123].mxu0  ;;  %v9040_v39 = vunpack.i.l.bf16 %v7800_v11 }
 0x2ca   :  { %v3547_v23 = vsel %vm3546_vm7, %v3544_v62, %v3541_v10  ;;  %5054 = vlog2.f32 %v3557_v36  ;;  %v4393_v42 = vadd.f32 %v7443_v49, %v7346_v19  ;;  %v3073_v3 = vsub.f32 0.0, %v3009_v56  ;;  %v9041_v62 = vld [vmem:[#allocation10_spill] sm:$0xff]  ;;  %v8031_v14 = vpop.f32.mrb[124].mxu0 }
 0x2cb   :  { %v7975_v33 = vsub.f32 %v9038_v37, %v7816_v32  ;;  %v7980_v63 = vsub.f32 %v9039_v22, %v7847_v12  ;;  %v3898_v44 = vmul.f32 %v9040_v39, %v3834_v48  ;;  %v2175_v32 = vadd.f32 1.0, %v5039_v40  ;;  %v5041_v12 = vpop.eup %5040  ;;  %v5286_v39 = vld [vmem:[%s8868_s3 + $0x148] sm:$0xff]  ;;  %9044 = vst [vmem:[#allocation10_spill] sm:$0xff] %v8031_v14 }
 0x2cc   :  { %v3835_v34 = vadd.f32 %v3547_v23, %v7905_v43  ;;  %v4395_v15 = vadd.f32 %v7443_v49, %v7379_v38  ;;  %v3010_v36 = vand.u32 2147483647, %v7917_v17  ;;  %v7999_v48 = vadd.f32 %v4393_v42, %v9041_v62 }
 0x2cd   :  { %3962 = vst.msk [vmem:[%s8870_s5 + $0x110] sm:$0xff] %vm2711_vm6, %v3898_v44  ;;  %v8889_v19 = vunpack.i.l.bf16 %v7983_v8  ;;  %v5043_v43 = vpop.eup %5042  ;;  %v9042_v56 = vunpack.i.h.bf16 %v7800_v11  ;;  %v3560_v38 = vmul.f32 -0.5, %v7894_v9  ;;  %v8013_v44 = vmul.f32 %v5286_v39, %v7908_v24 }
 0x2ce   :  { %v8006_v37 = vadd.f32 %v4395_v15, %v7384_v18  ;;  %v5045_v4 = vpop.eup %5044  ;;  %v2176_v23 = vadd.f32 1.0, %v5043_v43  ;;  %v3552_v42 = vadd.f32 1.0, %v3551_v28  ;;  %v4110_v11 = vmul.f32 -1.442695, %v7999_v48 }
 0x2cf   :  { %v3899_v40 = vmul.f32 %v9042_v56, %v3835_v34  ;;  %v8016_v34 = vpop.f32.mrb[124].mxu1  ;;  %v8018_v62 = vpop.eup %5046  ;;  %5056 = vrcp.f32 %v2175_v32  ;;  %v3178_v18 = vmul.f32 1.442695, %v3073_v3  ;;  %v3554_v43 = vand.u32 2147483647, %v7887_v2 }
 0x2d0   :  { %9043 = vst [vmem:[#allocation9_spill] sm:$0xff] %v8016_v34  ;;  %v1295_v56 = vpop.f32.mrb[125].mxu1  ;;  %v8026_v39 = vpop.eup %5048  ;;  %5058 = vrcp.f32 %v2176_v23  ;;  %v3074_v28 = vsub.f32 0.0, %v3010_v36  ;;  %v3563_v10 = vand.u32 2147483647, %v7894_v9  ;;  %v2685_v32 = vmul.f32 %v5041_v12, %v8889_v19 }
 0x2d1   :  { %3963 = vst.msk [vmem:[%s8870_s5 + $0x118] sm:$0xff] %vm2711_vm6, %v3899_v40  ;;  %v5051_v13 = vpop.eup %5050  ;;  %v3561_v22 = vadd.f32 1.0, %v3560_v38  ;;  %5060 = vpow2.f32 %v4110_v11  ;;  %v9045_v3 = vunpack.i.h.bf16 %v7983_v8  ;;  %v3566_v15 = vadd.f32 1.0, %v7928_v45  ;;  %v1680_v56 = vpop.f32.mrb[125].mxu0  ;;  %v5287_v38 = vld [vmem:[%s8868_s3 + $0x150] sm:$0xff] }
 0x2d2   :  { %v3550_v26 = vmul.f32 0.6931472, %v5051_v13  ;;  %v3553_v23 = vmul.f32 %v7887_v2, %v3552_v42  ;;  %v3011_v36 = vand.u32 2147483647, %v7999_v48  ;;  %v4111_v34 = vmul.f32 -1.442695, %v8006_v37  ;;  %v5053_v12 = vpop.eup %5052 }
 0x2d3   :  { %v2686_v40 = vmul.f32 %v5045_v4, %v9045_v3  ;;  %2750 = vst.msk [vmem:[%s8869_s4 + $0x130] sm:$0xff] %vm2711_vm6, %v2685_v32  ;;  %5062 = vpow2.f32 %v3178_v18  ;;  %v8047_v4 = vmul.f32 %v5287_v38, %v7917_v17  ;;  %vm3555_vm8 = vcmp.lt.f32.partialorder %v3554_v43, 0.0004427343  ;;  %v8058_v38 = vpop.permute.xlu0 %4673  ;;  %v8060_v19 = vpop.f32.mrb[126].mxu1 }
 0x2d4   :  { %v3575_v2 = vadd.f32 1.0, %v8018_v62  ;;  %v5055_v13 = vpop.eup %5054  ;;  %v3180_v42 = vmul.f32 1.442695, %v3074_v28  ;;  %v3556_v11 = vsel %vm3555_vm8, %v3553_v23, %v3550_v26  ;;  %v3012_v18 = vand.u32 2147483647, %v8006_v37  ;;  %9046 = vst [vmem:[#allocation23_spill] sm:$0xff] %v8060_v19 }
 0x2d5   :  { %2751 = vst.msk [vmem:[%s8869_s4 + $0x138] sm:$0xff] %vm2711_vm6, %v2686_v40  ;;  %5064 = vlog2.f32 %v3566_v15  ;;  %v3559_v32 = vmul.f32 0.6931472, %v5055_v13  ;;  %v3562_v3 = vmul.f32 %v7894_v9, %v3561_v22  ;;  %v3836_v56 = vadd.f32 %v3556_v11, %v7975_v33  ;;  %v1300_v28 = vpop.f32.mrb[127].mxu1  ;;  %v8062_v26 = vpop.f32.mrb[126].mxu0  ;;  %v9048_v9 = vld [vmem:[#allocation11_spill] sm:$0xff] }
 0x2d6   :  { %v3569_v43 = vmul.f32 -0.5, %v7928_v45  ;;  %v2177_v40 = vadd.f32 1.0, %v5053_v12  ;;  %vm3564_vm9 = vcmp.lt.f32.partialorder %v3563_v10, 0.0004427343  ;;  %v3075_v14 = vsub.f32 0.0, %v3011_v36  ;;  %v1685_v22 = vpop.f32.mrb[127].mxu0 }
 0x2d7   :  { %5066 = vpow2.f32 %v4111_v34  ;;  %v3565_v23 = vsel %vm3564_vm9, %v3562_v3, %v3559_v32  ;;  %v9047_v15 = vunpack.i.l.bf16 %v7883_v31  ;;  %v4397_v33 = vadd.f32 %v7443_v49, %v9048_v9  ;;  %v8069_v12 = vld [vmem:[#allocation4] ss:$0 sm:$0xff]  ;;  %v9049_v10 = vld [vmem:[#allocation14_spill] sm:$0xff] }
 0x2d8   :  { %5068 = vlog2.f32 %v3575_v2  ;;  %v3837_v11 = vadd.f32 %v3565_v23, %v7980_v63  ;;  %v3076_v19 = vsub.f32 0.0, %v3012_v18  ;;  %v4399_v34 = vadd.f32 %v8069_v12, %v9049_v10 }
 0x2d9   :  { %v3900_v13 = vmul.f32 %v9047_v15, %v3836_v56  ;;  %5070 = vpow2.f32 %v3180_v42  ;;  %v5057_v36 = vpop.eup %5056  ;;  %v9050_v2 = vmax.f32 %v7723_v30, 0.0  ;;  %v3570_v32 = vadd.f32 1.0, %v3569_v43  ;;  %v9051_v42 = vld [vmem:[#allocation12_spill] sm:$0xff]  ;;  %v9053_v15 = vld [vmem:[#allocation15_spill] sm:$0xff] }
 0x2da   :  { %v8081_v3 = vadd.f32 %v4397_v33, %v9051_v42  ;;  %v4675_v63 = vunpack.i.l.bf16 %v8058_v38  ;;  %v5059_v18 = vpop.eup %5058  ;;  %v9052_v56 = vunpack.i.h.bf16 %v7883_v31  ;;  %v3578_v23 = vmul.f32 -0.5, %v8018_v62 }
 0x2db   :  { %3964 = vst.msk [vmem:[%s8870_s5 + $0x120] sm:$0xff] %vm2711_vm6, %v3900_v13  ;;  %v2942_v49 = vsub.f32 %v9050_v2, %v7868_v1  ;;  %v8088_v9 = vadd.f32 %v4399_v34, %v9053_v15  ;;  %v8890_v13 = vunpack.i.h.bf16 %v8058_v38  ;;  %v5061_v22 = vpop.eup %5060  ;;  %5072 = vrcp.f32 %v2177_v40 }
 0x2dc   :  { %v3901_v28 = vmul.f32 %v9052_v56, %v3837_v11  ;;  %v3182_v30 = vmul.f32 1.442695, %v3075_v14  ;;  %v9054_v1 = vmax.f32 %v7822_v29, 0.0  ;;  %v4112_v33 = vmul.f32 -1.442695, %v8081_v3 }
 0x2dd   :  { %v2178_v31 = vadd.f32 1.0, %v5061_v22  ;;  %v3184_v10 = vmul.f32 1.442695, %v3076_v19  ;;  %v3572_v34 = vand.u32 2147483647, %v7928_v45  ;;  %v8101_v2 = vpop.eup %5062  ;;  %v3571_v14 = vmul.f32 %v7928_v45, %v3570_v32  ;;  %v5289_v32 = vld [vmem:[%s8868_s3 + $0x158] sm:$0xff] }
 0x2de   :  { %v2943_v43 = vsub.f32 %v9054_v1, %v7939_v51  ;;  %3965 = vst.msk [vmem:[%s8870_s5 + $0x128] sm:$0xff] %vm2711_vm6, %v3901_v28  ;;  %5074 = vpow2.f32 %v4112_v33  ;;  %v3013_v29 = vand.u32 2147483647, %v8081_v3  ;;  %v2687_v51 = vmul.f32 %v5057_v36, %v4675_v63  ;;  %v5290_v33 = vld [vmem:[%s8868_s3 + $0x160] sm:$0xff] }
 0x2df   :  { %v5065_v40 = vpop.eup %5064  ;;  %v3579_v42 = vadd.f32 1.0, %v3578_v23  ;;  %v3581_v56 = vand.u32 2147483647, %v8018_v62  ;;  %v2688_v28 = vmul.f32 %v5059_v18, %v8890_v13  ;;  %v3584_v19 = vadd.f32 1.0, %v8026_v39 }
 0x2e0   :  { %5076 = vrcp.f32 %v2178_v31  ;;  %v3568_v15 = vmul.f32 0.6931472, %v5065_v40  ;;  %v4113_v22 = vmul.f32 -1.442695, %v8088_v9  ;;  %v3014_v45 = vand.u32 2147483647, %v8088_v9 }
 0x2e1   :  { %2752 = vst.msk [vmem:[%s8869_s4 + $0x140] sm:$0xff] %vm2711_vm6, %v2687_v51  ;;  %v5067_v36 = vpop.eup %5066  ;;  %v8121_v18 = vmul.f32 %v5289_v32, %v7999_v48  ;;  %5078 = vpow2.f32 %v3182_v30  ;;  %vm3573_vm10 = vcmp.lt.f32.partialorder %v3572_v34, 0.0004427343  ;;  %2753 = vst.msk [vmem:[%s8869_s4 + $0x148] sm:$0xff] %vm2711_vm6, %v2688_v28  ;;  %v3593_v23 = vadd.f32 1.0, %v8101_v2  ;;  %v8132_v28 = vpop.permute.xlu1 %4678 }
 0x2e2   :  { %v5069_v1 = vpop.eup %5068  ;;  %5080 = vpow2.f32 %v3184_v10  ;;  %v3574_v31 = vsel %vm3573_vm10, %v3571_v14, %v3568_v15  ;;  %v3077_v51 = vsub.f32 0.0, %v3013_v29  ;;  %v3580_v32 = vmul.f32 %v8018_v62, %v3579_v42 }
 0x2e3   :  { %v8129_v40 = vpop.eup %5070  ;;  %v3577_v11 = vmul.f32 0.6931472, %v5069_v1  ;;  %v3838_v30 = vadd.f32 %v3574_v31, %v2942_v49  ;;  %5082 = vlog2.f32 %v3584_v19  ;;  %v2179_v34 = vadd.f32 1.0, %v5067_v36  ;;  %v9056_v19 = vld [vmem:[#allocation16_spill] sm:$0xff] }
 0x2e4   :  { %vm3582_vm11 = vcmp.lt.f32.partialorder %v3581_v56, 0.0004427343  ;;  %5084 = vpow2.f32 %v4113_v22  ;;  %v3078_v13 = vsub.f32 0.0, %v3014_v45  ;;  %v8138_v10 = vmul.f32 %v5290_v33, %v8006_v37 }
 0x2e5   :  { %v3583_v14 = vsel %vm3582_vm11, %v3580_v32, %v3577_v11  ;;  %v9055_v29 = vunpack.i.l.bf16 %v7983_v8  ;;  %5086 = vlog2.f32 %v3593_v23  ;;  %v5073_v62 = vpop.eup %5072  ;;  %v3186_v42 = vmul.f32 1.442695, %v3077_v51  ;;  %v9059_v32 = vld [vmem:[#allocation17_spill] sm:$0xff] }
 0x2e6   :  { %v3839_v49 = vadd.f32 %v3583_v14, %v2943_v43  ;;  %v3587_v56 = vmul.f32 -0.5, %v8026_v39  ;;  %v4401_v22 = vadd.f32 %v8069_v12, %v9056_v19  ;;  %v9057_v11 = vmax.f32 %v7825_v7, 0.0 }
 0x2e7   :  { %v3902_v15 = vmul.f32 %v9055_v29, %v3838_v30  ;;  %v3596_v36 = vmul.f32 -0.5, %v8101_v2  ;;  %v4403_v43 = vadd.f32 %v8069_v12, %v7510_v5  ;;  %v4680_v23 = vunpack.i.l.bf16 %v8132_v28  ;;  %v9060_v29 = vld [vmem:[#allocation18_spill] sm:$0xff] }
 0x2e8   :  { %v2944_v45 = vsub.f32 %v9057_v11, %v7963_v53  ;;  %v5075_v1 = vpop.eup %5074  ;;  %5088 = vrcp.f32 %v2179_v34  ;;  %v9058_v33 = vunpack.i.h.bf16 %v7983_v8  ;;  %v3188_v51 = vmul.f32 1.442695, %v3078_v13 }
 0x2e9   :  { %3966 = vst.msk [vmem:[%s8870_s5 + $0x130] sm:$0xff] %vm2711_vm6, %v3902_v15  ;;  %v8159_v30 = vadd.f32 %v4401_v22, %v9059_v32  ;;  %v2180_v14 = vadd.f32 1.0, %v5075_v1  ;;  %v8162_v7 = vadd.f32 %v4403_v43, %v9060_v29  ;;  %v8891_v53 = vunpack.i.h.bf16 %v8132_v28  ;;  %v5291_v43 = vld [vmem:[%s8868_s3 + $0x168] sm:$0xff] }
 0x2ea   :  { %v3903_v31 = vmul.f32 %v9058_v33, %v3839_v49  ;;  %v2689_v5 = vmul.f32 %v5073_v62, %v4680_v23  ;;  %v5077_v15 = vpop.eup %5076  ;;  %5090 = vpow2.f32 %v3186_v42  ;;  %v3588_v8 = vadd.f32 1.0, %v3587_v56  ;;  %v5292_v33 = vld [vmem:[%s8868_s3 + $0x170] sm:$0xff] }
 0x2eb   :  { %v3590_v13 = vand.u32 2147483647, %v8026_v39  ;;  %v4114_v34 = vmul.f32 -1.442695, %v8159_v30  ;;  %v8173_v49 = vpop.eup %5078  ;;  %5092 = vrcp.f32 %v2180_v14  ;;  %v9061_v19 = vmax.f32 %v7908_v24, 0.0 }
 0x2ec   :  { %3967 = vst.msk [vmem:[%s8870_s5 + $0x138] sm:$0xff] %vm2711_vm6, %v3903_v31  ;;  %v3597_v62 = vadd.f32 1.0, %v3596_v36  ;;  %2754 = vst.msk [vmem:[%s8869_s4 + $0x150] sm:$0xff] %vm2711_vm6, %v2689_v5  ;;  %v3602_v42 = vadd.f32 1.0, %v8129_v40  ;;  %v8183_v56 = vpop.eup %5080  ;;  %v8190_v1 = vmul.f32 %v5291_v43, %v8081_v3  ;;  %v3599_v24 = vand.u32 2147483647, %v8101_v2 }
 0x2ed   :  { %v2945_v22 = vsub.f32 %v9061_v19, %v8013_v44  ;;  %5094 = vpow2.f32 %v4114_v34  ;;  %v5083_v44 = vpop.eup %5082  ;;  %v8198_v31 = vmul.f32 %v5292_v33, %v8088_v9  ;;  %v2690_v32 = vmul.f32 %v5077_v15, %v8891_v53  ;;  %v8217_v33 = vpop.permute.xlu0 %4683  ;;  %v9063_v53 = vld [vmem:[#allocation19_spill] sm:$0xff] }
 0x2ee   :  { %5096 = vpow2.f32 %v3188_v51  ;;  %v5085_v14 = vpop.eup %5084  ;;  %v3586_v29 = vmul.f32 0.6931472, %v5083_v44  ;;  %v3589_v5 = vmul.f32 %v8026_v39, %v3588_v8  ;;  %vm3591_vm12 = vcmp.lt.f32.partialorder %v3590_v13, 0.0004427343 }
 0x2ef   :  { %v3015_v34 = vand.u32 2147483647, %v8159_v30  ;;  %v5087_v19 = vpop.eup %5086  ;;  %v3598_v43 = vmul.f32 %v8101_v2, %v3597_v62  ;;  %v4115_v36 = vmul.f32 -1.442695, %v8162_v7  ;;  %2755 = vst.msk [vmem:[%s8869_s4 + $0x158] sm:$0xff] %vm2711_vm6, %v2690_v32  ;;  %5098 = vlog2.f32 %v3602_v42 }
 0x2f0   :  { %v3611_v51 = vadd.f32 1.0, %v8173_v49  ;;  %v3592_v15 = vsel %vm3591_vm12, %v3589_v5, %v3586_v29  ;;  %v3595_v44 = vmul.f32 0.6931472, %v5087_v19  ;;  %vm3600_vm13 = vcmp.lt.f32.partialorder %v3599_v24, 0.0004427343 }
 0x2f1   :  { %v9062_v39 = vmax.f32 %v7917_v17, 0.0  ;;  %v2181_v13 = vadd.f32 1.0, %v5085_v14  ;;  %v3840_v2 = vadd.f32 %v3592_v15, %v2944_v45  ;;  %v3605_v62 = vmul.f32 -0.5, %v8129_v40 }
 0x2f2   :  { %5100 = vlog2.f32 %v3611_v51  ;;  %v5089_v11 = vpop.eup %5088  ;;  %v3601_v32 = vsel %vm3600_vm13, %v3598_v43, %v3595_v44  ;;  %v3079_v42 = vsub.f32 0.0, %v3015_v34  ;;  %v4405_v29 = vadd.f32 %v8069_v12, %v9063_v53 }
 0x2f3   :  { %v8214_v8 = vsub.f32 %v9062_v39, %v8047_v4  ;;  %v4407_v24 = vadd.f32 %v8069_v12, %v7560_v57  ;;  %v3841_v5 = vadd.f32 %v3601_v32, %v2945_v22  ;;  %v3904_v17 = vmul.f32 %v4675_v63, %v3840_v2 }
 0x2f4   :  { %5102 = vpow2.f32 %v4115_v36  ;;  %v3016_v4 = vand.u32 2147483647, %v8162_v7  ;;  %v8226_v45 = vpop.eup %5090  ;;  %v3614_v14 = vmul.f32 -0.5, %v8173_v49  ;;  %v8230_v19 = vadd.f32 %v4405_v29, %v7540_v46 }
 0x2f5   :  { %v8233_v34 = vadd.f32 %v4407_v24, %v7576_v55  ;;  %v4685_v53 = vunpack.i.l.bf16 %v8217_v33  ;;  %v5093_v57 = vpop.eup %5092  ;;  %v9064_v22 = vunpack.i.h.bf16 %v8058_v38  ;;  %3968 = vst.msk [vmem:[%s8870_s5 + $0x140] sm:$0xff] %vm2711_vm6, %v3904_v17  ;;  %v9065_v63 = vmax.f32 %v7999_v48, 0.0 }
 0x2f6   :  { %v3606_v46 = vadd.f32 1.0, %v3605_v62  ;;  %v4686_v51 = vunpack.i.h.bf16 %v8217_v33  ;;  %5104 = vrcp.f32 %v2181_v13  ;;  %v3190_v15 = vmul.f32 1.442695, %v3079_v42 }
 0x2f7   :  { %v3905_v43 = vmul.f32 %v9064_v22, %v3841_v5  ;;  %v2947_v36 = vsub.f32 %v9065_v63, %v8121_v18  ;;  %v5095_v55 = vpop.eup %5094  ;;  %v3608_v44 = vand.u32 2147483647, %v8129_v40  ;;  %v4116_v38 = vmul.f32 -1.442695, %v8230_v19 }
 0x2f8   :  { %v8248_v39 = vpop.eup %5096  ;;  %v2182_v2 = vadd.f32 1.0, %v5095_v55  ;;  %v3080_v48 = vsub.f32 0.0, %v3016_v4  ;;  %v3617_v18 = vand.u32 2147483647, %v8173_v49  ;;  %v4117_v62 = vmul.f32 -1.442695, %v8233_v34 }
 0x2f9   :  { %3969 = vst.msk [vmem:[%s8870_s5 + $0x148] sm:$0xff] %vm2711_vm6, %v3905_v43  ;;  %v3615_v32 = vadd.f32 1.0, %v3614_v14  ;;  %5106 = vpow2.f32 %v4116_v38  ;;  %v3018_v13 = vand.u32 2147483647, %v8233_v34  ;;  %v2691_v42 = vmul.f32 %v5089_v11, %v4685_v53  ;;  %v5099_v29 = vpop.eup %5098 }
 0x2fa   :  { %5108 = vrcp.f32 %v2182_v2  ;;  %v3017_v24 = vand.u32 2147483647, %v8230_v19  ;;  %v2692_v5 = vmul.f32 %v5093_v57, %v4686_v51  ;;  %v3620_v17 = vadd.f32 1.0, %v8183_v56 }
 0x2fb   :  { %v3604_v4 = vmul.f32 0.6931472, %v5099_v29  ;;  %v3607_v22 = vmul.f32 %v8129_v40, %v3606_v46  ;;  %5110 = vpow2.f32 %v4117_v62  ;;  %v3082_v14 = vsub.f32 0.0, %v3018_v13  ;;  %2756 = vst.msk [vmem:[%s8869_s4 + $0x160] sm:$0xff] %vm2711_vm6, %v2691_v42  ;;  %v8283_v29 = vpop.permute.xlu1 %4688 }
 0x2fc   :  { %v5101_v11 = vpop.eup %5100  ;;  %v2823_v43 = vmax.f32 %v8159_v30, 0.0  ;;  %5112 = vpow2.f32 %v3190_v15  ;;  %vm3609_vm14 = vcmp.lt.f32.partialorder %v3608_v44, 0.0004427343  ;;  %2757 = vst.msk [vmem:[%s8869_s4 + $0x168] sm:$0xff] %vm2711_vm6, %v2692_v5  ;;  %v3629_v57 = vadd.f32 1.0, %v8226_v45  ;;  %v5293_v15 = vld [vmem:[%s8868_s3 + $0x178] sm:$0xff] }
 0x2fd   :  { %v3192_v40 = vmul.f32 1.442695, %v3080_v48  ;;  %v3610_v63 = vsel %vm3609_vm14, %v3607_v22, %v3604_v4  ;;  %v3613_v46 = vmul.f32 0.6931472, %v5101_v11  ;;  %v3616_v55 = vmul.f32 %v8173_v49, %v3615_v32 }
 0x2fe   :  { %v5103_v38 = vpop.eup %5102  ;;  %vm3618_vm15 = vcmp.lt.f32.partialorder %v3617_v18, 0.0004427343  ;;  %v3842_v2 = vadd.f32 %v3610_v63, %v8214_v8  ;;  %v3081_v62 = vsub.f32 0.0, %v3017_v24  ;;  %5114 = vlog2.f32 %v3620_v17 }
 0x2ff   :  { %v8280_v44 = vmul.f32 %v5293_v15, %v8159_v30  ;;  %v2824_v13 = vmax.f32 %v8162_v7, 0.0  ;;  %v3619_v48 = vsel %vm3618_vm15, %v3616_v55, %v3613_v46  ;;  %v3196_v42 = vmul.f32 1.442695, %v3082_v14 }
 0x300   :  { %v3843_v49 = vadd.f32 %v3619_v48, %v2947_v36  ;;  %v3906_v18 = vmul.f32 %v4680_v23, %v3842_v2  ;;  %v3623_v8 = vmul.f32 -0.5, %v8183_v56  ;;  %5116 = vlog2.f32 %v3629_v57  ;;  %v5105_v32 = vpop.eup %5104 }
 0x301   :  { %v2183_v24 = vadd.f32 1.0, %v5103_v38  ;;  %5118 = vpow2.f32 %v3192_v40  ;;  %v4409_v5 = vadd.f32 %v8069_v12, %v7590_v54  ;;  %v4411_v17 = vadd.f32 %v8069_v12, %v7614_v60 }
 0x302   :  { %v9066_v4 = vunpack.i.h.bf16 %v8132_v28  ;;  %3970 = vst.msk [vmem:[%s8870_s5 + $0x150] sm:$0xff] %vm2711_vm6, %v3906_v18  ;;  %v3194_v23 = vmul.f32 1.442695, %v3081_v62  ;;  %v9067_v36 = vmax.f32 %v8006_v37, 0.0  ;;  %v4690_v11 = vunpack.i.l.bf16 %v8283_v29 }
 0x303   :  { %v5107_v57 = vpop.eup %5106  ;;  %5120 = vpow2.f32 %v3196_v42  ;;  %v3632_v54 = vmul.f32 -0.5, %v8226_v45  ;;  %v8304_v60 = vadd.f32 %v4409_v5, %v7594_v27  ;;  %v8307_v28 = vadd.f32 %v4411_v17, %v7619_v35 }
 0x304   :  { %v3907_v22 = vmul.f32 %v9066_v4, %v3843_v49  ;;  %v2948_v14 = vsub.f32 %v9067_v36, %v8138_v10  ;;  %v5109_v40 = vpop.eup %5108  ;;  %v2184_v37 = vadd.f32 1.0, %v5107_v57  ;;  %v3624_v10 = vadd.f32 1.0, %v3623_v8 }
 0x305   :  { %v4691_v63 = vunpack.i.h.bf16 %v8283_v29  ;;  %v2693_v46 = vmul.f32 %v5105_v32, %v4690_v11  ;;  %v5111_v55 = vpop.eup %5110  ;;  %5122 = vrcp.f32 %v2183_v24  ;;  %v3626_v27 = vand.u32 2147483647, %v8183_v56 }
 0x306   :  { %3971 = vst.msk [vmem:[%s8870_s5 + $0x158] sm:$0xff] %vm2711_vm6, %v3907_v22  ;;  %v4118_v35 = vmul.f32 -1.442695, %v8304_v60  ;;  %v3019_v38 = vand.u32 2147483647, %v8304_v60  ;;  %v8319_v2 = vpop.eup %5112  ;;  %5124 = vrcp.f32 %v2184_v37  ;;  %v2185_v62 = vadd.f32 1.0, %v5111_v55 }
 0x307   :  { %v4119_v15 = vmul.f32 -1.442695, %v8307_v28  ;;  %2758 = vst.msk [vmem:[%s8869_s4 + $0x170] sm:$0xff] %vm2711_vm6, %v2693_v46  ;;  %v3638_v48 = vadd.f32 1.0, %v8248_v39  ;;  %v3633_v42 = vadd.f32 1.0, %v3632_v54  ;;  %v3625_v32 = vmul.f32 %v8183_v56, %v3624_v10 }
 0x308   :  { %5126 = vpow2.f32 %v4118_v35  ;;  %v3083_v49 = vsub.f32 0.0, %v3019_v38  ;;  %v3020_v18 = vand.u32 2147483647, %v8307_v28  ;;  %v5115_v8 = vpop.eup %5114  ;;  %v3635_v24 = vand.u32 2147483647, %v8226_v45 }
 0x309   :  { %5128 = vrcp.f32 %v2185_v62  ;;  %v2694_v5 = vmul.f32 %v5109_v40, %v4691_v63  ;;  %v3622_v17 = vmul.f32 0.6931472, %v5115_v8  ;;  %vm3627_vm0 = vcmp.lt.f32.partialorder %v3626_v27, 0.0004427343 }
 0x30a   :  { %v3198_v4 = vmul.f32 1.442695, %v3083_v49  ;;  %5130 = vpow2.f32 %v4119_v15  ;;  %v3084_v22 = vsub.f32 0.0, %v3020_v18  ;;  %v5117_v36 = vpop.eup %5116  ;;  %v3641_v57 = vmul.f32 -0.5, %v8248_v39 }
 0x30b   :  { %2759 = vst.msk [vmem:[%s8869_s4 + $0x178] sm:$0xff] %vm2711_vm6, %v2694_v5  ;;  %5132 = vlog2.f32 %v3638_v48  ;;  %v3647_v56 = vadd.f32 1.0, %v8319_v2  ;;  %v8338_v54 = vpop.eup %5118  ;;  %v3628_v37 = vsel %vm3627_vm0, %v3625_v32, %v3622_v17  ;;  %v3631_v40 = vmul.f32 0.6931472, %v5117_v36 }
 0x30c   :  { %v3634_v10 = vmul.f32 %v8226_v45, %v3633_v42  ;;  %5134 = vpow2.f32 %v3198_v4  ;;  %v9068_v46 = vmax.f32 %v8081_v3, 0.0  ;;  %vm3636_vm1 = vcmp.lt.f32.partialorder %v3635_v24, 0.0004427343  ;;  %v8351_v3 = vpop.permute.xlu1 %4698 }
 0x30d   :  { %v3844_v27 = vadd.f32 %v3628_v37, %v2948_v14  ;;  %5136 = vlog2.f32 %v3647_v56  ;;  %v8344_v35 = vpop.eup %5120  ;;  %v3200_v62 = vmul.f32 1.442695, %v3084_v22  ;;  %v4413_v15 = vadd.f32 %v8069_v12, %v7646_v25 }
 0x30e   :  { %v2949_v55 = vsub.f32 %v9068_v46, %v8190_v1  ;;  %5138 = vpow2.f32 %v3194_v23  ;;  %v3637_v38 = vsel %vm3636_vm1, %v3634_v10, %v3631_v40  ;;  %v3642_v42 = vadd.f32 1.0, %v3641_v57  ;;  %v5294_v23 = vld [vmem:[%s8868_s3 + $0x190] sm:$0xff] }
 0x30f   :  { %v3908_v45 = vmul.f32 %v4685_v53, %v3844_v27  ;;  %v3650_v49 = vmul.f32 -0.5, %v8319_v2  ;;  %v5123_v1 = vpop.eup %5122  ;;  %v2826_v14 = vmax.f32 %v8233_v34, 0.0  ;;  %v8358_v18 = vmul.f32 %v5294_v23, %v8233_v34 }
 0x310   :  { %v3845_v48 = vadd.f32 %v3637_v38, %v2949_v55  ;;  %v8361_v25 = vadd.f32 %v4413_v15, %v7654_v47  ;;  %v4700_v53 = vunpack.i.l.bf16 %v8351_v3  ;;  %v5125_v8 = vpop.eup %5124  ;;  %v9069_v24 = vmax.f32 %v8088_v9, 0.0 }
 0x311   :  { %3972 = vst.msk [vmem:[%s8870_s5 + $0x160] sm:$0xff] %vm2711_vm6, %v3908_v45  ;;  %v2951_v47 = vsub.f32 %v2823_v43, %v8280_v44  ;;  %v3674_v17 = vadd.f32 1.0, %v8344_v35  ;;  %5140 = vpow2.f32 %v3200_v62  ;;  %v3644_v33 = vand.u32 2147483647, %v8248_v39  ;;  %v8385_v43 = vpop.permute.xlu0 %4693 }
 0x312   :  { %v3909_v32 = vmul.f32 %v4686_v51, %v3845_v48  ;;  %v2950_v5 = vsub.f32 %v9069_v24, %v8198_v31  ;;  %v5127_v4 = vpop.eup %5126  ;;  %v4120_v51 = vmul.f32 -1.442695, %v8361_v25  ;;  %v3021_v22 = vand.u32 2147483647, %v8361_v25 }
 0x313   :  { %v5129_v36 = vpop.eup %5128  ;;  %v2186_v9 = vadd.f32 1.0, %v5127_v4  ;;  %v3643_v30 = vmul.f32 %v8248_v39, %v3642_v42  ;;  %v3651_v31 = vadd.f32 1.0, %v3650_v49  ;;  %5142 = vlog2.f32 %v3674_v17  ;;  %v5295_v17 = vld [vmem:[%s8868_s3 + $0x180] sm:$0xff] }
 0x314   :  { %3973 = vst.msk [vmem:[%s8870_s5 + $0x168] sm:$0xff] %vm2711_vm6, %v3909_v32  ;;  %v5131_v44 = vpop.eup %5130  ;;  %5144 = vpow2.f32 %v4120_v51  ;;  %v3085_v57 = vsub.f32 0.0, %v3021_v22  ;;  %v2697_v56 = vmul.f32 %v5129_v36, %v4700_v53  ;;  %v4696_v37 = vunpack.i.h.bf16 %v8385_v43 }
 0x315   :  { %v5133_v40 = vpop.eup %5132  ;;  %5146 = vrcp.f32 %v2186_v9  ;;  %v2187_v10 = vadd.f32 1.0, %v5131_v44  ;;  %v3653_v46 = vand.u32 2147483647, %v8319_v2  ;;  %v3677_v55 = vmul.f32 -0.5, %v8344_v35 }
 0x316   :  { %v8392_v39 = vpop.eup %5134  ;;  %v3640_v27 = vmul.f32 0.6931472, %v5133_v40  ;;  %v3202_v38 = vmul.f32 1.442695, %v3085_v57  ;;  %2762 = vst.msk [vmem:[%s8869_s4 + $0x190] sm:$0xff] %vm2711_vm6, %v2697_v56  ;;  %v4695_v62 = vunpack.i.l.bf16 %v8385_v43  ;;  %v2696_v15 = vmul.f32 %v5125_v8, %v4696_v37 }
 0x317   :  { %v5137_v48 = vpop.eup %5136  ;;  %5148 = vrcp.f32 %v2187_v10  ;;  %vm3645_vm2 = vcmp.lt.f32.partialorder %v3644_v33, 0.0004427343  ;;  %v4415_v45 = vadd.f32 %v8069_v12, %v7669_v6  ;;  %v3683_v42 = vadd.f32 1.0, %v8392_v39 }
 0x318   :  { %v8404_v49 = vpop.eup %5138  ;;  %v3646_v23 = vsel %vm3645_vm2, %v3643_v30, %v3640_v27  ;;  %v3649_v32 = vmul.f32 0.6931472, %v5137_v48  ;;  %v3652_v24 = vmul.f32 %v8319_v2, %v3651_v31  ;;  %5150 = vpow2.f32 %v3202_v38  ;;  %2761 = vst.msk [vmem:[%s8869_s4 + $0x188] sm:$0xff] %vm2711_vm6, %v2696_v15  ;;  %v5297_v48 = vld [vmem:[%s8868_s3 + $0x188] sm:$0xff] }
 0x319   :  { %vm3654_vm3 = vcmp.lt.f32.partialorder %v3653_v46, 0.0004427343  ;;  %v3846_v8 = vadd.f32 %v3646_v23, %v2950_v5  ;;  %5152 = vlog2.f32 %v3683_v42  ;;  %v2695_v6 = vmul.f32 %v5123_v1, %v4695_v62 }
 0x31a   :  { %v2888_v4 = vmul.f32 %v5295_v17, %v8162_v7  ;;  %v3655_v33 = vsel %vm3654_vm3, %v3652_v24, %v3649_v32  ;;  %v3678_v2 = vadd.f32 1.0, %v3677_v55  ;;  %v3680_v51 = vand.u32 2147483647, %v8344_v35 }
 0x31b   :  { %v3847_v22 = vadd.f32 %v3655_v33, %v2951_v47  ;;  %v3910_v36 = vmul.f32 %v4690_v11, %v3846_v8  ;;  %v3686_v5 = vmul.f32 -0.5, %v8392_v39  ;;  %2760 = vst.msk [vmem:[%s8869_s4 + $0x180] sm:$0xff] %vm2711_vm6, %v2695_v6  ;;  %v3656_v1 = vadd.f32 1.0, %v8338_v54  ;;  %v8426_v9 = vpop.eup %5140  ;;  %v5296_v47 = vld [vmem:[%s8868_s3 + $0x198] sm:$0xff] }
 0x31c   :  { %v2827_v30 = vmax.f32 %v8304_v60, 0.0  ;;  %v2891_v31 = vmul.f32 %v5296_v47, %v8304_v60  ;;  %v4701_v11 = vunpack.i.h.bf16 %v8351_v3  ;;  %v3665_v44 = vadd.f32 1.0, %v8404_v49 }
 0x31d   :  { %v5143_v57 = vpop.eup %5142  ;;  %v3911_v56 = vmul.f32 %v4691_v63, %v3847_v22  ;;  %3974 = vst.msk [vmem:[%s8870_s5 + $0x170] sm:$0xff] %vm2711_vm6, %v3910_v36  ;;  %v2954_v40 = vsub.f32 %v2826_v14, %v8358_v18  ;;  %5154 = vlog2.f32 %v3656_v1  ;;  %v8445_v60 = vadd.f32 %v4415_v45, %v7741_v16  ;;  %v8479_v22 = vpop.permute.xlu0 %4703 }
 0x31e   :  { %v5145_v10 = vpop.eup %5144  ;;  %v3676_v46 = vmul.f32 0.6931472, %v5143_v57  ;;  %v3679_v55 = vmul.f32 %v8344_v35, %v3678_v2  ;;  %v3689_v29 = vand.u32 2147483647, %v8392_v39  ;;  %5156 = vlog2.f32 %v3665_v44 }
 0x31f   :  { %v5147_v63 = vpop.eup %5146  ;;  %3975 = vst.msk [vmem:[%s8870_s5 + $0x178] sm:$0xff] %vm2711_vm6, %v3911_v56  ;;  %v2188_v27 = vadd.f32 1.0, %v5145_v10  ;;  %vm3681_vm4 = vcmp.lt.f32.partialorder %v3680_v51, 0.0004427343  ;;  %v3687_v34 = vadd.f32 1.0, %v3686_v5  ;;  %v2825_v16 = vmax.f32 %v8230_v19, 0.0 }
 0x320   :  { %v4121_v14 = vmul.f32 -1.442695, %v8445_v60  ;;  %v2698_v18 = vmul.f32 %v5147_v63, %v4701_v11  ;;  %v3682_v35 = vsel %vm3681_vm4, %v3679_v55, %v3676_v46  ;;  %v3659_v38 = vmul.f32 -0.5, %v8338_v54 }
 0x321   :  { %v5149_v15 = vpop.eup %5148  ;;  %v2889_v45 = vmul.f32 %v5297_v48, %v8230_v19  ;;  %5158 = vrcp.f32 %v2188_v27  ;;  %v3850_v42 = vadd.f32 %v3682_v35, %v2954_v40  ;;  %v3668_v23 = vmul.f32 -0.5, %v8404_v49 }
 0x322   :  { %v8463_v32 = vpop.eup %5150  ;;  %2763 = vst.msk [vmem:[%s8869_s4 + $0x198] sm:$0xff] %vm2711_vm6, %v2698_v18  ;;  %v2955_v24 = vsub.f32 %v2827_v30, %v2891_v31  ;;  %vm8469_vm5 = vcmp.lt.f32.partialorder %v3689_v29, 0.0004427343  ;;  %5160 = vpow2.f32 %v4121_v14  ;;  %v3022_v6 = vand.u32 2147483647, %v8445_v60 }
 0x323   :  { %v5153_v19 = vpop.eup %5152  ;;  %v3688_v17 = vmul.f32 %v8392_v39, %v3687_v34  ;;  %v3914_v33 = vmul.f32 %v4700_v53, %v3850_v42  ;;  %v3662_v2 = vand.u32 2147483647, %v8338_v54  ;;  %v3671_v51 = vand.u32 2147483647, %v8404_v49 }
 0x324   :  { %v3685_v36 = vmul.f32 0.6931472, %v5153_v19  ;;  %v3660_v5 = vadd.f32 1.0, %v3659_v38  ;;  %v3086_v1 = vsub.f32 0.0, %v3022_v6  ;;  %v4705_v30 = vunpack.i.l.bf16 %v8479_v22 }
 0x325   :  { %3978 = vst.msk [vmem:[%s8870_s5 + $0x190] sm:$0xff] %vm2711_vm6, %v3914_v33  ;;  %v2952_v39 = vsub.f32 %v2824_v13, %v2888_v4  ;;  %v3669_v53 = vadd.f32 1.0, %v3668_v23  ;;  %v4417_v47 = vadd.f32 %v8069_v12, %v7754_v50  ;;  %v3692_v31 = vadd.f32 1.0, %v8426_v9  ;;  %v5298_v23 = vld [vmem:[%s8868_s3 + $0x1a0] sm:$0xff] }
 0x326   :  { %v3691_v44 = vsel %vm8469_vm5, %v3688_v17, %v3685_v36  ;;  %v3204_v57 = vmul.f32 1.442695, %v3086_v1  ;;  %v2699_v56 = vmul.f32 %v5149_v15, %v4705_v30  ;;  %v3701_v40 = vadd.f32 1.0, %v8463_v32 }
 0x327   :  { %v5155_v10 = vpop.eup %5154  ;;  %v3851_v46 = vadd.f32 %v3691_v44, %v2955_v24  ;;  %v2953_v55 = vsub.f32 %v2825_v16, %v2889_v45  ;;  %vm8496_vm7 = vcmp.lt.f32.partialorder %v3662_v2, 0.0004427343  ;;  %5162 = vlog2.f32 %v3692_v31 }
 0x328   :  { %v5157_v50 = vpop.eup %5156  ;;  %v3658_v13 = vmul.f32 0.6931472, %v5155_v10  ;;  %v3661_v4 = vmul.f32 %v8338_v54, %v3660_v5  ;;  %vm8501_vm8 = vcmp.lt.f32.partialorder %v3671_v51, 0.0004427343  ;;  %5164 = vpow2.f32 %v3204_v57  ;;  %2764 = vst.msk [vmem:[%s8869_s4 + $0x1a0] sm:$0xff] %vm2711_vm6, %v2699_v56  ;;  %v5299_v51 = vld [vmem:[%s8868_s3 + $0x1a8] sm:$0xff] }
 0x329   :  { %v3915_v63 = vmul.f32 %v4701_v11, %v3851_v46  ;;  %v3667_v27 = vmul.f32 0.6931472, %v5157_v50  ;;  %v3670_v34 = vmul.f32 %v8404_v49, %v3669_v53  ;;  %5166 = vlog2.f32 %v3701_v40 }
 0x32a   :  { %v3664_v54 = vsel %vm8496_vm7, %v3661_v4, %v3658_v13  ;;  %v4706_v14 = vunpack.i.h.bf16 %v8479_v22  ;;  %v3695_v16 = vmul.f32 -0.5, %v8426_v9  ;;  %v8517_v18 = vadd.f32 %v4417_v47, %v7784_v58  ;;  %v8580_v4 = vpop.permute.xlu1 %4708 }
 0x32b   :  { %v5159_v35 = vpop.eup %5158  ;;  %v2828_v38 = vmax.f32 %v8307_v28, 0.0  ;;  %3979 = vst.msk [vmem:[%s8870_s5 + $0x198] sm:$0xff] %vm2711_vm6, %v3915_v63  ;;  %v3673_v3 = vsel %vm8501_vm8, %v3670_v34, %v3667_v27  ;;  %v3848_v49 = vadd.f32 %v3664_v54, %v2952_v39  ;;  %v3704_v11 = vmul.f32 -0.5, %v8463_v32  ;;  %v9078_v63 = vld [vmem:[#allocation20_spill] sm:$0xff] }
 0x32c   :  { %v5161_v15 = vpop.eup %5160  ;;  %v3849_v48 = vadd.f32 %v3673_v3, %v2953_v55  ;;  %v2700_v58 = vmul.f32 %v5159_v35, %v4706_v14  ;;  %v4122_v45 = vmul.f32 -1.442695, %v8517_v18  ;;  %v4419_v42 = vadd.f32 %v8069_v12, %v7802_v0  ;;  %v9079_v35 = vld [vmem:[#allocation21_spill] sm:$0xff]  ;;  %v9080_v3 = vld [vmem:[#allocation22_spill] sm:$0xff] }
 0x32d   :  { %v2892_v24 = vmul.f32 %v5298_v23, %v8307_v28  ;;  %v3912_v8 = vmul.f32 %v4695_v62, %v3848_v49  ;;  %v2189_v6 = vadd.f32 1.0, %v5161_v15  ;;  %v3698_v19 = vand.u32 2147483647, %v8426_v9 }
 0x32e   :  { %v3913_v17 = vmul.f32 %v4696_v37, %v3849_v48  ;;  %2765 = vst.msk [vmem:[%s8869_s4 + $0x1a8] sm:$0xff] %vm2711_vm6, %v2700_v58  ;;  %v3696_v0 = vadd.f32 1.0, %v3695_v16  ;;  %5168 = vpow2.f32 %v4122_v45  ;;  %v3023_v33 = vand.u32 2147483647, %v8517_v18 }
 0x32f   :  { %3976 = vst.msk [vmem:[%s8870_s5 + $0x180] sm:$0xff] %vm2711_vm6, %v3912_v8  ;;  %5170 = vrcp.f32 %v2189_v6  ;;  %v3705_v28 = vadd.f32 1.0, %v3704_v11  ;;  %v2829_v62 = vmax.f32 %v8361_v25, 0.0  ;;  %v8556_v37 = vadd.f32 %v4419_v42, %v7810_v21 }
 0x330   :  { %3977 = vst.msk [vmem:[%s8870_s5 + $0x188] sm:$0xff] %vm2711_vm6, %v3913_v17  ;;  %v3087_v43 = vsub.f32 0.0, %v3023_v33  ;;  %v2893_v36 = vmul.f32 %v5299_v51, %v8361_v25  ;;  %v2956_v5 = vsub.f32 %v2828_v38, %v2892_v24  ;;  %vm8562_vm9 = vcmp.lt.f32.partialorder %v3698_v19, 0.0004427343  ;;  %v9081_v19 = vld [vmem:[#allocation8_spill] sm:$0xff] }
 0x331   :  { %v5163_v2 = vpop.eup %5162  ;;  %v3707_v39 = vand.u32 2147483647, %v8463_v32  ;;  %v3697_v21 = vmul.f32 %v8426_v9, %v3696_v0  ;;  %v4123_v44 = vmul.f32 -1.442695, %v8556_v37  ;;  %v3706_v25 = vmul.f32 %v8463_v32, %v3705_v28 }
 0x332   :  { %v8567_v53 = vpop.eup %5164  ;;  %v3694_v47 = vmul.f32 0.6931472, %v5163_v2  ;;  %v3206_v31 = vmul.f32 1.442695, %v3087_v43  ;;  %v4421_v40 = vadd.f32 %v8069_v12, %v7831_v20  ;;  %v4423_v10 = vadd.f32 %v8069_v12, %v7855_v61  ;;  %v8636_v2 = vpop.permute.xlu1 %4718 }
 0x333   :  { %v5167_v57 = vpop.eup %5166  ;;  %v3710_v56 = vadd.f32 1.0, %v8567_v53  ;;  %v3024_v9 = vand.u32 2147483647, %v8556_v37  ;;  %v2957_v7 = vsub.f32 %v2829_v62, %v2893_v36  ;;  %vm3708_vm10 = vcmp.lt.f32.partialorder %v3707_v39, 0.0004427343  ;;  %v5301_v62 = vld [vmem:[%s8868_s3 + $0x1b8] sm:$0xff] }
 0x334   :  { %v3700_v46 = vsel %vm8562_vm9, %v3697_v21, %v3694_v47  ;;  %v3703_v55 = vmul.f32 0.6931472, %v5167_v57  ;;  %5172 = vpow2.f32 %v3206_v31  ;;  %v3713_v20 = vmul.f32 -0.5, %v8567_v53 }
 0x335   :  { %5174 = vlog2.f32 %v3710_v56  ;;  %v3852_v50 = vadd.f32 %v3700_v46, %v2956_v5  ;;  %v3088_v32 = vsub.f32 0.0, %v3024_v9  ;;  %v8586_v27 = vadd.f32 %v4421_v40, %v9078_v63  ;;  %v8643_v56 = vpop.permute.xlu0 %4713 }
 0x336   :  { %v3709_v13 = vsel %vm3708_vm10, %v3706_v25, %v3703_v55  ;;  %5176 = vpow2.f32 %v4123_v44  ;;  %v4710_v54 = vunpack.i.l.bf16 %v8580_v4  ;;  %v8590_v38 = vadd.f32 %v4423_v10, %v9079_v35  ;;  %v9082_v35 = vld [vmem:[#allocation9_spill] sm:$0xff] }
 0x337   :  { %v3853_v29 = vadd.f32 %v3709_v13, %v2957_v7  ;;  %v3916_v61 = vmul.f32 %v4705_v30, %v3852_v50  ;;  %v3208_v16 = vmul.f32 1.442695, %v3088_v32  ;;  %v4425_v49 = vadd.f32 %v8069_v12, %v9080_v3  ;;  %v5302_v13 = vld [vmem:[%s8868_s3 + $0x1c0] sm:$0xff] }
 0x338   :  { %v5169_v34 = vpop.eup %5168  ;;  %v4124_v48 = vmul.f32 -1.442695, %v8586_v27  ;;  %v4427_v58 = vadd.f32 %v8069_v12, %v7920_v59  ;;  %v2830_v45 = vmax.f32 %v8445_v60, 0.0  ;;  %v3025_v22 = vand.u32 2147483647, %v8586_v27 }
 0x339   :  { %v5171_v11 = vpop.eup %5170  ;;  %v3917_v15 = vmul.f32 %v4706_v14, %v3853_v29  ;;  %3980 = vst.msk [vmem:[%s8870_s5 + $0x1a0] sm:$0xff] %vm2711_vm6, %v3916_v61  ;;  %v2190_v30 = vadd.f32 1.0, %v5169_v34  ;;  %5178 = vpow2.f32 %v3208_v16  ;;  %v5300_v14 = vld [vmem:[%s8868_s3 + $0x1b0] sm:$0xff]  ;;  %v3714_v24 = vadd.f32 1.0, %v3713_v20  ;;  %v8660_v34 = vld [vmem:[#allocation4] ss:$0 sm:$0xff] }
 0x33a   :  { %v2701_v42 = vmul.f32 %v5171_v11, %v4710_v54  ;;  %v2894_v23 = vmul.f32 %v5300_v14, %v8445_v60  ;;  %v4125_v59 = vmul.f32 -1.442695, %v8590_v38  ;;  %v4711_v12 = vunpack.i.h.bf16 %v8580_v4 }
 0x33b   :  { %3981 = vst.msk [vmem:[%s8870_s5 + $0x1a8] sm:$0xff] %vm2711_vm6, %v3917_v15  ;;  %5180 = vrcp.f32 %v2190_v30  ;;  %v3089_v8 = vsub.f32 0.0, %v3025_v22  ;;  %v3026_v60 = vand.u32 2147483647, %v8590_v38  ;;  %v3716_v6 = vand.u32 2147483647, %v8567_v53 }
 0x33c   :  { %2766 = vst.msk [vmem:[%s8869_s4 + $0x1b0] sm:$0xff] %vm2711_vm6, %v2701_v42  ;;  %5182 = vpow2.f32 %v4124_v48  ;;  %v8624_v17 = vadd.f32 %v4425_v49, %v9081_v19  ;;  %v8627_v0 = vadd.f32 %v4427_v58, %v7926_v52  ;;  %v2831_v28 = vmax.f32 %v8517_v18, 0.0  ;;  %v8674_v58 = vpop.permute.xlu0 %4723 }
 0x33d   :  { %5184 = vpow2.f32 %v4125_v59  ;;  %v2895_v43 = vmul.f32 %v5301_v62, %v8517_v18  ;;  %v3210_v51 = vmul.f32 1.442695, %v3089_v8  ;;  %v3090_v36 = vsub.f32 0.0, %v3026_v60  ;;  %v9084_v59 = vld [vmem:[#allocation10_spill] sm:$0xff] }
 0x33e   :  { %v8629_v33 = vpop.eup %5172  ;;  %v2958_v1 = vsub.f32 %v2830_v45, %v2894_v23  ;;  %v3715_v39 = vmul.f32 %v8567_v53, %v3714_v24  ;;  %v4721_v47 = vunpack.i.h.bf16 %v8636_v2  ;;  %v4126_v57 = vmul.f32 -1.442695, %v8624_v17  ;;  %v9083_v23 = vld [vmem:[#allocation13_spill] sm:$0xff] }
 0x33f   :  { %v5175_v5 = vpop.eup %5174  ;;  %v3719_v52 = vadd.f32 1.0, %v8629_v33  ;;  %5186 = vpow2.f32 %v3210_v51  ;;  %v3212_v44 = vmul.f32 1.442695, %v3090_v36  ;;  %vm3717_vm11 = vcmp.lt.f32.partialorder %v3716_v6, 0.0004427343  ;;  %v5304_v36 = vld [vmem:[%s8868_s3 + $0x1c8] sm:$0xff] }
 0x340   :  { %v5177_v21 = vpop.eup %5176  ;;  %v3712_v31 = vmul.f32 0.6931472, %v5175_v5  ;;  %v4720_v18 = vunpack.i.l.bf16 %v8636_v2  ;;  %v8645_v10 = vsub.f32 %v2831_v28, %v2895_v43  ;;  %v3027_v53 = vand.u32 2147483647, %v8624_v17 }
 0x341   :  { %5188 = vlog2.f32 %v3719_v52  ;;  %v2191_v25 = vadd.f32 1.0, %v5177_v21  ;;  %v3722_v55 = vmul.f32 -0.5, %v8629_v33  ;;  %v4127_v9 = vmul.f32 -1.442695, %v8627_v0 }
 0x342   :  { %v3718_v40 = vsel %vm3717_vm11, %v3715_v39, %v3712_v31  ;;  %5190 = vpow2.f32 %v3212_v44  ;;  %v4716_v50 = vunpack.i.h.bf16 %v8643_v56  ;;  %v2896_v32 = vmul.f32 %v5302_v13, %v8556_v37 }
 0x343   :  { %v3854_v46 = vadd.f32 %v3718_v40, %v2958_v1  ;;  %5192 = vrcp.f32 %v2191_v25  ;;  %v8650_v7 = vpop.eup %5178  ;;  %v3091_v20 = vsub.f32 0.0, %v3027_v53  ;;  %v4429_v16 = vadd.f32 %v8660_v34, %v7966_v41 }
 0x344   :  { %5194 = vpow2.f32 %v4126_v57  ;;  %v3728_v63 = vadd.f32 1.0, %v8650_v7  ;;  %v4431_v3 = vadd.f32 %v8660_v34, %v9082_v35  ;;  %v2832_v15 = vmax.f32 %v8556_v37, 0.0 }
 0x345   :  { %v5181_v29 = vpop.eup %5180  ;;  %v3918_v61 = vmul.f32 %v4710_v54, %v3854_v46  ;;  %v3214_v30 = vmul.f32 1.442695, %v3091_v20  ;;  %5196 = vpow2.f32 %v4127_v9  ;;  %v3723_v54 = vadd.f32 1.0, %v3722_v55  ;;  %v5305_v55 = vld [vmem:[%s8868_s3 + $0x1d0] sm:$0xff] }
 0x346   :  { %v5183_v49 = vpop.eup %5182  ;;  %v2702_v11 = vmul.f32 %v5181_v29, %v4711_v12  ;;  %v4715_v41 = vunpack.i.l.bf16 %v8643_v56  ;;  %5198 = vlog2.f32 %v3728_v63  ;;  %v3731_v37 = vmul.f32 -0.5, %v8650_v7 }
 0x347   :  { %v5185_v48 = vpop.eup %5184  ;;  %3982 = vst.msk [vmem:[%s8870_s5 + $0x1b0] sm:$0xff] %vm2711_vm6, %v3918_v61  ;;  %v2192_v45 = vadd.f32 1.0, %v5183_v49  ;;  %5200 = vpow2.f32 %v3214_v30  ;;  %v3028_v22 = vand.u32 2147483647, %v8627_v0  ;;  %v3725_v14 = vand.u32 2147483647, %v8629_v33 }
 0x348   :  { %2767 = vst.msk [vmem:[%s8869_s4 + $0x1b8] sm:$0xff] %vm2711_vm6, %v2702_v11  ;;  %v2193_v42 = vadd.f32 1.0, %v5185_v48  ;;  %v8684_v24 = vadd.f32 %v4429_v16, %v9083_v23  ;;  %v8687_v8 = vadd.f32 %v4431_v3, %v9084_v59  ;;  %v2960_v6 = vsub.f32 %v2832_v15, %v2896_v32  ;;  %v9087_v48 = vld [vmem:[#allocation23_spill] sm:$0xff] }
 0x349   :  { %5202 = vrcp.f32 %v2192_v45  ;;  %v8689_v60 = vpop.eup %5186  ;;  %v4725_v19 = vunpack.i.l.bf16 %v8674_v58  ;;  %v3092_v28 = vsub.f32 0.0, %v3028_v22  ;;  %v3734_v43 = vand.u32 2147483647, %v8650_v7 }
 0x34a   :  { %5204 = vrcp.f32 %v2193_v42  ;;  %v2833_v51 = vmax.f32 %v8586_v27, 0.0  ;;  %v2897_v5 = vmul.f32 %v5304_v36, %v8586_v27  ;;  %v3737_v1 = vadd.f32 1.0, %v8689_v60 }
 0x34b   :  { %v5189_v62 = vpop.eup %5188  ;;  %v3724_v21 = vmul.f32 %v8629_v33, %v3723_v54  ;;  %v3732_v31 = vadd.f32 1.0, %v3731_v37  ;;  %v3216_v44 = vmul.f32 1.442695, %v3092_v28  ;;  %vm3726_vm12 = vcmp.lt.f32.partialorder %v3725_v14, 0.0004427343 }
 0x34c   :  { %v8699_v39 = vpop.eup %5190  ;;  %v3721_v52 = vmul.f32 0.6931472, %v5189_v62  ;;  %5206 = vlog2.f32 %v3737_v1  ;;  %v2834_v25 = vmax.f32 %v8590_v38, 0.0  ;;  %v2898_v33 = vmul.f32 %v5305_v55, %v8590_v38 }
 0x34d   :  { %v5193_v57 = vpop.eup %5192  ;;  %v3746_v40 = vadd.f32 1.0, %v8699_v39  ;;  %v4128_v9 = vmul.f32 -1.442695, %v8684_v24  ;;  %v3740_v32 = vmul.f32 -0.5, %v8689_v60  ;;  %v3733_v61 = vmul.f32 %v8650_v7, %v3732_v31 }
 0x34e   :  { %v5195_v53 = vpop.eup %5194  ;;  %v3727_v46 = vsel %vm3726_vm12, %v3724_v21, %v3721_v52  ;;  %v2703_v27 = vmul.f32 %v5193_v57, %v4715_v41  ;;  %vm8718_vm13 = vcmp.lt.f32.partialorder %v3734_v43, 0.0004427343  ;;  %v2961_v38 = vsub.f32 %v2833_v51, %v2897_v5 }
 0x34f   :  { %v3855_v13 = vadd.f32 %v3727_v46, %v8645_v10  ;;  %5208 = vlog2.f32 %v3746_v40  ;;  %v2194_v20 = vadd.f32 1.0, %v5195_v53  ;;  %v5197_v29 = vpop.eup %5196  ;;  %v3029_v3 = vand.u32 2147483647, %v8684_v24 }
 0x350   :  { %2768 = vst.msk [vmem:[%s8869_s4 + $0x1c0] sm:$0xff] %vm2711_vm6, %v2703_v27  ;;  %5210 = vpow2.f32 %v3216_v44  ;;  %v5199_v16 = vpop.eup %5198  ;;  %v2195_v35 = vadd.f32 1.0, %v5197_v29  ;;  %v3749_v15 = vmul.f32 -0.5, %v8699_v39  ;;  %v4129_v7 = vmul.f32 -1.442695, %v8687_v8 }
 0x351   :  { %v3919_v10 = vmul.f32 %v4711_v12, %v3855_v13  ;;  %5212 = vrcp.f32 %v2194_v20  ;;  %v8725_v49 = vpop.eup %5200  ;;  %v3730_v11 = vmul.f32 0.6931472, %v5199_v16  ;;  %v3741_v4 = vadd.f32 1.0, %v3740_v32 }
 0x352   :  { %5214 = vpow2.f32 %v4128_v9  ;;  %v3755_v12 = vadd.f32 1.0, %v8725_v49  ;;  %v4433_v54 = vadd.f32 %v8660_v34, %v9087_v48  ;;  %v3093_v22 = vsub.f32 0.0, %v3029_v3 }
 0x353   :  { %v5203_v30 = vpop.eup %5202  ;;  %3983 = vst.msk [vmem:[%s8870_s5 + $0x1b8] sm:$0xff] %vm2711_vm6, %v3919_v10  ;;  %5216 = vrcp.f32 %v2195_v35  ;;  %v3736_v37 = vsel %vm8718_vm13, %v3733_v61, %v3730_v11  ;;  %v3743_v23 = vand.u32 2147483647, %v8689_v60  ;;  %v2962_v34 = vsub.f32 %v2834_v25, %v2898_v33 }
 0x354   :  { %v5205_v45 = vpop.eup %5204  ;;  %v2704_v42 = vmul.f32 %v5203_v30, %v4716_v50  ;;  %5218 = vpow2.f32 %v4129_v7  ;;  %v3856_v14 = vadd.f32 %v3736_v37, %v2960_v6  ;;  %v3750_v28 = vadd.f32 1.0, %v3749_v15 }
 0x355   :  { %v2705_v59 = vmul.f32 %v5205_v45, %v4720_v18  ;;  %5220 = vlog2.f32 %v3755_v12  ;;  %v3752_v62 = vand.u32 2147483647, %v8699_v39  ;;  %v3218_v43 = vmul.f32 1.442695, %v3093_v22  ;;  %v5307_v22 = vld [vmem:[%s8868_s3 + $0x1e0] sm:$0xff] }
 0x356   :  { %2769 = vst.msk [vmem:[%s8869_s4 + $0x1c8] sm:$0xff] %vm2711_vm6, %v2704_v42  ;;  %v5207_v51 = vpop.eup %5206  ;;  %v3920_v6 = vmul.f32 %v4715_v41, %v3856_v14  ;;  %v3758_v36 = vmul.f32 -0.5, %v8725_v49  ;;  %v3030_v5 = vand.u32 2147483647, %v8687_v8  ;;  %v8757_v1 = vadd.f32 %v4433_v54, %v8062_v26  ;;  %v5306_v41 = vld [vmem:[%s8868_s3 + $0x1d8] sm:$0xff] }
 0x357   :  { %2770 = vst.msk [vmem:[%s8869_s4 + $0x1d0] sm:$0xff] %vm2711_vm6, %v2705_v59  ;;  %v3739_v52 = vmul.f32 0.6931472, %v5207_v51  ;;  %v3742_v21 = vmul.f32 %v8689_v60, %v3741_v4  ;;  %v2835_v31 = vmax.f32 %v8624_v17, 0.0  ;;  %5222 = vpow2.f32 %v3218_v43 }
 0x358   :  { %3984 = vst.msk [vmem:[%s8870_s5 + $0x1c0] sm:$0xff] %vm2711_vm6, %v3920_v6  ;;  %vm3744_vm14 = vcmp.lt.f32.partialorder %v3743_v23, 0.0004427343  ;;  %v2899_v26 = vmul.f32 %v5306_v41, %v8624_v17  ;;  %v3094_v57 = vsub.f32 0.0, %v3030_v5  ;;  %v4130_v25 = vmul.f32 -1.442695, %v8757_v1 }
 0x359   :  { %v5209_v44 = vpop.eup %5208  ;;  %v3745_v40 = vsel %vm3744_vm14, %v3742_v21, %v3739_v52  ;;  %v3751_v46 = vmul.f32 %v8699_v39, %v3750_v28  ;;  %vm3753_vm15 = vcmp.lt.f32.partialorder %v3752_v62, 0.0004427343  ;;  %v3759_v33 = vadd.f32 1.0, %v3758_v36  ;;  %v8810_v28 = vpop.permute.xlu1 %4728 }
 0x35a   :  { %v8770_v60 = vpop.eup %5210  ;;  %v3748_v53 = vmul.f32 0.6931472, %v5209_v44  ;;  %v3857_v55 = vadd.f32 %v3745_v40, %v2961_v38  ;;  %v3031_v13 = vand.u32 2147483647, %v8757_v1  ;;  %v3220_v29 = vmul.f32 1.442695, %v3094_v57 }
 0x35b   :  { %v5213_v27 = vpop.eup %5212  ;;  %v3764_v9 = vadd.f32 1.0, %v8770_v60  ;;  %5224 = vpow2.f32 %v4130_v25  ;;  %v3761_v16 = vand.u32 2147483647, %v8725_v49  ;;  %v3767_v7 = vmul.f32 -0.5, %v8770_v60  ;;  %v5308_v40 = vld [vmem:[%s8868_s3 + $0x1e8] sm:$0xff] }
 0x35c   :  { %v5215_v32 = vpop.eup %5214  ;;  %v3754_v20 = vsel %vm3753_vm15, %v3751_v46, %v3748_v53  ;;  %v2706_v17 = vmul.f32 %v5213_v27, %v4721_v47  ;;  %v3921_v63 = vmul.f32 %v4716_v50, %v3857_v55  ;;  %v3760_v50 = vmul.f32 %v8725_v49, %v3759_v33 }
 0x35d   :  { %v5217_v61 = vpop.eup %5216  ;;  %v3858_v39 = vadd.f32 %v3754_v20, %v2962_v34  ;;  %5226 = vlog2.f32 %v3764_v9  ;;  %v2196_v35 = vadd.f32 1.0, %v5215_v32  ;;  %v3095_v30 = vsub.f32 0.0, %v3031_v13 }
 0x35e   :  { %v5219_v38 = vpop.eup %5218  ;;  %2771 = vst.msk [vmem:[%s8869_s4 + $0x1d8] sm:$0xff] %vm2711_vm6, %v2706_v17  ;;  %v2707_v10 = vmul.f32 %v5217_v61, %v4725_v19  ;;  %5228 = vpow2.f32 %v3220_v29  ;;  %3985 = vst.msk [vmem:[%s8870_s5 + $0x1c8] sm:$0xff] %vm2711_vm6, %v3921_v63  ;;  %v2963_v4 = vsub.f32 %v2835_v31, %v2899_v26  ;;  %vm3762_vm0 = vcmp.lt.f32.partialorder %v3761_v16, 0.0004427343  ;;  %v5309_v63 = vld [vmem:[%s8868_s3 + $0x1f0] sm:$0xff] }
 0x35f   :  { %v5221_v3 = vpop.eup %5220  ;;  %v3922_v56 = vmul.f32 %v4720_v18, %v3858_v39  ;;  %v2197_v11 = vadd.f32 1.0, %v5219_v38  ;;  %5230 = vrcp.f32 %v2196_v35  ;;  %v3222_v12 = vmul.f32 1.442695, %v3095_v30 }
 0x360   :  { %v3757_v15 = vmul.f32 0.6931472, %v5221_v3  ;;  %2772 = vst.msk [vmem:[%s8869_s4 + $0x1e0] sm:$0xff] %vm2711_vm6, %v2707_v10  ;;  %v2836_v45 = vmax.f32 %v8627_v0, 0.0  ;;  %v3768_v37 = vadd.f32 1.0, %v3767_v7  ;;  %v2900_v14 = vmul.f32 %v5307_v22, %v8627_v0 }
 0x361   :  { %3986 = vst.msk [vmem:[%s8870_s5 + $0x1d0] sm:$0xff] %vm2711_vm6, %v3922_v56  ;;  %5232 = vrcp.f32 %v2197_v11  ;;  %v5223_v18 = vpop.eup %5222  ;;  %v3770_v23 = vand.u32 2147483647, %v8770_v60  ;;  %v4726_v62 = vunpack.i.h.bf16 %v8674_v58  ;;  %v4730_v52 = vunpack.i.l.bf16 %v8810_v28 }
 0x362   :  { %v3763_v49 = vsel %vm3762_vm0, %v3760_v50, %v3757_v15  ;;  %v3773_v54 = vadd.f32 1.0, %v5223_v18  ;;  %5234 = vpow2.f32 %v3222_v12  ;;  %v3769_v51 = vmul.f32 %v8770_v60, %v3768_v37 }
 0x363   :  { %v3859_v48 = vadd.f32 %v3763_v49, %v2963_v4  ;;  %v3776_v0 = vmul.f32 -0.5, %v5223_v18  ;;  %v2964_v6 = vsub.f32 %v2836_v45, %v2900_v14  ;;  %vm3771_vm1 = vcmp.lt.f32.partialorder %v3770_v23, 0.0004427343  ;;  %v5310_v4 = vld [vmem:[%s8868_s3 + $0x1f8] sm:$0xff] }
 0x364   :  { %5236 = vlog2.f32 %v3773_v54  ;;  %v2837_v60 = vmax.f32 %v8684_v24, 0.0  ;;  %v2901_v53 = vmul.f32 %v5308_v40, %v8684_v24  ;;  %v3779_v46 = vand.u32 2147483647, %v5223_v18 }
 0x365   :  { %v3923_v42 = vmul.f32 %v4721_v47, %v3859_v48  ;;  %v5225_v59 = vpop.eup %5224  ;;  %v3777_v26 = vadd.f32 1.0, %v3776_v0  ;;  %v4731_v24 = vunpack.i.h.bf16 %v8810_v28  ;;  %v2838_v61 = vmax.f32 %v8687_v8, 0.0 }
 0x366   :  { %v2198_v2 = vadd.f32 1.0, %v5225_v59  ;;  %v2965_v13 = vsub.f32 %v2837_v60, %v2901_v53  ;;  %vm3780_vm2 = vcmp.lt.f32.partialorder %v3779_v46, 0.0004427343  ;;  %v2902_v39 = vmul.f32 %v5309_v63, %v8687_v8 }
 0x367   :  { %v5227_v34 = vpop.eup %5226  ;;  %3987 = vst.msk [vmem:[%s8870_s5 + $0x1d8] sm:$0xff] %vm2711_vm6, %v3923_v42  ;;  %v3778_v9 = vmul.f32 %v5223_v18, %v3777_v26  ;;  %v2839_v30 = vmax.f32 %v8757_v1, 0.0  ;;  %v2903_v18 = vmul.f32 %v5310_v4, %v8757_v1 }
 0x368   :  { %v5229_v47 = vpop.eup %5228  ;;  %v3766_v43 = vmul.f32 0.6931472, %v5227_v34  ;;  %5238 = vrcp.f32 %v2198_v2  ;;  %v2966_v11 = vsub.f32 %v2838_v61, %v2902_v39 }
 0x369   :  { %v3782_v36 = vadd.f32 1.0, %v5229_v47  ;;  %v5231_v5 = vpop.eup %5230  ;;  %v3785_v58 = vmul.f32 -0.5, %v5229_v47  ;;  %v3788_v16 = vand.u32 2147483647, %v5229_v47  ;;  %v2967_v37 = vsub.f32 %v2839_v30, %v2903_v18 }
 0x36a   :  { %v3772_v21 = vsel %vm3771_vm1, %v3769_v51, %v3766_v43  ;;  %v2708_v41 = vmul.f32 %v5231_v5, %v4726_v62 }
 0x36b   :  { %v5233_v31 = vpop.eup %5232  ;;  %v3860_v44 = vadd.f32 %v3772_v21, %v2964_v6  ;;  %5240 = vlog2.f32 %v3782_v36  ;;  %v3786_v20 = vadd.f32 1.0, %v3785_v58  ;;  %vm3789_vm3 = vcmp.lt.f32.partialorder %v3788_v16, 0.0004427343 }
 0x36c   :  { %v2709_v57 = vmul.f32 %v5233_v31, %v4730_v52  ;;  %2773 = vst.msk [vmem:[%s8869_s4 + $0x1e8] sm:$0xff] %vm2711_vm6, %v2708_v41  ;;  %v5235_v27 = vpop.eup %5234 }
 0x36d   :  { %v3924_v25 = vmul.f32 %v4725_v19, %v3860_v44  ;;  %v3791_v55 = vadd.f32 1.0, %v5235_v27  ;;  %v3794_v10 = vmul.f32 -0.5, %v5235_v27  ;;  %v3787_v50 = vmul.f32 %v5229_v47, %v3786_v20 }
 0x36e   :  { %2774 = vst.msk [vmem:[%s8869_s4 + $0x1f0] sm:$0xff] %vm2711_vm6, %v2709_v57  ;;  %v5237_v19 = vpop.eup %5236  ;;  %v3797_v49 = vand.u32 2147483647, %v5235_v27 }
 0x36f   :  { %3988 = vst.msk [vmem:[%s8870_s5 + $0x1e0] sm:$0xff] %vm2711_vm6, %v3924_v25  ;;  %v3775_v33 = vmul.f32 0.6931472, %v5237_v19  ;;  %5242 = vlog2.f32 %v3791_v55  ;;  %v3795_v15 = vadd.f32 1.0, %v3794_v10 }
 0x370   :  { %vm3798_vm4 = vcmp.lt.f32.partialorder %v3797_v49, 0.0004427343 }
 0x371   :  { %v3781_v32 = vsel %vm3780_vm2, %v3778_v9, %v3775_v33  ;;  %v3796_v45 = vmul.f32 %v5235_v27, %v3795_v15 }
 0x372   :  { %v5239_v17 = vpop.eup %5238  ;;  %v3861_v29 = vadd.f32 %v3781_v32, %v2965_v13 }
 0x373   :  { %v2710_v38 = vmul.f32 %v5239_v17, %v4731_v24 }
 0x374   :  { %v3925_v3 = vmul.f32 %v4726_v62, %v3861_v29 }
 0x375   :  { %v5241_v35 = vpop.eup %5240  ;;  %2775 = vst.msk [vmem:[%s8869_s4 + $0x1f8] sm:$0xff] %vm2711_vm6, %v2710_v38 }
 0x376   :  { %v3784_v56 = vmul.f32 0.6931472, %v5241_v35  ;;  %3989 = vst.msk [vmem:[%s8870_s5 + $0x1e8] sm:$0xff] %vm2711_vm6, %v3925_v3 }
 0x378   :  { %v3790_v8 = vsel %vm3789_vm3, %v3787_v50, %v3784_v56 }
 0x379   :  { %v3862_v7 = vadd.f32 %v3790_v8, %v2966_v11  ;;  %v5243_v12 = vpop.eup %5242 }
 0x37a   :  { %v3793_v54 = vmul.f32 0.6931472, %v5243_v12 }
 0x37b   :  { %v3926_v48 = vmul.f32 %v4730_v52, %v3862_v7 }
 0x37c   :  { %v3799_v42 = vsel %vm3798_vm4, %v3796_v45, %v3793_v54 }
 0x37d   :  { %3990 = vst.msk [vmem:[%s8870_s5 + $0x1f0] sm:$0xff] %vm2711_vm6, %v3926_v48  ;;  %v3863_v22 = vadd.f32 %v3799_v42, %v2967_v37 }
 0x37f   :  { %v3927_v14 = vmul.f32 %v4731_v24, %v3863_v22 }
 0x381   :  { %3991 = vst.msk [vmem:[%s8870_s5 + $0x1f8] sm:$0xff] %vm2711_vm6, %v3927_v14 }
 0x382   :  { %4000 = vsyncpa [#allocation3], 1 }
 0x383   :  { %4001 = vsyncpa [#allocation5], 1 }

</bundles_post_ra>
